<compile_context>
chip_gen: v7x
topology: tpu7x:2x2x1
jax: 0.10.0
libtpu: 0.0.40
codegen_flags: <defaults>
</compile_context>

<pallas_src>
import functools
import math

import jax
import jax.numpy as jnp
from jax.experimental import pallas as pl
from jax.experimental.pallas import tpu as pltpu


LN_EPS = 1e-5


# ---------------------------------------------------------------------------
# In-kernel helpers
# ---------------------------------------------------------------------------
def _layernorm(x, gamma, beta, eps=LN_EPS):
    mean = jnp.mean(x, axis=-1, keepdims=True)
    xc = x - mean
    var = jnp.mean(xc * xc, axis=-1, keepdims=True)
    return xc * jax.lax.rsqrt(var + eps) * gamma + beta


# ---------------------------------------------------------------------------
# Pallas kernel: full decoder stack (layer axis is a grid axis; the
# activation block stays resident in a fp32 VMEM carry across layers)
# ---------------------------------------------------------------------------
def decoder_stack_kernel(x_ref, wqkv_ref, bqkv_ref, wo_ref, bo_ref,
                         w1_ref, b1_ref, w2_ref, b2_ref,
                         ln1_g_ref, ln1_b_ref, ln2_g_ref, ln2_b_ref,
                         fln_g_ref, fln_b_ref,
                         out_ref, carry_ref, *, nhead):
    layer = pl.program_id(1)
    n_layers = pl.num_programs(1)
    Bt, S, D = x_ref.shape
    hd = D // nhead
    R = Bt * S

    # Load activations into the fp32 carry only on the first layer step.
    @pl.when(layer == 0)
    def _():
        carry_ref[...] = x_ref[...].astype(jnp.float32).reshape(R, D)

    x = carry_ref[...]                       # (R, D) fp32
    x_bf = x.astype(jnp.bfloat16)

    # ---- fused QKV projection (1/sqrt(hd) pre-folded into Q columns) -----
    qkv = jnp.dot(x_bf, wqkv_ref[...],
                  preferred_element_type=jnp.float32) + bqkv_ref[...]
    q = qkv[:, :D]
    k = qkv[:, D:2 * D]
    v = qkv[:, 2 * D:]

    # causal mask, built directly at (Bt, S, S) -> no bool broadcasts later
    row = jax.lax.broadcasted_iota(jnp.int32, (Bt, S, S), 1)
    col = jax.lax.broadcasted_iota(jnp.int32, (Bt, S, S), 2)
    allowed = col <= row
    neg = jnp.float32(-1e30)

    # ---- causal multi-head self-attention ---------------------------------
    # Static per-head loop (small), each head batched over the whole batch
    # block via 3-D einsums that contract over the last dims (no .T on K).
    head_outs = []
    for h in range(nhead):
        c0 = h * hd
        qh = q[:, c0:c0 + hd].reshape(Bt, S, hd).astype(jnp.bfloat16)
        kh = k[:, c0:c0 + hd].reshape(Bt, S, hd).astype(jnp.bfloat16)
        vh = v[:, c0:c0 + hd].reshape(Bt, S, hd).astype(jnp.bfloat16)

        s = jnp.einsum('bqd,bkd->bqk', qh, kh,
                       preferred_element_type=jnp.float32)     # (Bt, S, S)
        s = jnp.where(allowed, s, neg)
        s = s - jnp.max(s, axis=-1, keepdims=True)
        p = jnp.exp(s)
        p = p * pl.reciprocal(jnp.sum(p, axis=-1, keepdims=True), approx=True)

        oh = jnp.einsum('bqk,bkd->bqd', p.astype(jnp.bfloat16), vh,
                        preferred_element_type=jnp.float32)    # (Bt, S, hd)
        head_outs.append(oh.reshape(R, hd))

    # lane-contiguous head assembly + single full-depth output projection
    o = jnp.concatenate(head_outs, axis=-1)                    # (R, D)
    attn = jnp.dot(o.astype(jnp.bfloat16), wo_ref[...],
                   preferred_element_type=jnp.float32) + bo_ref[...]

    # post-norm: x1 = norm1(x + sa(x))     (dropout1 = identity, eval mode)
    x1 = _layernorm(x + attn, ln1_g_ref[...], ln1_b_ref[...])

    # ---- feed-forward: relu(x1 @ w1 + b1) @ w2 + b2 ------------------------
    h1 = jnp.dot(x1.astype(jnp.bfloat16), w1_ref[...],
                 preferred_element_type=jnp.float32) + b1_ref[...]
    h1 = jnp.maximum(h1, 0.0)               # F.relu (default activation)
    h2 = jnp.dot(h1.astype(jnp.bfloat16), w2_ref[...],
                 preferred_element_type=jnp.float32) + b2_ref[...]

    # x2 = norm2(x1 + ff(x1))              (dropout / dropout2 = identity)
    x2 = _layernorm(x1 + h2, ln2_g_ref[...], ln2_b_ref[...])

    carry_ref[...] = x2

    # Final DecoderOnly.norm fused into the last layer step.
    @pl.when(layer == n_layers - 1)
    def _():
        y = _layernorm(x2, fln_g_ref[...], fln_b_ref[...])
        out_ref[...] = y.reshape(Bt, S, D).astype(out_ref.dtype)


# ---------------------------------------------------------------------------
# Wrapper
# ---------------------------------------------------------------------------
def decoder_only_forward(x, sp, final_ln, nhead, *,
                         batch_block=None,
                         vmem_limit_bytes=48 * 1024 * 1024):
    B, S, D = x.shape
    L = sp["wqkv"].shape[0]
    Dff = sp["w1"].shape[2]
    Bt = B if batch_block is None else batch_block
    assert B % Bt == 0, "batch must be divisible by batch_block"

    kernel = functools.partial(decoder_stack_kernel, nhead=nhead)

    def w3(shape):
        # layer-stacked weight/bias: leading L dim indexed by the layer grid
        # axis and squeezed out of the kernel ref
        return pl.BlockSpec((None,) + shape, lambda b, l: (l, 0, 0))

    in_specs = [
        pl.BlockSpec((Bt, S, D), lambda b, l: (b, 0, 0)),   # x (read at l==0)
        w3((D, 3 * D)), w3((1, 3 * D)),                     # wqkv, bqkv
        w3((D, D)),     w3((1, D)),                         # wo, bo
        w3((D, Dff)),   w3((1, Dff)),                       # w1, b1
        w3((Dff, D)),   w3((1, D)),                         # w2, b2
        w3((1, D)), w3((1, D)),                             # ln1 gamma/beta
        w3((1, D)), w3((1, D)),                             # ln2 gamma/beta
        pl.BlockSpec((1, D), lambda b, l: (0, 0)),          # final-ln gamma
        pl.BlockSpec((1, D), lambda b, l: (0, 0)),          # final-ln beta
    ]

    return pl.pallas_call(
        kernel,
        out_shape=jax.ShapeDtypeStruct((B, S, D), x.dtype),
        grid=(B // Bt, L),
        in_specs=in_specs,
        out_specs=pl.BlockSpec((Bt, S, D), lambda b, l: (b, 0, 0)),
        scratch_shapes=[pltpu.VMEM((Bt * S, D), jnp.float32)],   # layer carry
        compiler_params=pltpu.CompilerParams(
            # batch axis parallel (megacore / v7x dual-TC), layer axis is the
            # sequential carry axis
            dimension_semantics=("parallel", "arbitrary"),
            # below v7x's 64 MiB physical VMEM, above v5e/v6e scoped defaults
            vmem_limit_bytes=vmem_limit_bytes),
    )(x, sp["wqkv"], sp["bqkv"], sp["wo"], sp["bo"],
      sp["w1"], sp["b1"], sp["w2"], sp["b2"],
      sp["ln1_g"], sp["ln1_b"], sp["ln2_g"], sp["ln2_b"],
      final_ln["g"], final_ln["b"])


# ---------------------------------------------------------------------------
# Parameter init (xavier_uniform for dim>1 weights, small random biases,
# near-identity LayerNorms) and kernel-side parameter prep (stack over layers)
# ---------------------------------------------------------------------------
def xavier_uniform(key, shape):
    fan_in, fan_out = shape
    bound = math.sqrt(6.0 / (fan_in + fan_out))
    return jax.random.uniform(key, shape, jnp.float32, -bound, bound)


def init_layer_params(key, d_model, d_ff):
    ks = jax.random.split(key, 12)
    u = lambda k, shape, b: jax.random.uniform(k, shape, jnp.float32, -b, b)
    return {
        "wqkv": xavier_uniform(ks[0], (d_model, 3 * d_model)),
        "bqkv": u(ks[1], (3 * d_model,), 0.02),
        "wo":   xavier_uniform(ks[2], (d_model, d_model)),
        "bo":   u(ks[3], (d_model,), 0.02),
        "w1":   xavier_uniform(ks[4], (d_model, d_ff)),
        "b1":   u(ks[5], (d_ff,), 0.02),
        "w2":   xavier_uniform(ks[6], (d_ff, d_model)),
        "b2":   u(ks[7], (d_model,), 0.02),
        "ln1_g": 1.0 + u(ks[8], (d_model,), 0.05),
        "ln1_b": u(ks[9], (d_model,), 0.05),
        "ln2_g": 1.0 + u(ks[10], (d_model,), 0.05),
        "ln2_b": u(ks[11], (d_model,), 0.05),
    }


def prepare_stacked_params(raw_layers, nhead):
    """Stack per-layer params along a leading L axis; bf16 weights, fp32
    biases / LN params; fold 1/sqrt(hd) into the Q columns of wqkv/bqkv."""
    D = raw_layers[0]["wqkv"].shape[0]
    hd = D // nhead
    scale = 1.0 / math.sqrt(hd)
    col_scale = jnp.concatenate(
        [jnp.full((D,), scale, jnp.float32), jnp.ones((2 * D,), jnp.float32)])
    r2 = lambda a: a.reshape(1, -1).astype(jnp.float32)
    stk = lambda name, fn: jnp.stack([fn(p[name]) for p in raw_layers])
    return {
        "wqkv": stk("wqkv", lambda w: (w * col_scale[None, :]).astype(jnp.bfloat16)),
        "bqkv": stk("bqkv", lambda b: r2(b * col_scale)),
        "wo":   stk("wo", lambda w: w.astype(jnp.bfloat16)),
        "bo":   stk("bo", r2),
        "w1":   stk("w1", lambda w: w.astype(jnp.bfloat16)),
        "b1":   stk("b1", r2),
        "w2":   stk("w2", lambda w: w.astype(jnp.bfloat16)),
        "b2":   stk("b2", r2),
        "ln1_g": stk("ln1_g", r2), "ln1_b": stk("ln1_b", r2),
        "ln2_g": stk("ln2_g", r2), "ln2_b": stk("ln2_b", r2),
    }


# ---------------------------------------------------------------------------
# Pure-JAX fp32 reference (same math; weights rounded through bf16 to match
# the kernel's weight storage; activations stay fp32)
# ---------------------------------------------------------------------------
def _bf16_round(w):
    return w.astype(jnp.bfloat16).astype(jnp.float32)


def _ln_ref(z, g, b):
    m = z.mean(-1, keepdims=True)
    va = ((z - m) ** 2).mean(-1, keepdims=True)
    return (z - m) / jnp.sqrt(va + LN_EPS) * g + b


def ref_layer(x, p, nhead):
    B, S, D = x.shape
    hd = D // nhead
    qkv = x @ _bf16_round(p["wqkv"]) + p["bqkv"]
    q, k, v = qkv[..., :D], qkv[..., D:2 * D], qkv[..., 2 * D:]
    q = q / math.sqrt(hd)
    qh = q.reshape(B, S, nhead, hd).transpose(0, 2, 1, 3)
    kh = k.reshape(B, S, nhead, hd).transpose(0, 2, 1, 3)
    vh = v.reshape(B, S, nhead, hd).transpose(0, 2, 1, 3)
    s = jnp.einsum("bhqd,bhkd->bhqk", qh, kh)
    s = s + jnp.triu(jnp.full((S, S), -jnp.inf), k=1)
    a = jax.nn.softmax(s, axis=-1)
    o = jnp.einsum("bhqk,bhkd->bhqd", a, vh).transpose(0, 2, 1, 3).reshape(B, S, D)
    o = o @ _bf16_round(p["wo"]) + p["bo"]

    x1 = _ln_ref(x + o, p["ln1_g"], p["ln1_b"])
    h = jnp.maximum(x1 @ _bf16_round(p["w1"]) + p["b1"], 0.0)
    x2 = _ln_ref(x1 + h @ _bf16_round(p["w2"]) + p["b2"],
                 p["ln2_g"], p["ln2_b"])
    return x2


def ref_forward(x, layer_params, final_ln, nhead):
    out = x
    for p in layer_params:
        out = ref_layer(out, p, nhead)
    return _ln_ref(out, final_ln["g"], final_ln["b"])


# ---------------------------------------------------------------------------
if __name__ == "__main__":
    # Small shapes consistent with the module: batch=4, seq=8, d_model=128
    # (lane-aligned), nhead=4, dim_feedforward at the layer default 2048.
    B, S = 4, 8
    d_model, nhead, d_ff, num_layers = 128, 4, 2048, 2
    # Even 2-step parallel batch axis: feeds both TensorCores on v7x; costs a
    # single ~0.35 us extra grid step on single-TC v5e/v6e at these shapes.
    batch_block = 2

    key = jax.random.PRNGKey(0)
    keys = jax.random.split(key, num_layers + 3)
    k_x, k_fg, k_fb = keys[0], keys[1], keys[2]
    k_layers = keys[3:]

    x = jax.random.normal(k_x, (B, S, d_model), jnp.float32)
    raw_layers = [init_layer_params(k, d_model, d_ff) for k in k_layers]
    final_ln_raw = {
        "g": 1.0 + jax.random.uniform(k_fg, (d_model,), jnp.float32, -0.05, 0.05),
        "b": jax.random.uniform(k_fb, (d_model,), jnp.float32, -0.05, 0.05),
    }

    stacked = prepare_stacked_params(raw_layers, nhead)
    final_ln_kp = {"g": final_ln_raw["g"].reshape(1, -1),
                   "b": final_ln_raw["b"].reshape(1, -1)}

    # TODO(synk): tgt_key_padding_mask is not supported (test passes None,
    # matching the default); dropout layers are treated as identity (eval).

    out = decoder_only_forward(x, stacked, final_ln_kp, nhead,
                               batch_block=batch_block)
    out = jax.block_until_ready(out)

    ref = ref_forward(x, raw_layers, final_ln_raw, nhead)
    err = float(jnp.max(jnp.abs(out - ref)))
    assert out.shape == (B, S, d_model)
    assert jnp.allclose(out, ref, atol=5e-2, rtol=5e-2), f"max err = {err}"

    print("KERNEL_OK")
</pallas_src>

<mosaic_0001>
module attributes {stable_mosaic.version = 11 : i64} {
  func.func @decoder_stack_kernel(%arg0: i32, %arg1: i32, %arg2: memref<2x8x128xf32, #tpu.memory_space<vmem>>, %arg3: memref<1x128x384xbf16, #tpu.memory_space<vmem>>, %arg4: memref<1x1x384xf32, #tpu.memory_space<vmem>>, %arg5: memref<1x128x128xbf16, #tpu.memory_space<vmem>>, %arg6: memref<1x1x128xf32, #tpu.memory_space<vmem>>, %arg7: memref<1x128x2048xbf16, #tpu.memory_space<vmem>>, %arg8: memref<1x1x2048xf32, #tpu.memory_space<vmem>>, %arg9: memref<1x2048x128xbf16, #tpu.memory_space<vmem>>, %arg10: memref<1x1x128xf32, #tpu.memory_space<vmem>>, %arg11: memref<1x1x128xf32, #tpu.memory_space<vmem>>, %arg12: memref<1x1x128xf32, #tpu.memory_space<vmem>>, %arg13: memref<1x1x128xf32, #tpu.memory_space<vmem>>, %arg14: memref<1x1x128xf32, #tpu.memory_space<vmem>>, %arg15: memref<1x128xf32, #tpu.memory_space<vmem>>, %arg16: memref<1x128xf32, #tpu.memory_space<vmem>>, %arg17: memref<2x8x128xf32, #tpu.memory_space<vmem>>, %arg18: memref<16x128xf32, #tpu.memory_space<vmem>>) attributes {dimension_semantics = [#tpu.dimension_semantics<parallel>, #tpu.dimension_semantics<arbitrary>], iteration_bounds = array<i64: 2, 2>, scalar_prefetch = 0 : i64, scratch_operands = 1 : i64, tpu.core_type = #tpu.core_type<tc>, window_params = [{transform_indices = @transform_0, window_bounds = array<i64: 2, 8, 128>}, {transform_indices = @transform_1, window_bounds = array<i64: 1, 128, 384>}, {transform_indices = @transform_2, window_bounds = array<i64: 1, 1, 384>}, {transform_indices = @transform_3, window_bounds = array<i64: 1, 128, 128>}, {transform_indices = @transform_4, window_bounds = array<i64: 1, 1, 128>}, {transform_indices = @transform_5, window_bounds = array<i64: 1, 128, 2048>}, {transform_indices = @transform_6, window_bounds = array<i64: 1, 1, 2048>}, {transform_indices = @transform_7, window_bounds = array<i64: 1, 2048, 128>}, {transform_indices = @transform_8, window_bounds = array<i64: 1, 1, 128>}, {transform_indices = @transform_9, window_bounds = array<i64: 1, 1, 128>}, {transform_indices = @transform_10, window_bounds = array<i64: 1, 1, 128>}, {transform_indices = @transform_11, window_bounds = array<i64: 1, 1, 128>}, {transform_indices = @transform_12, window_bounds = array<i64: 1, 1, 128>}, {pipeline_mode = #tpu.pipeline_mode<synchronous>, transform_indices = @transform_13, window_bounds = array<i64: 1, 128>}, {pipeline_mode = #tpu.pipeline_mode<synchronous>, transform_indices = @transform_14, window_bounds = array<i64: 1, 128>}, {transform_indices = @transform_15, window_bounds = array<i64: 2, 8, 128>}]} {
    %c0_i32 = arith.constant 0 : i32
    %0 = arith.cmpi eq, %arg1, %c0_i32 : i32
    %1 = arith.extui %0 : i1 to i32
    %c0_i32_0 = arith.constant 0 : i32
    %2 = arith.cmpi ne, %1, %c0_i32_0 : i32
    scf.if %2 {
      %c0_75 = arith.constant 0 : index
      %c0_76 = arith.constant 0 : index
      %c0_77 = arith.constant 0 : index
      %199 = vector.load %arg2[%c0_75, %c0_76, %c0_77] : memref<2x8x128xf32, #tpu.memory_space<vmem>>, vector<2x8x128xf32>
      %200 = vector.shape_cast %199 : vector<2x8x128xf32> to vector<16x128xf32>
      %c0_78 = arith.constant 0 : index
      %c0_79 = arith.constant 0 : index
      %201 = vector.load %arg18[%c0_78, %c0_79] : memref<16x128xf32, #tpu.memory_space<vmem>>, vector<16x128xf32>
      tpu.vector_store %arg18[%c0_78, %c0_79], %200 {strides = array<i32>} : memref<16x128xf32, #tpu.memory_space<vmem>>, vector<16x128xf32>,
    } else {
    }
    %c0 = arith.constant 0 : index
    %c0_1 = arith.constant 0 : index
    %3 = vector.load %arg18[%c0, %c0_1] : memref<16x128xf32, #tpu.memory_space<vmem>>, vector<16x128xf32>
    %4 = arith.truncf %3 : vector<16x128xf32> to vector<16x128xbf16>
    %c0_2 = arith.constant 0 : index
    %c0_3 = arith.constant 0 : index
    %c0_4 = arith.constant 0 : index
    %5 = vector.load %arg3[%c0_2, %c0_3, %c0_4] : memref<1x128x384xbf16, #tpu.memory_space<vmem>>, vector<1x128x384xbf16>
    %6 = vector.shape_cast %5 : vector<1x128x384xbf16> to vector<128x384xbf16>
    %cst = arith.constant dense<0.000000e+00> : vector<16x384xf32>
    %7 = tpu.matmul %4, %6, %cst {dimension_numbers = #tpu.dot_dimension_numbers<[1], [0], [0], [1], [0, 0, 1, 1], [], []>} : vector<16x128xbf16>, vector<128x384xbf16>, vector<16x384xf32> -> vector<16x384xf32>
    %c0_5 = arith.constant 0 : index
    %c0_6 = arith.constant 0 : index
    %c0_7 = arith.constant 0 : index
    %8 = vector.load %arg4[%c0_5, %c0_6, %c0_7] : memref<1x1x384xf32, #tpu.memory_space<vmem>>, vector<1x1x384xf32>
    %9 = vector.shape_cast %8 : vector<1x1x384xf32> to vector<1x384xf32>
    %10 = vector.broadcast %9 : vector<1x384xf32> to vector<16x384xf32>
    %11 = arith.addf %7, %10 : vector<16x384xf32>
    %12 = vector.extract_strided_slice %11 {offsets = [0, 0], sizes = [16, 128], strides = [1, 1]} : vector<16x384xf32> to vector<16x128xf32>
    %13 = vector.extract_strided_slice %11 {offsets = [0, 128], sizes = [16, 128], strides = [1, 1]} : vector<16x384xf32> to vector<16x128xf32>
    %14 = vector.extract_strided_slice %11 {offsets = [0, 256], sizes = [16, 128], strides = [1, 1]} : vector<16x384xf32> to vector<16x128xf32>
    %15 = tpu.iota {dimensions = array<i32: 1>} : vector<2x8x8xi32>
    %16 = tpu.iota {dimensions = array<i32: 2>} : vector<2x8x8xi32>
    %17 = arith.cmpi sle, %16, %15 : vector<2x8x8xi32>
    %18 = vector.extract_strided_slice %12 {offsets = [0, 0], sizes = [16, 32], strides = [1, 1]} : vector<16x128xf32> to vector<16x32xf32>
    %19 = vector.shape_cast %18 : vector<16x32xf32> to vector<2x8x32xf32>
    %20 = arith.truncf %19 : vector<2x8x32xf32> to vector<2x8x32xbf16>
    %21 = vector.extract_strided_slice %13 {offsets = [0, 0], sizes = [16, 32], strides = [1, 1]} : vector<16x128xf32> to vector<16x32xf32>
    %22 = vector.shape_cast %21 : vector<16x32xf32> to vector<2x8x32xf32>
    %23 = arith.truncf %22 : vector<2x8x32xf32> to vector<2x8x32xbf16>
    %24 = vector.extract_strided_slice %14 {offsets = [0, 0], sizes = [16, 32], strides = [1, 1]} : vector<16x128xf32> to vector<16x32xf32>
    %25 = vector.shape_cast %24 : vector<16x32xf32> to vector<2x8x32xf32>
    %26 = arith.truncf %25 : vector<2x8x32xf32> to vector<2x8x32xbf16>
    "tpu.trace_start"() <{level = 10 : i32, message = "bqd,bkd->bqk"}> : () -> ()
    %cst_8 = arith.constant dense<0.000000e+00> : vector<2x8x8xf32>
    %27 = tpu.matmul %20, %23, %cst_8 {dimension_numbers = #tpu.dot_dimension_numbers<[2], [2], [1], [1], [0, 0, 0, 1, 1, 1], [0], [0]>} : vector<2x8x32xbf16>, vector<2x8x32xbf16>, vector<2x8x8xf32> -> vector<2x8x8xf32>
    %cst_9 = arith.constant -1.000000e+30 : f32
    "tpu.trace_stop"() : () -> ()
    %28 = vector.broadcast %cst_9 : f32 to vector<2x8x8xf32>
    %29 = arith.select %17, %27, %28 : vector<2x8x8xi1>, vector<2x8x8xf32>
    %cst_10 = arith.constant dense<0xFF800000> : vector<2x8xf32>
    %30 = vector.multi_reduction <maximumf>, %29, %cst_10 [2] : vector<2x8x8xf32> to vector<2x8xf32>
    %31 = vector.shape_cast %30 : vector<2x8xf32> to vector<2x8x1xf32>
    %32 = vector.broadcast %31 : vector<2x8x1xf32> to vector<2x8x8xf32>
    %33 = arith.subf %29, %32 : vector<2x8x8xf32>
    %34 = math.exp %33 : vector<2x8x8xf32>
    %cst_11 = arith.constant dense<0.000000e+00> : vector<2x8xf32>
    %35 = vector.multi_reduction <add>, %34, %cst_11 [2] : vector<2x8x8xf32> to vector<2x8xf32>
    %36 = vector.shape_cast %35 : vector<2x8xf32> to vector<2x8x1xf32>
    %37 = tpu.reciprocal %36 {approx = true} : vector<2x8x1xf32> -> vector<2x8x1xf32>
    %38 = vector.broadcast %37 : vector<2x8x1xf32> to vector<2x8x8xf32>
    %39 = arith.mulf %34, %38 : vector<2x8x8xf32>
    %40 = arith.truncf %39 : vector<2x8x8xf32> to vector<2x8x8xbf16>
    "tpu.trace_start"() <{level = 10 : i32, message = "bqk,bkd->bqd"}> : () -> ()
    %cst_12 = arith.constant dense<0.000000e+00> : vector<2x8x32xf32>
    %41 = tpu.matmul %40, %26, %cst_12 {dimension_numbers = #tpu.dot_dimension_numbers<[2], [1], [1], [2], [0, 0, 0, 1, 1, 2], [0], [0]>} : vector<2x8x8xbf16>, vector<2x8x32xbf16>, vector<2x8x32xf32> -> vector<2x8x32xf32>
    "tpu.trace_stop"() : () -> ()
    %42 = vector.shape_cast %41 : vector<2x8x32xf32> to vector<16x32xf32>
    %43 = vector.extract_strided_slice %12 {offsets = [0, 32], sizes = [16, 32], strides = [1, 1]} : vector<16x128xf32> to vector<16x32xf32>
    %44 = vector.shape_cast %43 : vector<16x32xf32> to vector<2x8x32xf32>
    %45 = arith.truncf %44 : vector<2x8x32xf32> to vector<2x8x32xbf16>
    %46 = vector.extract_strided_slice %13 {offsets = [0, 32], sizes = [16, 32], strides = [1, 1]} : vector<16x128xf32> to vector<16x32xf32>
    %47 = vector.shape_cast %46 : vector<16x32xf32> to vector<2x8x32xf32>
    %48 = arith.truncf %47 : vector<2x8x32xf32> to vector<2x8x32xbf16>
    %49 = vector.extract_strided_slice %14 {offsets = [0, 32], sizes = [16, 32], strides = [1, 1]} : vector<16x128xf32> to vector<16x32xf32>
    %50 = vector.shape_cast %49 : vector<16x32xf32> to vector<2x8x32xf32>
    %51 = arith.truncf %50 : vector<2x8x32xf32> to vector<2x8x32xbf16>
    "tpu.trace_start"() <{level = 10 : i32, message = "bqd,bkd->bqk"}> : () -> ()
    %cst_13 = arith.constant dense<0.000000e+00> : vector<2x8x8xf32>
    %52 = tpu.matmul %45, %48, %cst_13 {dimension_numbers = #tpu.dot_dimension_numbers<[2], [2], [1], [1], [0, 0, 0, 1, 1, 1], [0], [0]>} : vector<2x8x32xbf16>, vector<2x8x32xbf16>, vector<2x8x8xf32> -> vector<2x8x8xf32>
    %cst_14 = arith.constant -1.000000e+30 : f32
    "tpu.trace_stop"() : () -> ()
    %53 = vector.broadcast %cst_14 : f32 to vector<2x8x8xf32>
    %54 = arith.select %17, %52, %53 : vector<2x8x8xi1>, vector<2x8x8xf32>
    %cst_15 = arith.constant dense<0xFF800000> : vector<2x8xf32>
    %55 = vector.multi_reduction <maximumf>, %54, %cst_15 [2] : vector<2x8x8xf32> to vector<2x8xf32>
    %56 = vector.shape_cast %55 : vector<2x8xf32> to vector<2x8x1xf32>
    %57 = vector.broadcast %56 : vector<2x8x1xf32> to vector<2x8x8xf32>
    %58 = arith.subf %54, %57 : vector<2x8x8xf32>
    %59 = math.exp %58 : vector<2x8x8xf32>
    %cst_16 = arith.constant dense<0.000000e+00> : vector<2x8xf32>
    %60 = vector.multi_reduction <add>, %59, %cst_16 [2] : vector<2x8x8xf32> to vector<2x8xf32>
    %61 = vector.shape_cast %60 : vector<2x8xf32> to vector<2x8x1xf32>
    %62 = tpu.reciprocal %61 {approx = true} : vector<2x8x1xf32> -> vector<2x8x1xf32>
    %63 = vector.broadcast %62 : vector<2x8x1xf32> to vector<2x8x8xf32>
    %64 = arith.mulf %59, %63 : vector<2x8x8xf32>
    %65 = arith.truncf %64 : vector<2x8x8xf32> to vector<2x8x8xbf16>
    "tpu.trace_start"() <{level = 10 : i32, message = "bqk,bkd->bqd"}> : () -> ()
    %cst_17 = arith.constant dense<0.000000e+00> : vector<2x8x32xf32>
    %66 = tpu.matmul %65, %51, %cst_17 {dimension_numbers = #tpu.dot_dimension_numbers<[2], [1], [1], [2], [0, 0, 0, 1, 1, 2], [0], [0]>} : vector<2x8x8xbf16>, vector<2x8x32xbf16>, vector<2x8x32xf32> -> vector<2x8x32xf32>
    "tpu.trace_stop"() : () -> ()
    %67 = vector.shape_cast %66 : vector<2x8x32xf32> to vector<16x32xf32>
    %68 = vector.extract_strided_slice %12 {offsets = [0, 64], sizes = [16, 32], strides = [1, 1]} : vector<16x128xf32> to vector<16x32xf32>
    %69 = vector.shape_cast %68 : vector<16x32xf32> to vector<2x8x32xf32>
    %70 = arith.truncf %69 : vector<2x8x32xf32> to vector<2x8x32xbf16>
    %71 = vector.extract_strided_slice %13 {offsets = [0, 64], sizes = [16, 32], strides = [1, 1]} : vector<16x128xf32> to vector<16x32xf32>
    %72 = vector.shape_cast %71 : vector<16x32xf32> to vector<2x8x32xf32>
    %73 = arith.truncf %72 : vector<2x8x32xf32> to vector<2x8x32xbf16>
    %74 = vector.extract_strided_slice %14 {offsets = [0, 64], sizes = [16, 32], strides = [1, 1]} : vector<16x128xf32> to vector<16x32xf32>
    %75 = vector.shape_cast %74 : vector<16x32xf32> to vector<2x8x32xf32>
    %76 = arith.truncf %75 : vector<2x8x32xf32> to vector<2x8x32xbf16>
    "tpu.trace_start"() <{level = 10 : i32, message = "bqd,bkd->bqk"}> : () -> ()
    %cst_18 = arith.constant dense<0.000000e+00> : vector<2x8x8xf32>
    %77 = tpu.matmul %70, %73, %cst_18 {dimension_numbers = #tpu.dot_dimension_numbers<[2], [2], [1], [1], [0, 0, 0, 1, 1, 1], [0], [0]>} : vector<2x8x32xbf16>, vector<2x8x32xbf16>, vector<2x8x8xf32> -> vector<2x8x8xf32>
    %cst_19 = arith.constant -1.000000e+30 : f32
    "tpu.trace_stop"() : () -> ()
    %78 = vector.broadcast %cst_19 : f32 to vector<2x8x8xf32>
    %79 = arith.select %17, %77, %78 : vector<2x8x8xi1>, vector<2x8x8xf32>
    %cst_20 = arith.constant dense<0xFF800000> : vector<2x8xf32>
    %80 = vector.multi_reduction <maximumf>, %79, %cst_20 [2] : vector<2x8x8xf32> to vector<2x8xf32>
    %81 = vector.shape_cast %80 : vector<2x8xf32> to vector<2x8x1xf32>
    %82 = vector.broadcast %81 : vector<2x8x1xf32> to vector<2x8x8xf32>
    %83 = arith.subf %79, %82 : vector<2x8x8xf32>
    %84 = math.exp %83 : vector<2x8x8xf32>
    %cst_21 = arith.constant dense<0.000000e+00> : vector<2x8xf32>
    %85 = vector.multi_reduction <add>, %84, %cst_21 [2] : vector<2x8x8xf32> to vector<2x8xf32>
    %86 = vector.shape_cast %85 : vector<2x8xf32> to vector<2x8x1xf32>
    %87 = tpu.reciprocal %86 {approx = true} : vector<2x8x1xf32> -> vector<2x8x1xf32>
    %88 = vector.broadcast %87 : vector<2x8x1xf32> to vector<2x8x8xf32>
    %89 = arith.mulf %84, %88 : vector<2x8x8xf32>
    %90 = arith.truncf %89 : vector<2x8x8xf32> to vector<2x8x8xbf16>
    "tpu.trace_start"() <{level = 10 : i32, message = "bqk,bkd->bqd"}> : () -> ()
    %cst_22 = arith.constant dense<0.000000e+00> : vector<2x8x32xf32>
    %91 = tpu.matmul %90, %76, %cst_22 {dimension_numbers = #tpu.dot_dimension_numbers<[2], [1], [1], [2], [0, 0, 0, 1, 1, 2], [0], [0]>} : vector<2x8x8xbf16>, vector<2x8x32xbf16>, vector<2x8x32xf32> -> vector<2x8x32xf32>
    "tpu.trace_stop"() : () -> ()
    %92 = vector.shape_cast %91 : vector<2x8x32xf32> to vector<16x32xf32>
    %93 = vector.extract_strided_slice %12 {offsets = [0, 96], sizes = [16, 32], strides = [1, 1]} : vector<16x128xf32> to vector<16x32xf32>
    %94 = vector.shape_cast %93 : vector<16x32xf32> to vector<2x8x32xf32>
    %95 = arith.truncf %94 : vector<2x8x32xf32> to vector<2x8x32xbf16>
    %96 = vector.extract_strided_slice %13 {offsets = [0, 96], sizes = [16, 32], strides = [1, 1]} : vector<16x128xf32> to vector<16x32xf32>
    %97 = vector.shape_cast %96 : vector<16x32xf32> to vector<2x8x32xf32>
    %98 = arith.truncf %97 : vector<2x8x32xf32> to vector<2x8x32xbf16>
    %99 = vector.extract_strided_slice %14 {offsets = [0, 96], sizes = [16, 32], strides = [1, 1]} : vector<16x128xf32> to vector<16x32xf32>
    %100 = vector.shape_cast %99 : vector<16x32xf32> to vector<2x8x32xf32>
    %101 = arith.truncf %100 : vector<2x8x32xf32> to vector<2x8x32xbf16>
    "tpu.trace_start"() <{level = 10 : i32, message = "bqd,bkd->bqk"}> : () -> ()
    %cst_23 = arith.constant dense<0.000000e+00> : vector<2x8x8xf32>
    %102 = tpu.matmul %95, %98, %cst_23 {dimension_numbers = #tpu.dot_dimension_numbers<[2], [2], [1], [1], [0, 0, 0, 1, 1, 1], [0], [0]>} : vector<2x8x32xbf16>, vector<2x8x32xbf16>, vector<2x8x8xf32> -> vector<2x8x8xf32>
    %cst_24 = arith.constant -1.000000e+30 : f32
    "tpu.trace_stop"() : () -> ()
    %103 = vector.broadcast %cst_24 : f32 to vector<2x8x8xf32>
    %104 = arith.select %17, %102, %103 : vector<2x8x8xi1>, vector<2x8x8xf32>
    %cst_25 = arith.constant dense<0xFF800000> : vector<2x8xf32>
    %105 = vector.multi_reduction <maximumf>, %104, %cst_25 [2] : vector<2x8x8xf32> to vector<2x8xf32>
    %106 = vector.shape_cast %105 : vector<2x8xf32> to vector<2x8x1xf32>
    %107 = vector.broadcast %106 : vector<2x8x1xf32> to vector<2x8x8xf32>
    %108 = arith.subf %104, %107 : vector<2x8x8xf32>
    %109 = math.exp %108 : vector<2x8x8xf32>
    %cst_26 = arith.constant dense<0.000000e+00> : vector<2x8xf32>
    %110 = vector.multi_reduction <add>, %109, %cst_26 [2] : vector<2x8x8xf32> to vector<2x8xf32>
    %111 = vector.shape_cast %110 : vector<2x8xf32> to vector<2x8x1xf32>
    %112 = tpu.reciprocal %111 {approx = true} : vector<2x8x1xf32> -> vector<2x8x1xf32>
    %113 = vector.broadcast %112 : vector<2x8x1xf32> to vector<2x8x8xf32>
    %114 = arith.mulf %109, %113 : vector<2x8x8xf32>
    %115 = arith.truncf %114 : vector<2x8x8xf32> to vector<2x8x8xbf16>
    "tpu.trace_start"() <{level = 10 : i32, message = "bqk,bkd->bqd"}> : () -> ()
    %cst_27 = arith.constant dense<0.000000e+00> : vector<2x8x32xf32>
    %116 = tpu.matmul %115, %101, %cst_27 {dimension_numbers = #tpu.dot_dimension_numbers<[2], [1], [1], [2], [0, 0, 0, 1, 1, 2], [0], [0]>} : vector<2x8x8xbf16>, vector<2x8x32xbf16>, vector<2x8x32xf32> -> vector<2x8x32xf32>
    "tpu.trace_stop"() : () -> ()
    %117 = vector.shape_cast %116 : vector<2x8x32xf32> to vector<16x32xf32>
    %118 = tpu.concatenate %42, %67, %92, %117 in 1 : vector<16x32xf32>, vector<16x32xf32>, vector<16x32xf32>, vector<16x32xf32> -> vector<16x128xf32>
    %119 = arith.truncf %118 : vector<16x128xf32> to vector<16x128xbf16>
    %c0_28 = arith.constant 0 : index
    %c0_29 = arith.constant 0 : index
    %c0_30 = arith.constant 0 : index
    %120 = vector.load %arg5[%c0_28, %c0_29, %c0_30] : memref<1x128x128xbf16, #tpu.memory_space<vmem>>, vector<1x128x128xbf16>
    %121 = vector.shape_cast %120 : vector<1x128x128xbf16> to vector<128x128xbf16>
    %cst_31 = arith.constant dense<0.000000e+00> : vector<16x128xf32>
    %122 = tpu.matmul %119, %121, %cst_31 {dimension_numbers = #tpu.dot_dimension_numbers<[1], [0], [0], [1], [0, 0, 1, 1], [], []>} : vector<16x128xbf16>, vector<128x128xbf16>, vector<16x128xf32> -> vector<16x128xf32>
    %c0_32 = arith.constant 0 : index
    %c0_33 = arith.constant 0 : index
    %c0_34 = arith.constant 0 : index
    %123 = vector.load %arg6[%c0_32, %c0_33, %c0_34] : memref<1x1x128xf32, #tpu.memory_space<vmem>>, vector<1x1x128xf32>
    %124 = vector.shape_cast %123 : vector<1x1x128xf32> to vector<1x128xf32>
    %125 = vector.broadcast %124 : vector<1x128xf32> to vector<16x128xf32>
    %126 = arith.addf %122, %125 : vector<16x128xf32>
    %127 = arith.addf %3, %126 : vector<16x128xf32>
    %c0_35 = arith.constant 0 : index
    %c0_36 = arith.constant 0 : index
    %c0_37 = arith.constant 0 : index
    %128 = vector.load %arg11[%c0_35, %c0_36, %c0_37] : memref<1x1x128xf32, #tpu.memory_space<vmem>>, vector<1x1x128xf32>
    %129 = vector.shape_cast %128 : vector<1x1x128xf32> to vector<1x128xf32>
    %c0_38 = arith.constant 0 : index
    %c0_39 = arith.constant 0 : index
    %c0_40 = arith.constant 0 : index
    %130 = vector.load %arg12[%c0_38, %c0_39, %c0_40] : memref<1x1x128xf32, #tpu.memory_space<vmem>>, vector<1x1x128xf32>
    %131 = vector.shape_cast %130 : vector<1x1x128xf32> to vector<1x128xf32>
    %cst_41 = arith.constant dense<0.000000e+00> : vector<16xf32>
    %132 = vector.multi_reduction <add>, %127, %cst_41 [1] : vector<16x128xf32> to vector<16xf32>
    %133 = vector.shape_cast %132 : vector<16xf32> to vector<16x1xf32>
    %cst_42 = arith.constant 1.280000e+02 : f32
    %134 = vector.broadcast %cst_42 : f32 to vector<16x1xf32>
    %135 = arith.divf %133, %134 : vector<16x1xf32>
    %136 = vector.broadcast %135 : vector<16x1xf32> to vector<16x128xf32>
    %137 = arith.subf %127, %136 : vector<16x128xf32>
    %138 = arith.mulf %137, %137 : vector<16x128xf32>
    %cst_43 = arith.constant dense<0.000000e+00> : vector<16xf32>
    %139 = vector.multi_reduction <add>, %138, %cst_43 [1] : vector<16x128xf32> to vector<16xf32>
    %140 = vector.shape_cast %139 : vector<16xf32> to vector<16x1xf32>
    %cst_44 = arith.constant 1.280000e+02 : f32
    %141 = vector.broadcast %cst_44 : f32 to vector<16x1xf32>
    %142 = arith.divf %140, %141 : vector<16x1xf32>
    %cst_45 = arith.constant 9.99999974E-6 : f32
    %143 = vector.broadcast %cst_45 : f32 to vector<16x1xf32>
    %144 = arith.addf %142, %143 : vector<16x1xf32>
    %145 = math.rsqrt %144 : vector<16x1xf32>
    %146 = vector.broadcast %145 : vector<16x1xf32> to vector<16x128xf32>
    %147 = arith.mulf %137, %146 : vector<16x128xf32>
    %148 = vector.broadcast %129 : vector<1x128xf32> to vector<16x128xf32>
    %149 = arith.mulf %147, %148 : vector<16x128xf32>
    %150 = vector.broadcast %131 : vector<1x128xf32> to vector<16x128xf32>
    %151 = arith.addf %149, %150 : vector<16x128xf32>
    %152 = arith.truncf %151 : vector<16x128xf32> to vector<16x128xbf16>
    %c0_46 = arith.constant 0 : index
    %c0_47 = arith.constant 0 : index
    %c0_48 = arith.constant 0 : index
    %153 = vector.load %arg7[%c0_46, %c0_47, %c0_48] : memref<1x128x2048xbf16, #tpu.memory_space<vmem>>, vector<1x128x2048xbf16>
    %154 = vector.shape_cast %153 : vector<1x128x2048xbf16> to vector<128x2048xbf16>
    %cst_49 = arith.constant dense<0.000000e+00> : vector<16x2048xf32>
    %155 = tpu.matmul %152, %154, %cst_49 {dimension_numbers = #tpu.dot_dimension_numbers<[1], [0], [0], [1], [0, 0, 1, 1], [], []>} : vector<16x128xbf16>, vector<128x2048xbf16>, vector<16x2048xf32> -> vector<16x2048xf32>
    %c0_50 = arith.constant 0 : index
    %c0_51 = arith.constant 0 : index
    %c0_52 = arith.constant 0 : index
    %156 = vector.load %arg8[%c0_50, %c0_51, %c0_52] : memref<1x1x2048xf32, #tpu.memory_space<vmem>>, vector<1x1x2048xf32>
    %157 = vector.shape_cast %156 : vector<1x1x2048xf32> to vector<1x2048xf32>
    %158 = vector.broadcast %157 : vector<1x2048xf32> to vector<16x2048xf32>
    %159 = arith.addf %155, %158 : vector<16x2048xf32>
    %cst_53 = arith.constant 0.000000e+00 : f32
    %160 = vector.broadcast %cst_53 : f32 to vector<16x2048xf32>
    %161 = arith.maximumf %159, %160 : vector<16x2048xf32>
    %162 = arith.truncf %161 : vector<16x2048xf32> to vector<16x2048xbf16>
    %c0_54 = arith.constant 0 : index
    %c0_55 = arith.constant 0 : index
    %c0_56 = arith.constant 0 : index
    %163 = vector.load %arg9[%c0_54, %c0_55, %c0_56] : memref<1x2048x128xbf16, #tpu.memory_space<vmem>>, vector<1x2048x128xbf16>
    %164 = vector.shape_cast %163 : vector<1x2048x128xbf16> to vector<2048x128xbf16>
    %cst_57 = arith.constant dense<0.000000e+00> : vector<16x128xf32>
    %165 = tpu.matmul %162, %164, %cst_57 {dimension_numbers = #tpu.dot_dimension_numbers<[1], [0], [0], [1], [0, 0, 1, 1], [], []>} : vector<16x2048xbf16>, vector<2048x128xbf16>, vector<16x128xf32> -> vector<16x128xf32>
    %c0_58 = arith.constant 0 : index
    %c0_59 = arith.constant 0 : index
    %c0_60 = arith.constant 0 : index
    %166 = vector.load %arg10[%c0_58, %c0_59, %c0_60] : memref<1x1x128xf32, #tpu.memory_space<vmem>>, vector<1x1x128xf32>
    %167 = vector.shape_cast %166 : vector<1x1x128xf32> to vector<1x128xf32>
    %168 = vector.broadcast %167 : vector<1x128xf32> to vector<16x128xf32>
    %169 = arith.addf %165, %168 : vector<16x128xf32>
    %170 = arith.addf %151, %169 : vector<16x128xf32>
    %c0_61 = arith.constant 0 : index
    %c0_62 = arith.constant 0 : index
    %c0_63 = arith.constant 0 : index
    %171 = vector.load %arg13[%c0_61, %c0_62, %c0_63] : memref<1x1x128xf32, #tpu.memory_space<vmem>>, vector<1x1x128xf32>
    %172 = vector.shape_cast %171 : vector<1x1x128xf32> to vector<1x128xf32>
    %c0_64 = arith.constant 0 : index
    %c0_65 = arith.constant 0 : index
    %c0_66 = arith.constant 0 : index
    %173 = vector.load %arg14[%c0_64, %c0_65, %c0_66] : memref<1x1x128xf32, #tpu.memory_space<vmem>>, vector<1x1x128xf32>
    %174 = vector.shape_cast %173 : vector<1x1x128xf32> to vector<1x128xf32>
    %cst_67 = arith.constant dense<0.000000e+00> : vector<16xf32>
    %175 = vector.multi_reduction <add>, %170, %cst_67 [1] : vector<16x128xf32> to vector<16xf32>
    %176 = vector.shape_cast %175 : vector<16xf32> to vector<16x1xf32>
    %cst_68 = arith.constant 1.280000e+02 : f32
    %177 = vector.broadcast %cst_68 : f32 to vector<16x1xf32>
    %178 = arith.divf %176, %177 : vector<16x1xf32>
    %179 = vector.broadcast %178 : vector<16x1xf32> to vector<16x128xf32>
    %180 = arith.subf %170, %179 : vector<16x128xf32>
    %181 = arith.mulf %180, %180 : vector<16x128xf32>
    %cst_69 = arith.constant dense<0.000000e+00> : vector<16xf32>
    %182 = vector.multi_reduction <add>, %181, %cst_69 [1] : vector<16x128xf32> to vector<16xf32>
    %183 = vector.shape_cast %182 : vector<16xf32> to vector<16x1xf32>
    %cst_70 = arith.constant 1.280000e+02 : f32
    %184 = vector.broadcast %cst_70 : f32 to vector<16x1xf32>
    %185 = arith.divf %183, %184 : vector<16x1xf32>
    %cst_71 = arith.constant 9.99999974E-6 : f32
    %186 = vector.broadcast %cst_71 : f32 to vector<16x1xf32>
    %187 = arith.addf %185, %186 : vector<16x1xf32>
    %188 = math.rsqrt %187 : vector<16x1xf32>
    %189 = vector.broadcast %188 : vector<16x1xf32> to vector<16x128xf32>
    %190 = arith.mulf %180, %189 : vector<16x128xf32>
    %191 = vector.broadcast %172 : vector<1x128xf32> to vector<16x128xf32>
    %192 = arith.mulf %190, %191 : vector<16x128xf32>
    %193 = vector.broadcast %174 : vector<1x128xf32> to vector<16x128xf32>
    %194 = arith.addf %192, %193 : vector<16x128xf32>
    %c0_72 = arith.constant 0 : index
    %c0_73 = arith.constant 0 : index
    %195 = vector.load %arg18[%c0_72, %c0_73] : memref<16x128xf32, #tpu.memory_space<vmem>>, vector<16x128xf32>
    tpu.vector_store %arg18[%c0_72, %c0_73], %194 {strides = array<i32>} : memref<16x128xf32, #tpu.memory_space<vmem>>, vector<16x128xf32>,
    %c1_i32 = arith.constant 1 : i32
    %196 = arith.cmpi eq, %arg1, %c1_i32 : i32
    %197 = arith.extui %196 : i1 to i32
    %c0_i32_74 = arith.constant 0 : i32
    %198 = arith.cmpi ne, %197, %c0_i32_74 : i32
    scf.if %198 {
      %c0_75 = arith.constant 0 : index
      %c0_76 = arith.constant 0 : index
      %199 = vector.load %arg15[%c0_75, %c0_76] : memref<1x128xf32, #tpu.memory_space<vmem>>, vector<1x128xf32>
      %c0_77 = arith.constant 0 : index
      %c0_78 = arith.constant 0 : index
      %200 = vector.load %arg16[%c0_77, %c0_78] : memref<1x128xf32, #tpu.memory_space<vmem>>, vector<1x128xf32>
      %cst_79 = arith.constant dense<0.000000e+00> : vector<16xf32>
      %201 = vector.multi_reduction <add>, %194, %cst_79 [1] : vector<16x128xf32> to vector<16xf32>
      %202 = vector.shape_cast %201 : vector<16xf32> to vector<16x1xf32>
      %cst_80 = arith.constant 1.280000e+02 : f32
      %203 = vector.broadcast %cst_80 : f32 to vector<16x1xf32>
      %204 = arith.divf %202, %203 : vector<16x1xf32>
      %205 = vector.broadcast %204 : vector<16x1xf32> to vector<16x128xf32>
      %206 = arith.subf %194, %205 : vector<16x128xf32>
      %207 = arith.mulf %206, %206 : vector<16x128xf32>
      %cst_81 = arith.constant dense<0.000000e+00> : vector<16xf32>
      %208 = vector.multi_reduction <add>, %207, %cst_81 [1] : vector<16x128xf32> to vector<16xf32>
      %209 = vector.shape_cast %208 : vector<16xf32> to vector<16x1xf32>
      %cst_82 = arith.constant 1.280000e+02 : f32
      %210 = vector.broadcast %cst_82 : f32 to vector<16x1xf32>
      %211 = arith.divf %209, %210 : vector<16x1xf32>
      %cst_83 = arith.constant 9.99999974E-6 : f32
      %212 = vector.broadcast %cst_83 : f32 to vector<16x1xf32>
      %213 = arith.addf %211, %212 : vector<16x1xf32>
      %214 = math.rsqrt %213 : vector<16x1xf32>
      %215 = vector.broadcast %214 : vector<16x1xf32> to vector<16x128xf32>
      %216 = arith.mulf %206, %215 : vector<16x128xf32>
      %217 = vector.broadcast %199 : vector<1x128xf32> to vector<16x128xf32>
      %218 = arith.mulf %216, %217 : vector<16x128xf32>
      %219 = vector.broadcast %200 : vector<1x128xf32> to vector<16x128xf32>
      %220 = arith.addf %218, %219 : vector<16x128xf32>
      %221 = vector.shape_cast %220 : vector<16x128xf32> to vector<2x8x128xf32>
      %c0_84 = arith.constant 0 : index
      %c0_85 = arith.constant 0 : index
      %c0_86 = arith.constant 0 : index
      %222 = vector.load %arg17[%c0_84, %c0_85, %c0_86] : memref<2x8x128xf32, #tpu.memory_space<vmem>>, vector<2x8x128xf32>
      tpu.vector_store %arg17[%c0_84, %c0_85, %c0_86], %221 {strides = array<i32>} : memref<2x8x128xf32, #tpu.memory_space<vmem>>, vector<2x8x128xf32>,
    } else {
    }
    return
  }
  func.func @transform_0(%arg0: i32, %arg1: i32) -> (i32, i32, i32) {
    %c0_i32 = arith.constant 0 : i32
    %c0_i32_0 = arith.constant 0 : i32
    %c0_i32_1 = arith.constant 0 : i32
    return %arg0, %c0_i32, %c0_i32_0 : i32, i32, i32
  }
  func.func @transform_1(%arg0: i32, %arg1: i32) -> (i32, i32, i32) {
    %c0_i32 = arith.constant 0 : i32
    %c0_i32_0 = arith.constant 0 : i32
    %c0_i32_1 = arith.constant 0 : i32
    return %arg1, %c0_i32, %c0_i32_0 : i32, i32, i32
  }
  func.func @transform_2(%arg0: i32, %arg1: i32) -> (i32, i32, i32) {
    %c0_i32 = arith.constant 0 : i32
    %c0_i32_0 = arith.constant 0 : i32
    %c0_i32_1 = arith.constant 0 : i32
    return %arg1, %c0_i32, %c0_i32_0 : i32, i32, i32
  }
  func.func @transform_3(%arg0: i32, %arg1: i32) -> (i32, i32, i32) {
    %c0_i32 = arith.constant 0 : i32
    %c0_i32_0 = arith.constant 0 : i32
    %c0_i32_1 = arith.constant 0 : i32
    return %arg1, %c0_i32, %c0_i32_0 : i32, i32, i32
  }
  func.func @transform_4(%arg0: i32, %arg1: i32) -> (i32, i32, i32) {
    %c0_i32 = arith.constant 0 : i32
    %c0_i32_0 = arith.constant 0 : i32
    %c0_i32_1 = arith.constant 0 : i32
    return %arg1, %c0_i32, %c0_i32_0 : i32, i32, i32
  }
  func.func @transform_5(%arg0: i32, %arg1: i32) -> (i32, i32, i32) {
    %c0_i32 = arith.constant 0 : i32
    %c0_i32_0 = arith.constant 0 : i32
    %c0_i32_1 = arith.constant 0 : i32
    return %arg1, %c0_i32, %c0_i32_0 : i32, i32, i32
  }
  func.func @transform_6(%arg0: i32, %arg1: i32) -> (i32, i32, i32) {
    %c0_i32 = arith.constant 0 : i32
    %c0_i32_0 = arith.constant 0 : i32
    %c0_i32_1 = arith.constant 0 : i32
    return %arg1, %c0_i32, %c0_i32_0 : i32, i32, i32
  }
  func.func @transform_7(%arg0: i32, %arg1: i32) -> (i32, i32, i32) {
    %c0_i32 = arith.constant 0 : i32
    %c0_i32_0 = arith.constant 0 : i32
    %c0_i32_1 = arith.constant 0 : i32
    return %arg1, %c0_i32, %c0_i32_0 : i32, i32, i32
  }
  func.func @transform_8(%arg0: i32, %arg1: i32) -> (i32, i32, i32) {
    %c0_i32 = arith.constant 0 : i32
    %c0_i32_0 = arith.constant 0 : i32
    %c0_i32_1 = arith.constant 0 : i32
    return %arg1, %c0_i32, %c0_i32_0 : i32, i32, i32
  }
  func.func @transform_9(%arg0: i32, %arg1: i32) -> (i32, i32, i32) {
    %c0_i32 = arith.constant 0 : i32
    %c0_i32_0 = arith.constant 0 : i32
    %c0_i32_1 = arith.constant 0 : i32
    return %arg1, %c0_i32, %c0_i32_0 : i32, i32, i32
  }
  func.func @transform_10(%arg0: i32, %arg1: i32) -> (i32, i32, i32) {
    %c0_i32 = arith.constant 0 : i32
    %c0_i32_0 = arith.constant 0 : i32
    %c0_i32_1 = arith.constant 0 : i32
    return %arg1, %c0_i32, %c0_i32_0 : i32, i32, i32
  }
  func.func @transform_11(%arg0: i32, %arg1: i32) -> (i32, i32, i32) {
    %c0_i32 = arith.constant 0 : i32
    %c0_i32_0 = arith.constant 0 : i32
    %c0_i32_1 = arith.constant 0 : i32
    return %arg1, %c0_i32, %c0_i32_0 : i32, i32, i32
  }
  func.func @transform_12(%arg0: i32, %arg1: i32) -> (i32, i32, i32) {
    %c0_i32 = arith.constant 0 : i32
    %c0_i32_0 = arith.constant 0 : i32
    %c0_i32_1 = arith.constant 0 : i32
    return %arg1, %c0_i32, %c0_i32_0 : i32, i32, i32
  }
  func.func @transform_13(%arg0: i32, %arg1: i32) -> (i32, i32) {
    %c0_i32 = arith.constant 0 : i32
    %c0_i32_0 = arith.constant 0 : i32
    %c0_i32_1 = arith.constant 0 : i32
    return %c0_i32, %c0_i32_0 : i32, i32
  }
  func.func @transform_14(%arg0: i32, %arg1: i32) -> (i32, i32) {
    %c0_i32 = arith.constant 0 : i32
    %c0_i32_0 = arith.constant 0 : i32
    %c0_i32_1 = arith.constant 0 : i32
    return %c0_i32, %c0_i32_0 : i32, i32
  }
  func.func @transform_15(%arg0: i32, %arg1: i32) -> (i32, i32, i32) {
    %c0_i32 = arith.constant 0 : i32
    %c0_i32_0 = arith.constant 0 : i32
    %c0_i32_1 = arith.constant 0 : i32
    return %arg0, %c0_i32, %c0_i32_0 : i32, i32, i32
  }
}

</mosaic_0001>

<bundles_post_ra>
// kernel: tpu_custom_call.1
= control target key start
LH: loop header
LB: loop body
LE: loop exit
PB: predicated region body
PF: predicated region fallthrough
CT: control target
= control target key end

     0   :  { %s7816_s0 = inlined_call_operand.hbm [shape: f32[4,8,128], index: 0, kind: input, shape index: {}]   ;;  %s7817_s1 = inlined_call_operand.hbm [shape: bf16[2,128,384], index: 1, kind: input, shape index: {}]   ;;  %s7818_s2 = inlined_call_operand.vmem [shape: f32[2,1,384], index: 2, kind: input, shape index: {}]   ;;  %s7819_s3 = inlined_call_operand.hbm [shape: bf16[2,128,128], index: 3, kind: input, shape index: {}]   ;;  %s7820_s4 = inlined_call_operand.vmem [shape: f32[2,1,128], index: 4, kind: input, shape index: {}]   ;;  %s7821_s5 = inlined_call_operand.hbm [shape: bf16[2,128,2048], index: 5, kind: input, shape index: {}]   ;;  %s7822_s6 = inlined_call_operand.hbm [shape: f32[2,1,2048], index: 6, kind: input, shape index: {}]   ;;  %s7823_s7 = inlined_call_operand.hbm [shape: bf16[2,2048,128], index: 7, kind: input, shape index: {}]   ;;  %s7824_s8 = inlined_call_operand.vmem [shape: f32[2,1,128], index: 8, kind: input, shape index: {}]   ;;  %s7825_s9 = inlined_call_operand.vmem [shape: f32[2,1,128], index: 9, kind: input, shape index: {}]   ;;  %s7826_s10 = inlined_call_operand.vmem [shape: f32[2,1,128], index: 10, kind: input, shape index: {}]   ;;  %s7827_s11 = inlined_call_operand.vmem [shape: f32[2,1,128], index: 11, kind: input, shape index: {}]   ;;  %s7828_s12 = inlined_call_operand.vmem [shape: f32[2,1,128], index: 12, kind: input, shape index: {}]   ;;  %s7829_s13 = inlined_call_operand.vmem [shape: f32[1,128], index: 13, kind: input, shape index: {}]   ;;  %s7830_s14 = inlined_call_operand.vmem [shape: f32[1,128], index: 14, kind: input, shape index: {}]   ;;  %s7831_s15 = inlined_call_operand.hbm [shape: f32[4,8,128], index: 15, kind: output, shape index: {}]  }
   0x1   :  { %7862 = sst [smem:[#allocation37_spill]] %s7816_s0 }
   0x2   :  { %7863 = sst [smem:[#allocation38_spill]] %s7817_s1 }
   0x3   :  { %7864 = sst [smem:[#allocation39_spill]] %s7818_s2 }
   0x4   :  { %7865 = sst [smem:[#allocation40_spill]] %s7819_s3 }
   0x5   :  { %7866 = sst [smem:[#allocation41_spill]] %s7820_s4 }
   0x6   :  { %7867 = sst [smem:[#allocation42_spill]] %s7821_s5 }
   0x7   :  { %7868 = sst [smem:[#allocation43_spill]] %s7822_s6 }
   0x8   :  { %7869 = sst [smem:[#allocation44_spill]] %s7823_s7 }
   0x9   :  { %7870 = sst [smem:[#allocation45_spill]] %s7824_s8 }
   0xa   :  { %7871 = sst [smem:[#allocation46_spill]] %s7825_s9 }
   0xb   :  { %7872 = sst [smem:[#allocation47_spill]] %s7826_s10 }
   0xc   :  { %7873 = sst [smem:[#allocation48_spill]] %s7827_s11 }
   0xd   :  { %7874 = sst [smem:[#allocation49_spill]] %s7828_s12 }
   0xe   :  { %7875 = sst [smem:[#allocation50_spill]] %s7829_s13 }
   0xf   :  { %7876 = sst [smem:[#allocation51_spill]] %s7830_s14 }
  0x10   :  { %7877 = sst [smem:[#allocation52_spill]] %s7831_s15 }
  0x11   :  { %20 = vsyncpa [#allocation4], 0 }
  0x12   :  { %22 = vsyncpa [#allocation4 + $0x1], 0 }
  0x13   :  { %23 = vsyncpa [#allocation7], 0 }
  0x14   :  { %25 = vsyncpa [#allocation7 + $0x1], 0 }
  0x15   :  { %26 = vsyncpa [#allocation10], 0 }
  0x16   :  { %28 = vsyncpa [#allocation10 + $0x1], 0 }
  0x17   :  { %29 = vsyncpa [#allocation13], 0 }
  0x18   :  { %31 = vsyncpa [#allocation13 + $0x1], 0 }
  0x19   :  { %32 = vsyncpa [#allocation5], 0 }
  0x1a   :  { %34 = vsyncpa [#allocation5 + $0x1], 0  ;;  %s6651_s18 = smov 0   ;;  %s6653_s19 = smov 0  }
  0x1b   :  { %s6655_s20 = smov 0   ;;  %s6657_s21 = smov 0  }
  0x1c   :  { %s6659_s22 = smov 0   ;;  %s6661_s23 = smov 0  }
  0x1d   :  { %s6663_s24 = smov 0   ;;  %s6665_s25 = smov 0  }
  0x1e   :  { %s6667_s26 = smov 0   ;;  %s6669_s27 = smov 0  }
  0x1f   :  { %s6671_s28 = smov 0  }
  0x20 LB: > { %7878 = sst [smem:[#allocation20_spill]] %s6511_s19  ;;  %p7834_p0 = scmp.eq.s32.totalorder %s6547_s28, 0  ;;  %s6547_s28 = sphi %s6671_s28, %s40_s28   ;;  %s6543_s27 = sphi %s6669_s27, %s7966_s27   ;;  %s6539_s26 = sphi %s6667_s26, %s7965_s26   ;;  %s6535_s25 = sphi %s6665_s25, %s7964_s25   ;;  %s6531_s24 = sphi %s6663_s24, %s7963_s24   ;;  %s6527_s23 = sphi %s6661_s23, %s7962_s23   ;;  %s6523_s22 = sphi %s6659_s22, %s7961_s22   ;;  %s6519_s21 = sphi %s6657_s21, %s7960_s21   ;;  %s6515_s20 = sphi %s6655_s20, %s7959_s20   ;;  %s6511_s19 = sphi %s6653_s19, %s7958_s19   ;;  %s6507_s18 = sphi %s6651_s18, %s7957_s18  }
  0x21   : > { %7879 = sst [smem:[#allocation21_spill]] %s6515_s20  ;;  %p92_p1 = scmp.ne.s32.totalorder %s6515_s20, %s6511_s19 }
  0x22   : > { %7880 = sst [smem:[#allocation22_spill]] %s6519_s21  ;;  %p7833_p3 = scmp.lt.s32.totalorder %s6547_s28, 4 }
  0x23   : > { %7881 = sst [smem:[#allocation23_spill]] %s6523_s22  ;;  %p94_p4 = por %p92_p1, %p7834_p0 }
  0x24   : > { %7882 = sst [smem:[#allocation24_spill]] %s6527_s23  ;;  %s6717_s16 = sand.u32 1, %s6515_s20  }
  0x25   : > { %7883 = sst [smem:[#allocation25_spill]] %s6531_s24  ;;  %s5858_s17 = smul.u32 192, %s6717_s16 }
  0x26   : > { %7884 = sst [smem:[#allocation26_spill]] %s6535_s25  ;;  %p6722_p5 = pnand %p7833_p3, %p94_p4 }
  0x27   : > { %7885 = sst [smem:[#allocation27_spill]] %s6539_s26  ;;  %s5859_s25 = smul.u32 3072, %s6539_s26 }
  0x28   : > { %7886 = sst [smem:[#allocation28_spill]] %s6543_s27  ;;  %s7889_s1 = sld [smem:[#allocation38_spill]] }
  0x29   : > { %7887 = sst [smem:[#allocation29_spill]] %s6547_s28  ;;  %s507_s30 = scalar_lea.vmem [#allocation6], %s5858_s17 }
  0x2a   : > { %s7888_s15 = scalar_select %p6722_p5, 1, 0 }
  0x2b   : > { %s514_s12 = sshll.u32 %s507_s30, 4  ;;  %s7890_s11 = sand.u32 1, %s6547_s28   ;;  %s6732_s12 = int_to_ptr.vmem [resolvable:$true] %s514_s12 }
  0x2c   : > { %s6736_s10 = scalar_lea.sflag [#allocation7], %s7890_s11  ;;  %p6742_p7 = pneg %p6722_p5 }
  0x2e   : > { %s6730_s29 = scalar_lea.hbm %s7889_s1, %s5859_s25  ;;  %s6238_s25 = scalar_lea.hbm %s7889_s1, 6144 }
  0x2f   : > { %s6233_s2 = scalar_lea.hbm %s6730_s29, 3072  ;;  %p6239_p10 = scmp.lt.u32.totalorder %s6730_s29, %s7889_s1 }
  0x30   : > { %p6234_p6 = scmp.ne.s32.totalorder %s6730_s29, %s6233_s2  ;;  %p6240_p11 = scmp.lt.u32.totalorder %s6238_s25, %s6233_s2 }
  0x31   : > { %p6242_p13 = scmp.lt.u32.totalorder %s6233_s2, %s6730_s29 }
  0x32   : > { %p6236_p8 = pnand %p6742_p7, %p6234_p6  ;;  %p6241_p12 = por %p6240_p11, %p6239_p10 }
  0x34   : > { %p6237_p9 = pneg %p6236_p8  ;;  %p6243_p1 = por %p6242_p13, %p6241_p12 }
  0x36   : > { %p6244_p4 = pnand %p6243_p1, %p6237_p9 }
  0x38   : > { %6247 = shalt.err (!%p6244_p4)
}
  0x39   : > { %s6248_s11 = scalar_lea.vmem %s6732_s12, 3072  ;;  %s6549_s13 = smov [#allocation6]  }
  0x3a   : > { %p6249_p6 = scmp.ne.s32.totalorder %s6732_s12, %s6248_s11  ;;  %s6253_s14 = sshll.u32 %s6549_s13, 4  ;;  %s6254_s14 = int_to_ptr.vmem [resolvable:$false] %s6253_s14 }
  0x3b   : > { %s6255_s30 = scalar_lea.vmem %s6254_s14, 6144  ;;  %p6256_p2 = scmp.lt.s32.totalorder %s6732_s12, %s6254_s14 }
  0x3c   : > { %p6251_p8 = pnand %p6249_p6, %p6742_p7  ;;  %p6257_p0 = scmp.lt.s32.totalorder %s6255_s30, %s6248_s11 }
  0x3e   : > { %p6252_p3 = pneg %p6251_p8  ;;  %p6258_p10 = por %p6257_p0, %p6256_p2 }
  0x40   : > { %p6259_p11 = pnand %p6258_p10, %p6252_p3 }
  0x42   : > { %6262 = shalt.err (!%p6259_p11)
}
  0x43   : > { %s6550_s2 = smov 192   ;;  %s6551_s25 = smov 12  }
  0x44   : > { %5882 = dma.hbm_to_vmem [thread:$0]  (!%p6722_p5), %s6730_s29, 3072, %s6732_s12, %s6736_s10, %s6550_s2, %s6550_s2, %s6551_s25  }
  0x45   : > { %p5164_p9 = scmp.ge.s32.totalorder %s6547_s28, 1  ;;  %p647_p0 = scmp.lt.s32.totalorder %s6547_s28, 5 }
  0x46   : > { %s7837_s11 = sshll.u32 %s6717_s16, 10  ;;  %s7835_s13 = sshll.u32 %s6539_s26, 14 }
  0x47   : > { %p6768_p2 = pnand %p5164_p9, %p647_p0  ;;  %s7893_s5 = sld [smem:[#allocation42_spill]] }
  0x48   : > { %s562_s12 = scalar_lea.vmem [#allocation9], %s7837_s11  ;;  %s7894_s2 = sand.u32 1, %s6547_s28  }
  0x49   : > { %s7892_s17 = scalar_select %p6768_p2, 1, 0 }
  0x4a   : > { %s569_s29 = sshll.u32 %s562_s12, 4  ;;  %s6787_s25 = scalar_lea.sflag [#allocation10], %s7894_s2  ;;  %s6783_s29 = int_to_ptr.vmem [resolvable:$true] %s569_s29 }
  0x4d   : > { %s6779_s1 = scalar_lea.hbm %s7893_s5, %s7835_s13  ;;  %s6268_s13 = scalar_lea.hbm %s7893_s5, 32768 }
  0x4e   : > { %s6263_s8 = scalar_lea.hbm %s6779_s1, 16384  ;;  %p6269_p1 = scmp.lt.u32.totalorder %s6779_s1, %s7893_s5 }
  0x4f   : > { %p6264_p3 = scmp.ne.s32.totalorder %s6779_s1, %s6263_s8  ;;  %p6270_p4 = scmp.lt.u32.totalorder %s6268_s13, %s6263_s8 }
  0x50   : > { %p6272_p8 = scmp.lt.u32.totalorder %s6263_s8, %s6779_s1 }
  0x51   : > { %p6266_p12 = pnand %p6264_p3, %p6742_p7  ;;  %p6271_p6 = por %p6270_p4, %p6269_p1 }
  0x53   : > { %p6267_p13 = pneg %p6266_p12  ;;  %p6273_p10 = por %p6272_p8, %p6271_p6 }
  0x55   : > { %p6274_p11 = pnand %p6273_p10, %p6267_p13 }
  0x57   : > { %6277 = shalt.err (!%p6274_p11)
}
  0x58   : > { %s6278_s12 = scalar_lea.vmem %s6783_s29, 16384  ;;  %s6552_s2 = smov [#allocation9]  }
  0x59   : > { %p6279_p9 = scmp.ne.s32.totalorder %s6783_s29, %s6278_s12  ;;  %s6283_s14 = sshll.u32 %s6552_s2, 4  ;;  %s6284_s14 = int_to_ptr.vmem [resolvable:$false] %s6283_s14 }
  0x5a   : > { %s6285_s4 = scalar_lea.vmem %s6284_s14, 32768  ;;  %p6286_p12 = scmp.lt.s32.totalorder %s6783_s29, %s6284_s14 }
  0x5b   : > { %p6281_p0 = pnand %p6279_p9, %p6742_p7  ;;  %p6287_p2 = scmp.lt.s32.totalorder %s6285_s4, %s6278_s12 }
  0x5d   : > { %p6282_p3 = pneg %p6281_p0  ;;  %p6288_p1 = por %p6287_p2, %p6286_p12 }
  0x5f   : > { %p6289_p4 = pnand %p6288_p1, %p6282_p3 }
  0x61   : > { %6292 = shalt.err (!%p6289_p4)
}
  0x62   : > { %s6553_s8 = smov 1024   ;;  %s7838_s24 = smov 64  }
  0x63   : > { %5888 = dma.hbm_to_vmem [thread:$0]  (!%p6722_p5), %s6779_s1, 16384, %s6783_s29, %s6787_s25, %s6553_s8, %s6553_s8, %s7838_s24  }
  0x64   : > { %s6813_s13 = sadd.s32 4294967295, %s6547_s28   ;;  %s5145_s30 = sadd.s32 4294967294, %s6547_s28  }
  0x65   : > { %s49_s12 = sadd.s32 1, %s6539_s26  ;;  %s52_s2 = sadd.s32 1, %s6543_s27 }
  0x66   : > { %p50_p2 = scmp.ge.s32.totalorder %s49_s12, 2  ;;  %s59_s14 = sadd.s32 1, %s6527_s23 }
  0x67   : > { %p66_p13 = scmp.ne.s32.totalorder %s6527_s23, %s6523_s22  ;;  %p72_p6 = scmp.ne.s32.totalorder %s6523_s22, %s6519_s21 }
  0x68   : > { %s7968_s12 = smov (%p50_p2, %s49_s12), 0  ;;  %s7970_s2 = smov (!%p50_p2, %s52_s2), %s6543_s27 }
  0x69   : > { %7895 = sst [smem:[#allocation30_spill]] %s7968_s12  ;;  %p7896_p8 = scmp.eq.s32.totalorder %s6547_s28, 0 }
  0x6a   : > { %p73_p11 = scmp.eq.s32.totalorder %s6813_s13, 0  ;;  %p54_p9 = scmp.ge.s32.totalorder %s7970_s2, 2 }
  0x6b   : > { %p6831_p10 = por %p7896_p8, %p66_p13  ;;  %s82_s29 = ssub.s32 %s6539_s26, %s7968_s12 }
  0x6c   : > { %p6841_p0 = por %p73_p11, %p72_p6  ;;  %p83_p3 = scmp.eq.s32.totalorder %s82_s29, 0 }
  0x6d   : > { %s7972_s2 = smov (%p54_p9, %s7970_s2), 0  ;;  %s7901_s8 = sadd.s32 1, %s6515_s20 }
  0x6e   : > { %s7898_s4 = scalar_select %p6841_p0, 1, 0 }
  0x6f   : > { %7900 = sst [smem:[#allocation32_spill]] %s7972_s2  ;;  %s56_s24 = ssub.s32 %s6543_s27, %s7972_s2 }
  0x70   : > { %7899 = sst [smem:[#allocation31_spill]] %s7898_s4  ;;  %p7903_p12 = scmp.ne.s32.totalorder %s6511_s19, %s6507_s18 }
  0x71   : > { %s6850_s11 = scalar_select %p83_p3, %s6515_s20, %s7901_s8  }
  0x72   : > { %p6857_p1 = por %p7903_p12, %p73_p11  ;;  %p57_p4 = scmp.eq.s32.totalorder %s56_s24, 0 }
  0x73   : > { %7902 = sst [smem:[#allocation33_spill]] %s6850_s11  ;;  %p450_p2 = scmp.eq.s32.totalorder %s6813_s13, 3 }
  0x74   : > { %s7904_s5 = scalar_select %p6857_p1, 1, 0 }
  0x75   : > { %p456_p8 = scmp.eq.s32.totalorder %s5145_s30, 3  ;;  %s482_s12 = sand.u32 1, %s6527_s23  }
  0x76   : > { %s6864_s29 = scalar_select %p57_p4, %s6527_s23, %s59_s14  }
  0x77   : > { %p6869_p9 = por %p450_p2, %p66_p13  ;;  %p6876_p3 = por %p456_p8, %p72_p6 }
  0x78   : > { %7905 = sst [smem:[#allocation34_spill]] %s6864_s29  ;;  %s5148_s18 = sshll.u32 %s482_s12, 4 }
  0x79   : > { %s7906_s4 = scalar_select %p6869_p9, 1, 0 }
  0x7a   : > { %s7908_s8 = scalar_select %p6876_p3, 1, 0 }
  0x7b   : > { %7907 = sst [smem:[#allocation35_spill]] %s7906_s4  ;;  %s5490_s2 = sshll.u32 %s6543_s27, 8 }
  0x7c   : > { %7909 = sst [smem:[#allocation36_spill]] %s7908_s8  ;;  %s486_s30 = scalar_lea.vmem [#allocation3], %s5148_s18 }
  0x7d   : > { %s7910_s0 = sld [smem:[#allocation37_spill]]  ;;  %s493_s14 = sshll.u32 %s486_s30, 4  ;;  %s6886_s14 = int_to_ptr.vmem [resolvable:$true] %s493_s14 }
  0x7e   : > { %p7911_p13 = scmp.lt.s32.totalorder %s6547_s28, 4  ;;  %s6897_s20 = scalar_lea.sflag [#allocation4], %s482_s12 }
  0x80   : > { %p6892_p6 = pnand %p7911_p13, %p6831_p10 }
  0x82   : > { %p6295_p12 = pneg %p6892_p6 }
  0x83   : > { %s6884_s24 = scalar_lea.hbm %s7910_s0, %s5490_s2  ;;  %s6298_s18 = scalar_lea.hbm %s7910_s0, 512 }
  0x84   : > { %s6293_s11 = scalar_lea.hbm %s6884_s24, 256  ;;  %p6299_p10 = scmp.lt.u32.totalorder %s6884_s24, %s7910_s0 }
  0x85   : > { %p6294_p11 = scmp.ne.s32.totalorder %s6884_s24, %s6293_s11  ;;  %p6300_p8 = scmp.lt.u32.totalorder %s6298_s18, %s6293_s11 }
  0x86   : > { %p6302_p3 = scmp.lt.u32.totalorder %s6293_s11, %s6884_s24 }
  0x87   : > { %p6296_p4 = pnand %p6295_p12, %p6294_p11  ;;  %p6301_p13 = por %p6300_p8, %p6299_p10 }
  0x89   : > { %p6297_p2 = pneg %p6296_p4  ;;  %p6303_p9 = por %p6302_p3, %p6301_p13 }
  0x8b   : > { %p6304_p1 = pnand %p6303_p9, %p6297_p2 }
  0x8d   : > { %6307 = shalt.err (!%p6304_p1)
}
  0x8e   : > { %s6308_s12 = scalar_lea.vmem %s6886_s14, 256  ;;  %s6555_s2 = smov [#allocation3]  }
  0x8f   : > { %p6309_p11 = scmp.ne.s32.totalorder %s6886_s14, %s6308_s12  ;;  %s6313_s1 = sshll.u32 %s6555_s2, 4  ;;  %s6314_s1 = int_to_ptr.vmem [resolvable:$false] %s6313_s1 }
  0x90   : > { %s6315_s23 = scalar_lea.vmem %s6314_s1, 512  ;;  %p6316_p5 = scmp.lt.s32.totalorder %s6886_s14, %s6314_s1 }
  0x91   : > { %p6311_p4 = pnand %p6309_p11, %p6295_p12  ;;  %p6317_p10 = scmp.lt.s32.totalorder %s6315_s23, %s6308_s12 }
  0x93   : > { %p6312_p0 = pneg %p6311_p4  ;;  %p6318_p8 = por %p6317_p10, %p6316_p5 }
  0x95   : > { %p6319_p3 = pnand %p6318_p8, %p6312_p0 }
  0x97   : > { %6322 = shalt.err (!%p6319_p3)
}
  0x98   : > { %s6556_s11 = smov 128   ;;  %s6557_s18 = smov 8  }
  0x99   : > { %5879 = dma.hbm_to_vmem [thread:$0]  (!%p6892_p6), %s6884_s24, 256, %s6886_s14, %s6897_s20, %s6556_s11, %s6556_s11, %s6557_s18  }
  0x9a   : > { %s5491_s30 = sshll.u32 %s6539_s26, 10  ;;  %s7913_s3 = sld [smem:[#allocation40_spill]] }
  0x9b   : > { %s7914_s12 = sshll.u32 %s6717_s16, 6 }
  0x9c   : > { %s535_s23 = scalar_lea.vmem [#allocation8], %s7914_s12 }
  0x9d   : > { %s542_s0 = sshll.u32 %s535_s23, 4  ;;  %s6933_s0 = int_to_ptr.vmem [resolvable:$true] %s542_s0 }
  0xa0   : > { %s6929_s1 = scalar_lea.hbm %s7913_s3, %s5491_s30  ;;  %s6328_s27 = scalar_lea.hbm %s7913_s3, 2048 }
  0xa1   : > { %s6323_s8 = scalar_lea.hbm %s6929_s1, 1024  ;;  %p6329_p9 = scmp.lt.u32.totalorder %s6929_s1, %s7913_s3 }
  0xa2   : > { %p6324_p5 = scmp.ne.s32.totalorder %s6929_s1, %s6323_s8  ;;  %p6330_p6 = scmp.lt.u32.totalorder %s6328_s27, %s6323_s8 }
  0xa3   : > { %p6332_p2 = scmp.lt.u32.totalorder %s6323_s8, %s6929_s1 }
  0xa4   : > { %p6326_p0 = pnand %p6324_p5, %p6742_p7  ;;  %p6331_p12 = por %p6330_p6, %p6329_p9 }
  0xa6   : > { %p6327_p1 = pneg %p6326_p0  ;;  %p6333_p13 = por %p6332_p2, %p6331_p12 }
  0xa8   : > { %p6334_p11 = pnand %p6333_p13, %p6327_p1 }
  0xaa   : > { %6337 = shalt.err (!%p6334_p11)
}
  0xab   : > { %s6338_s11 = scalar_lea.vmem %s6933_s0, 1024  ;;  %s6558_s18 = smov [#allocation8]  }
  0xac   : > { %p6339_p4 = scmp.ne.s32.totalorder %s6933_s0, %s6338_s11  ;;  %s6343_s30 = sshll.u32 %s6558_s18, 4  ;;  %s6344_s30 = int_to_ptr.vmem [resolvable:$false] %s6343_s30 }
  0xad   : > { %s6345_s2 = scalar_lea.vmem %s6344_s30, 2048  ;;  %p6346_p3 = scmp.lt.s32.totalorder %s6933_s0, %s6344_s30 }
  0xae   : > { %p6341_p10 = pnand %p6339_p4, %p6742_p7  ;;  %p6347_p5 = scmp.lt.s32.totalorder %s6345_s2, %s6338_s11 }
  0xb0   : > { %p6342_p8 = pneg %p6341_p10  ;;  %p6348_p0 = por %p6347_p5, %p6346_p3 }
  0xb2   : > { %p6349_p9 = pnand %p6348_p0, %p6342_p8 }
  0xb4   : > { %6352 = shalt.err (!%p6349_p9)
}
  0xb5   : > { %s6559_s8 = smov 4   ;;  %p7915_p1 = scmp.ne.s32.totalorder %s7888_s15, 0 }
  0xb6   : > { %s7916_s12 = smov 64   ;;  %s5158_s23 = sshll.u32 %s6717_s16, 4 }
  0xb7   : > { %5885 = dma.hbm_to_vmem [thread:$0]  (!%p7915_p1), %s6929_s1, 1024, %s6933_s0, %s6736_s10, %s7916_s12, %s7916_s12, %s6559_s8  }
  0xb8   : > { %s5493_s29 = sshll.u32 %s6539_s26, 8  ;;  %s7917_s6 = sld [smem:[#allocation43_spill]] }
  0xb9   : > { %s583_s20 = scalar_lea.vmem [#allocation11], %s5158_s23 }
  0xba   : > { %s591_s11 = sshll.u32 %s583_s20, 4  ;;  %s592_s11 = int_to_ptr.vmem [resolvable:$true] %s591_s11 }
  0xbe   : > { %s6965_s14 = scalar_lea.hbm %s7917_s6, %s5493_s29  ;;  %s6358_s1 = scalar_lea.hbm %s7917_s6, 512 }
  0xbf   : > { %s6353_s18 = scalar_lea.hbm %s6965_s14, 256  ;;  %p6359_p13 = scmp.lt.u32.totalorder %s6965_s14, %s7917_s6 }
  0xc0   : > { %p6354_p6 = scmp.ne.s32.totalorder %s6965_s14, %s6353_s18  ;;  %p6360_p11 = scmp.lt.u32.totalorder %s6358_s1, %s6353_s18 }
  0xc1   : > { %p6362_p10 = scmp.lt.u32.totalorder %s6353_s18, %s6965_s14 }
  0xc2   : > { %p6356_p12 = pnand %p6354_p6, %p6742_p7  ;;  %p6361_p4 = por %p6360_p11, %p6359_p13 }
  0xc4   : > { %p6357_p2 = pneg %p6356_p12  ;;  %p6363_p8 = por %p6362_p10, %p6361_p4 }
  0xc6   : > { %p6364_p3 = pnand %p6363_p8, %p6357_p2 }
  0xc8   : > { %6367 = shalt.err (!%p6364_p3)
}
  0xc9   : > { %s6368_s23 = scalar_lea.vmem %s592_s11, 256  ;;  %s6560_s29 = smov [#allocation11]  }
  0xca   : > { %p6369_p5 = scmp.ne.s32.totalorder %s592_s11, %s6368_s23  ;;  %s6373_s24 = sshll.u32 %s6560_s29, 4  ;;  %s6374_s24 = int_to_ptr.vmem [resolvable:$false] %s6373_s24 }
  0xcb   : > { %s6375_s27 = scalar_lea.vmem %s6374_s24, 512  ;;  %p6376_p6 = scmp.lt.s32.totalorder %s592_s11, %s6374_s24 }
  0xcc   : > { %p6371_p0 = pnand %p6369_p5, %p6742_p7  ;;  %p6377_p12 = scmp.lt.s32.totalorder %s6375_s27, %s6368_s23 }
  0xce   : > { %p6372_p9 = pneg %p6371_p0  ;;  %p6378_p1 = por %p6377_p12, %p6376_p6 }
  0xd0   : > { %p6379_p11 = pnand %p6378_p1, %p6372_p9 }
  0xd2   : > { %6382 = shalt.err (!%p6379_p11)
}
  0xd3   : > { %p7918_p13 = scmp.ne.s32.totalorder %s7888_s15, 0  ;;  %s7919_s20 = sshll.u32 %s6539_s26, 14 }
  0xd4   : > { %s7920_s7 = sld [smem:[#allocation44_spill]]  ;;  %s7921_s1 = sshll.u32 %s6717_s16, 10 }
  0xd5   : > { %5891 = dma.hbm_to_vmem [thread:$0]  (!%p7918_p13), %s6965_s14, 256, %s592_s11, %s6787_s25  }
  0xd6   : > { %s602_s30 = scalar_lea.vmem [#allocation12], %s7921_s1  ;;  %s599_s23 = scalar_lea.sflag [#allocation13], %s6717_s16 }
  0xd7   : > { %s609_s2 = sshll.u32 %s602_s30, 4  ;;  %s6994_s2 = int_to_ptr.vmem [resolvable:$true] %s609_s2 }
  0xda   : > { %s6990_s10 = scalar_lea.hbm %s7920_s7, %s7919_s20  ;;  %s6388_s11 = scalar_lea.hbm %s7920_s7, 32768 }
  0xdb   : > { %s6383_s29 = scalar_lea.hbm %s6990_s10, 16384  ;;  %p6389_p10 = scmp.lt.u32.totalorder %s6990_s10, %s7920_s7 }
  0xdc   : > { %p6384_p1 = scmp.ne.s32.totalorder %s6990_s10, %s6383_s29  ;;  %p6390_p8 = scmp.lt.u32.totalorder %s6388_s11, %s6383_s29 }
  0xdd   : > { %p6392_p5 = scmp.lt.u32.totalorder %s6383_s29, %s6990_s10 }
  0xde   : > { %p6386_p2 = pnand %p6384_p1, %p6742_p7  ;;  %p6391_p3 = por %p6390_p8, %p6389_p10 }
  0xe0   : > { %p6387_p4 = pneg %p6386_p2  ;;  %p6393_p0 = por %p6392_p5, %p6391_p3 }
  0xe2   : > { %p6394_p9 = pnand %p6393_p0, %p6387_p4 }
  0xe4   : > { %6397 = shalt.err (!%p6394_p9)
}
  0xe5   : > { %s6398_s20 = scalar_lea.vmem %s6994_s2, 16384  ;;  %s6561_s18 = smov [#allocation12]  }
  0xe6   : > { %p6399_p6 = scmp.ne.s32.totalorder %s6994_s2, %s6398_s20  ;;  %s6403_s0 = sshll.u32 %s6561_s18, 4  ;;  %s6404_s0 = int_to_ptr.vmem [resolvable:$false] %s6403_s0 }
  0xe7   : > { %s6405_s1 = scalar_lea.vmem %s6404_s0, 32768  ;;  %p6406_p1 = scmp.lt.s32.totalorder %s6994_s2, %s6404_s0 }
  0xe8   : > { %p6401_p12 = pnand %p6399_p6, %p6742_p7  ;;  %p6407_p2 = scmp.lt.s32.totalorder %s6405_s1, %s6398_s20 }
  0xea   : > { %p6402_p11 = pneg %p6401_p12  ;;  %p6408_p10 = por %p6407_p2, %p6406_p1 }
  0xec   : > { %p6409_p8 = pnand %p6408_p10, %p6402_p11 }
  0xee   : > { %6412 = shalt.err (!%p6409_p8)
}
  0xef   : > { %5894 = dma.hbm_to_vmem [thread:$0]  (!%p7918_p13), %s6990_s10, 16384, %s6994_s2, %s599_s23, %s7916_s12, %s7916_s12, %s6559_s8  }
  0xf0   : > { %p7922_p7 = scmp.ne.s32.totalorder %s7892_s17, 0 }
  0xf1   : > { %s7923_s9 = sld [smem:[#allocation31_spill]] (!%p7922_p7)  ;;  %s7026_s30 = sand.u32 (!%p7922_p7), 1, %s6523_s22  }
  0xf2   : > { %651 = sbr.rel (%p7922_p7) target bundleno = 4795 (0x12bb), region = 80  ;;  %s7853_s29 = sshll.u32 (!%p7922_p7), %s7026_s30, 4 }
  0xf3   : > { %s654_s15 = scalar_lea.sflag (!%p7922_p7), [#allocation4], %s7026_s30  ;;  %s7032_s25 = scalar_lea.vmem (!%p7922_p7), [#allocation3], %s7853_s29 }
  0xf7   : > { %p7924_p4 = scmp.ne.s32.totalorder (!%p7922_p7), %s7923_s9, 0 }
  0xf9   : > { %6486 = dma.done.wait (%p7924_p4), %s654_s15, 256  }
  0xfa   : > { %6488 = vsyncadd (%p7924_p4), %s654_s15, 4294967040  ;;  %s662_s16 = sand.u32 1, %s6813_s13   ;;  %s664_s17 = sand.u32 1, %s6511_s19  }
  0xfb   : > { %s5860_s8 = smul.u32 192, %s664_s17  ;;  %s663_s12 = scalar_lea.sflag [#allocation7], %s662_s16 }
  0xfc   : > { %p7925_p13 = scmp.ne.s32.totalorder %s7904_s5, 0 }
  0xfd   : > { %s7040_s10 = scalar_lea.vmem [#allocation6], %s5860_s8 }
  0xfe   : > { %6490 = dma.done.wait (%p7925_p13), %s663_s12, 4096  }
  0xff   : > { %6492 = vsyncadd (%p7925_p13), %s663_s12, 4294963200  ;;  %s5166_s2 = sshll.u32 %s664_s17, 6  ;;  %s5167_s23 = sshll.u32 %s664_s17, 10 }
 0x100   : > { %s7046_s14 = scalar_lea.vmem [#allocation8], %s5166_s2  ;;  %s681_s11 = scalar_lea.sflag [#allocation10], %s662_s16 }
 0x101   : > { %s7048_s24 = scalar_lea.vmem [#allocation9], %s5167_s23 }
 0x102   : > { %6494 = dma.done.wait (%p7925_p13), %s681_s11, 16640  }
 0x103   : > { %6496 = vsyncadd (%p7925_p13), %s681_s11, 4294950656  ;;  %s5168_s13 = sshll.u32 %s664_s17, 4  ;;  %s699_s20 = scalar_lea.sflag [#allocation13], %s664_s17 }
 0x104   : > { %s7054_s27 = scalar_lea.vmem [#allocation11], %s5168_s13  ;;  %s7056_s18 = scalar_lea.vmem [#allocation12], %s5167_s23 }
 0x105   : > { %6498 = dma.done.wait (%p7925_p13), %s699_s20, 16384  }
 0x106   : > { %6500 = vsyncadd (%p7925_p13), %s699_s20, 4294950912  ;;  %s7926_s0 = sld [smem:[#allocation25_spill]]  ;;  %s7929_s20 = sld [smem:[#allocation46_spill]] }
 0x107   : > { %s7930_s7 = sld [smem:[#allocation39_spill]]  ;;  %s7932_s16 = sld [smem:[#allocation48_spill]] }
 0x108   : > { %s7931_s21 = sld [smem:[#allocation47_spill]]  ;;  %s7933_s12 = sld [smem:[#allocation49_spill]] }
 0x109   : > { %s7934_s23 = sshll.u32 %s7026_s30, 4 }
 0x10a   : > { %s7098_s11 = scalar_lea.vmem [#allocation14], %s7934_s23 }
 0x10c   : > { %p797_p3 = scmp.lt.s32.totalorder %s7926_s0, 1  ;;  %p5171_p5 = scmp.ne.s32.totalorder %s7926_s0, 0 }
 0x10d   : > { %v825_v0 = vld [vmem:[%s7032_s25] sm:$0xff] (!%p5171_p5)  ;;  %v826_v1 = vld [vmem:[%s7032_s25 + $0x8] sm:$0xff] (!%p5171_p5) }
 0x10e   : > { %s7064_s1 = scalar_select %p797_p3, %s7926_s0, 1 }
 0x10f   : > { %824 = sbr.rel (%p5171_p5) target bundleno = 278 (0x116), region = 108  ;;  %827 = vst [vmem:[#allocation2] sm:$0xff] (!%p5171_p5), %v825_v0  ;;  %828 = vst [vmem:[#allocation2 + $0x8] sm:$0xff] (!%p5171_p5), %v826_v1 }
 0x110   : > { %s5861_s9 = smul.u32 3, %s7064_s1  ;;  %s809_s29 = scalar_lea.vmem %s7929_s20, %s7064_s1 }
 0x111   : > { %s812_s28 = scalar_lea.vmem %s7931_s21, %s7064_s1  ;;  %s815_s17 = scalar_lea.vmem %s7932_s16, %s7064_s1 }
 0x112   : > { %s7082_s26 = scalar_lea.vmem %s7930_s7, %s5861_s9  ;;  %s818_s2 = scalar_lea.vmem %s7933_s12, %s7064_s1 }
 0x116 PF: > { %v6019_v2 = vld [vmem:[%s7040_s10 + $0x4] ss:$12 sps:$4 sm:$0xff]   ;;  %v6021_v3 = vld [vmem:[%s7040_s10] ss:$12 sps:$4 sm:$0xff]   ;;  %v6562_v4 = vmov 0   ;;  %v6563_v5 = vmov 0.0   ;;  %v866_v31 = vlaneseq }
 0x117   : > { %1041 = vmatprep.mubr.bf16.mxu0 %v6562_v4  ;;  %5722 = vmatprep.subr.bf16.mxu1 %v6563_v5  ;;  %v6022_v6 = vld [vmem:[%s7040_s10 + $0x1c] ss:$12 sps:$4 sm:$0xff]   ;;  %v6024_v7 = vld [vmem:[%s7040_s10 + $0x18] ss:$12 sps:$4 sm:$0xff]   ;;  %v6025_v8 = vld [vmem:[%s7040_s10 + $0x34] ss:$12 sps:$4 sm:$0xff]  }
 0x118   : > { %1009 = vmatprep.subr.bf16.mxu0 %v6019_v2  ;;  %v6027_v9 = vld [vmem:[%s7040_s10 + $0x30] ss:$12 sps:$4 sm:$0xff]   ;;  %v6028_v10 = vld [vmem:[%s7040_s10 + $0x4c] ss:$12 sps:$4 sm:$0xff]   ;;  %v6030_v11 = vld [vmem:[%s7040_s10 + $0x48] ss:$12 sps:$4 sm:$0xff]  }
 0x119   : > { %1010 = vmatpush1.bf16.msra.mxu0 %v6021_v3  ;;  %v6031_v12 = vld [vmem:[%s7040_s10 + $0x64] ss:$12 sps:$4 sm:$0xff]   ;;  %v6043_v13 = vld [vmem:[%s7040_s10 + $0x8] ss:$12 sps:$4 sm:$0xff]   ;;  %v6044_v14 = vld [vmem:[%s7040_s10 + $0x20] ss:$12 sps:$4 sm:$0xff]  }
 0x11a   : > { %1011 = vmatprep.subr.bf16.mxu0 %v6022_v6  ;;  %5723 = vmatpush3.bf16.msra.mxu1 %v6043_v13  ;;  %v6033_v15 = vld [vmem:[%s7040_s10 + $0x60] ss:$12 sps:$4 sm:$0xff]   ;;  %v6034_v16 = vld [vmem:[%s7040_s10 + $0x7c] ss:$12 sps:$4 sm:$0xff]   ;;  %v6045_v17 = vld [vmem:[%s7040_s10 + $0x38] ss:$12 sps:$4 sm:$0xff]  }
 0x11b   : > { %5724 = vmatprep.subr.bf16.mxu1 %v6563_v5  ;;  %v6036_v18 = vld [vmem:[%s7040_s10 + $0x78] ss:$12 sps:$4 sm:$0xff]   ;;  %v6037_v19 = vld [vmem:[%s7040_s10 + $0x94] ss:$12 sps:$4 sm:$0xff]   ;;  %v6046_v20 = vld [vmem:[%s7040_s10 + $0x50] ss:$12 sps:$4 sm:$0xff]  }
 0x11c   : > { %v6039_v21 = vld [vmem:[%s7040_s10 + $0x90] ss:$12 sps:$4 sm:$0xff]   ;;  %v6040_v22 = vld [vmem:[%s7040_s10 + $0xac] ss:$12 sps:$4 sm:$0xff]   ;;  %v6047_v23 = vld [vmem:[%s7040_s10 + $0x68] ss:$12 sps:$4 sm:$0xff]  }
 0x11d   : > { %1012 = vmatpush1.bf16.msra.mxu0 %v6024_v7  ;;  %v6042_v24 = vld [vmem:[%s7040_s10 + $0xa8] ss:$12 sps:$4 sm:$0xff]   ;;  %v830_v26 = vld [vmem:[#allocation2 + $0x8] sm:$0xff]  ;;  %v6048_v27 = vld [vmem:[%s7040_s10 + $0x80] ss:$12 sps:$4 sm:$0xff]   ;;  %vm6564_vm0 = vmmov 0  }
 0x11e   : > { %1013 = vmatprep.subr.bf16.mxu0 %v6025_v8  ;;  %5725 = vmatpush3.bf16.msra.mxu1 %v6044_v14  ;;  %v829_v25 = vld [vmem:[#allocation2] sm:$0xff]  ;;  %v6049_v29 = vld [vmem:[%s7040_s10 + $0x98] ss:$12 sps:$4 sm:$0xff]   ;;  %v7144_v32 = vshrl.u32 %v866_v31, 7  ;;  %vm1104_vm1 = vcmask 261120   ;;  %vm1227_vm2 = vcmask 1043456  }
 0x11f   : > { %5726 = vmatprep.subr.bf16.mxu1 %v6563_v5  ;;  %v831_v28 = vpack.c.bf16 %v830_v26, %v829_v25  ;;  %v6050_v30 = vld [vmem:[%s7040_s10 + $0xb0] ss:$12 sps:$4 sm:$0xff]   ;;  %5738 = vmatprep.mubr.msk.bf16.mxu1 %vm6564_vm0, %v6563_v5  ;;  %v1096_v62 = vand.u32 127, %v866_v31  ;;  %vm1199_vm4 = vcmask 64512   ;;  %s6565_s3 = smov 96   ;;  %s6566_s6 = smov 64  }
 0x120   : > { %v7147_v33 = vsub.s32 1, %v7144_v32  ;;  %v864_v34 = vld [vmem:[%s7082_s26] sm:$0x7]  ;;  %v7152_v36 = vsub.s32 0, %v7144_v32  ;;  %v7178_v52 = vsub.s32 2, %v7144_v32  ;;  %s6567_s7 = smov 32  }
 0x121   : > { %1014 = vmatpush1.bf16.msra.mxu0 %v6027_v9  ;;  %vm7187_vm3 = vcmp.le.s32.totalorder %v1096_v62, %v7144_v32  ;;  %vm2015_vm5 = vcmask 523264   ;;  %vm2018_vm6 = vcmask 785408   ;;  %s7937_s22 = sld [smem:[#allocation41_spill]]  ;;  %s7945_s16 = sld [smem:[#allocation25_spill]] }
 0x122   : > { %1015 = vmatprep.subr.bf16.mxu0 %v6028_v10  ;;  %5727 = vmatpush3.bf16.msra.mxu1 %v6045_v17  ;;  %v873_v35 = vrot.slane %v864_v34, %v7147_v33  ;;  %v869_v42 = vrot.slane %v864_v34, %v7152_v36  ;;  %v877_v53 = vrot.slane %v864_v34, %v7178_v52 }
 0x123   : > { %5728 = vmatprep.subr.bf16.mxu1 %v6563_v5 }
 0x125   : > { %1016 = vmatpush1.bf16.msra.mxu0 %v6030_v11 }
 0x126   : > { %1017 = vmatprep.subr.bf16.mxu0 %v6031_v12  ;;  %5729 = vmatpush3.bf16.msra.mxu1 %v6046_v20 }
 0x127   : > { %5730 = vmatprep.subr.bf16.mxu1 %v6563_v5  ;;  %s7938_s26 = scalar_lea.vmem %s7937_s22, %s7064_s1  ;;  %p5482_p0 = scmp.ne.s32.totalorder %s7945_s16, 1 }
 0x128   : > { %s7946_s5 = sld [smem:[#allocation50_spill]] (!%p5482_p0) }
 0x129   : > { %1018 = vmatpush1.bf16.msra.mxu0 %v6033_v15 }
 0x12a   : > { %1019 = vmatprep.subr.bf16.mxu0 %v6034_v16  ;;  %5731 = vmatpush3.bf16.msra.mxu1 %v6047_v23 }
 0x12b   : > { %5732 = vmatprep.subr.bf16.mxu1 %v6563_v5 }
 0x12d   : > { %1020 = vmatpush1.bf16.msra.mxu0 %v6036_v18 }
 0x12e   : > { %1021 = vmatprep.subr.bf16.mxu0 %v6037_v19  ;;  %5733 = vmatpush3.bf16.msra.mxu1 %v6048_v27 }
 0x12f   : > { %5734 = vmatprep.subr.bf16.mxu1 %v6563_v5 }
 0x131   : > { %1022 = vmatpush1.bf16.msra.mxu0 %v6039_v21 }
 0x132   : > { %1023 = vmatprep.subr.bf16.mxu0 %v6040_v22  ;;  %5735 = vmatpush3.bf16.msra.mxu1 %v6049_v29 }
 0x133   : > { %5736 = vmatprep.subr.bf16.mxu1 %v6563_v5 }
 0x135   : > { %1024 = vmatpush1.bf16.msra.mxu0 %v6042_v24 }
 0x136   : > { %5766 = vmatprep.subr.bf16.mxu0 %v6563_v5  ;;  %5737 = vmatpush3.bf16.msra.mxu1 %v6050_v30 }
 0x137   : > { %5742 = vmatprep.subr.bf16.mxu1 %v6563_v5 }
 0x138   : > { %1042 = vmatmul.mubr.bf16.vlgmr.msra.gmra.mrb[0].mxu0 %v831_v28 }
 0x139   : > { %5768 = vmatprep.mubr.msk.bf16.mxu0 %vm6564_vm0, %v6563_v5  ;;  %5739 = vmatmul.mubr.bf16.vlgmr.msra.gmra.mrb[0].mxu1 %v831_v28 }
 0x13a   : > { %5744 = vmatprep.mubr.msk.bf16.mxu1 %vm6564_vm0, %v6563_v5 }
 0x20b   : > { %v1043_v37 = vpop.f32.mrb[0].mxu0 }
 0x20c   : > { %v1045_v38 = vpop.f32.mrb[1].mxu0  ;;  %v1044_v46 = vadd.f32 %v1043_v37, %v869_v42  ;;  %v1086_v54 = vpop.f32.mrb[0].mxu1 }
 0x20d   : > { %v1046_v39 = vadd.f32 %v1045_v38, %v873_v35  ;;  %v1047_v40 = vpop.f32.mrb[2].mxu0  ;;  %v1087_v55 = vadd.f32 %v1086_v54, %v877_v53  ;;  %v5740_v56 = vpop.f32.mrb[1].mxu1 }
 0x20e   : > { %v1049_v41 = vpop.f32.mrb[3].mxu0  ;;  %v7162_v48 = vpack.c.bf16 %v1044_v46, %v1044_v46  ;;  %v1048_v50 = vadd.f32 %v1047_v40, %v869_v42  ;;  %v1089_v57 = vpop.f32.mrb[2].mxu1 }
 0x20f   : > { %v7155_v43 = vpack.c.bf16 %v1046_v39, %v1046_v39  ;;  %v1050_v44 = vadd.f32 %v1049_v41, %v873_v35  ;;  %v7181_v58 = vpack.c.bf16 %v1087_v55, %v1087_v55  ;;  %v1090_v59 = vadd.f32 %v1089_v57, %v877_v53  ;;  %v5741_v60 = vpop.f32.mrb[3].mxu1 }
 0x210   : > { %v7171_v51 = vpack.c.bf16 %v1048_v50, %v1048_v50 }
 0x211   : > { %v1109_v45 = vsel %vm1104_vm1, %v7155_v43, 0  ;;  %v7160_v47 = vpack.c.bf16 %v1050_v44, %v1050_v44  ;;  %v1229_v61 = vsel %vm1227_vm2, %v7181_v58, 0  ;;  %v7209_v28 = vpack.c.bf16 %v1090_v59, %v1090_v59 }
 0x212   : > { %5743 = vmatpush3.bf16.xpose.msra.mxu1 %v1109_v45 }
 0x213   : > { %5748 = vmatprep.subr.bf16.mxu1 %v6563_v5  ;;  %v1155_v49 = vsel %vm1104_vm1, %v7160_v47, 0  ;;  %v1275_v31 = vsel %vm1227_vm2, %v7209_v28, 0 }
 0x219   : > { %5745 = vmatmul.mubr.msk.bf16.vlgmr.msra.gmra.mrb[4].mxu1 %vm1104_vm1, %v7162_v48 }
 0x21a   : > { %5749 = vmatpush3.bf16.xpose.msra.mxu1 %v1155_v49  ;;  %5750 = vmatprep.mubr.msk.bf16.mxu1 %vm6564_vm0, %v6563_v5 }
 0x21b   : > { %5754 = vmatprep.subr.bf16.mxu1 %v6563_v5 }
 0x221   : > { %5751 = vmatmul.mubr.msk.bf16.vlgmr.msra.gmra.mrb[8].mxu1 %vm1104_vm1, %v7171_v51 }
 0x222   : > { %5756 = vmatprep.mubr.msk.bf16.mxu1 %vm6564_vm0, %v6563_v5  ;;  %5755 = vmatpush3.bf16.msra.mxu1 %v1229_v61 }
 0x223   : > { %5760 = vmatprep.subr.bf16.mxu1 %v6563_v5 }
 0x2ec   : > { %v1145_v0 = vpop.f32.mrb[4].mxu1 }
 0x2ed   : > { %v1197_v1 = vsel %vm7187_vm3, %v1145_v0, -1e+30  ;;  %v5746_v2 = vpop.f32.mrb[5].mxu1 }
 0x2ee   : > { %v1148_v3 = vpop.f32.mrb[6].mxu1  ;;  %v1200_v6 = vsel %vm1199_vm4, %v1197_v1, -inf }
 0x2ef   : > { %1201 = vmax.xlane.f32.xlu0 %v1200_v6  ;;  %v5747_v7 = vpop.f32.mrb[7].mxu1 }
 0x2f4   : > { %v1191_v8 = vpop.f32.mrb[8].mxu1 }
 0x2f5   : > { %v1198_v9 = vsel %vm7187_vm3, %v1191_v8, -1e+30  ;;  %v5752_v10 = vpop.f32.mrb[9].mxu1 }
 0x2f6   : > { %v1194_v11 = vpop.f32.mrb[10].mxu1  ;;  %v1203_v12 = vsel %vm1199_vm4, %v1198_v9, -inf }
 0x2f7   : > { %1204 = vmax.xlane.f32.xlu0 %v1203_v12  ;;  %v5753_v13 = vpop.f32.mrb[11].mxu1 }
 0x30d   : > { %1321 = vrot.lane.b32.xlu0 %v7155_v43, %s6565_s3 }
 0x37c   : > { %v1202_v14 = vpop.xlane.xlu0 %1201 }
 0x37d   : > { %v1206_v15 = vsub.f32 %v1197_v1, %v1202_v14 }
 0x37f   : > { %v1208_v16 = vmul.f32 1.442695, %v1206_v15 }
 0x381   : > { %6187 = vpow2.f32 %v1208_v16 }
 0x384   : > { %v1205_v17 = vpop.xlane.xlu0 %1204 }
 0x385   : > { %v1207_v22 = vsub.f32 %v1198_v9, %v1205_v17 }
 0x387   : > { %v1210_v23 = vmul.f32 1.442695, %v1207_v22 }
 0x388   : > { %v1322_v18 = vpop.permute.xlu0 %1321 }
 0x389   : > { %v1327_v19 = vsel %vm1104_vm1, %v1322_v18, 0  ;;  %6189 = vpow2.f32 %v1210_v23 }
 0x38a   : > { %5767 = vmatpush3.bf16.xpose.msra.mxu0 %v1327_v19 }
 0x38b   : > { %v6188_v20 = vpop.eup %6187  ;;  %5778 = vmatprep.subr.bf16.mxu0 %v6563_v5 }
 0x38c   : > { %v1212_v21 = vsel %vm1199_vm4, %v6188_v20, 0.0 }
 0x38d   : > { %1213 = vadd.xlane.f32.xlu1 %v1212_v21 }
 0x393   : > { %v6190_v24 = vpop.eup %6189 }
 0x394   : > { %v1215_v25 = vsel %vm1199_vm4, %v6190_v24, 0.0 }
 0x39e   : > { %1373 = vrot.lane.b32.xlu1 %v7160_v47, %s6565_s3 }
 0x3c2   : > { %1216 = vadd.xlane.f32.xlu1 %v1215_v25 }
 0x3d3   : > { %1318 = vrot.lane.b32.xlu1 %v7162_v48, %s6565_s3 }
 0x3d7   : > { %1370 = vrot.lane.b32.xlu1 %v7171_v51, %s6565_s3 }
 0x41a   : > { %v1214_v26 = vpop.xlane.xlu1 %1213 }
 0x41b   : > { %6191 = vrcp.f32 %v1214_v26 }
 0x41e   : > { %v1374_v34 = vpop.permute.xlu1 %1373 }
 0x41f   : > { %v1379_v41 = vsel %vm1104_vm1, %v1374_v34, 0 }
 0x425   : > { %v6192_v27 = vpop.eup %6191 }
 0x426   : > { %v1220_v29 = vmul.f32 %v6192_v27, %v6188_v20 }
 0x428   : > { %v1222_v30 = vpack.c.bf16 %v1220_v29, %v1220_v29 }
 0x42a   : > { %5757 = vmatmul.mubr.msk.bf16.vlgmr.msra.gmra.mrb[12].mxu1 %vm1199_vm4, %v1222_v30 }
 0x42b   : > { %5761 = vmatpush3.bf16.msra.mxu1 %v1275_v31  ;;  %5762 = vmatprep.mubr.msk.bf16.mxu1 %vm6564_vm0, %v6563_v5 }
 0x42c   : > { %5772 = vmatprep.subr.bf16.mxu1 %v6563_v5 }
 0x44f   : > { %v1217_v35 = vpop.xlane.xlu1 %1216 }
 0x450   : > { %6193 = vrcp.f32 %v1217_v35 }
 0x453   : > { %v1319_v37 = vpop.permute.xlu1 %1318 }
 0x454   : > { %5769 = vmatmul.mubr.msk.bf16.vlgmr.msra.gmra.mrb[4].mxu0 %vm1104_vm1, %v1319_v37 }
 0x455   : > { %5780 = vmatprep.mubr.msk.bf16.mxu0 %vm6564_vm0, %v6563_v5 }
 0x457   : > { %v1371_v42 = vpop.permute.xlu1 %1370 }
 0x45a   : > { %v6194_v38 = vpop.eup %6193 }
 0x45b   : > { %v1221_v39 = vmul.f32 %v6194_v38, %v6190_v24 }
 0x45d   : > { %v1223_v40 = vpack.c.bf16 %v1221_v39, %v1221_v39 }
 0x45f   : > { %5763 = vmatmul.mubr.msk.bf16.vlgmr.msra.gmra.mrb[16].mxu1 %vm1199_vm4, %v1223_v40 }
 0x460   : > { %5773 = vmatpush3.bf16.xpose.msra.mxu1 %v1379_v41  ;;  %5774 = vmatprep.mubr.msk.bf16.mxu1 %vm6564_vm0, %v6563_v5 }
 0x461   : > { %5784 = vmatprep.subr.bf16.mxu1 %v6563_v5 }
 0x467   : > { %5775 = vmatmul.mubr.msk.bf16.vlgmr.msra.gmra.mrb[20].mxu1 %vm1104_vm1, %v1371_v42 }
 0x468   : > { %5786 = vmatprep.mubr.msk.bf16.mxu1 %vm6564_vm0, %v6563_v5 }
 0x4fd   : > { %v7228_v44 = vpop.f32.mrb[12].mxu1 }
 0x4fe   : > { %v5758_v45 = vpop.f32.mrb[13].mxu1 }
 0x4ff   : > { %v1268_v46 = vpop.f32.mrb[14].mxu1 }
 0x500   : > { %v5759_v49 = vpop.f32.mrb[15].mxu1 }
 0x527   : > { %v1363_v50 = vpop.f32.mrb[4].mxu0 }
 0x528   : > { %v1421_v53 = vsel %vm7187_vm3, %v1363_v50, -1e+30  ;;  %v5770_v54 = vpop.f32.mrb[5].mxu0 }
 0x529   : > { %v1366_v55 = vpop.f32.mrb[6].mxu0  ;;  %v1423_v56 = vsel %vm1199_vm4, %v1421_v53, -inf }
 0x52a   : > { %1424 = vmax.xlane.f32.xlu0 %v1423_v56  ;;  %v5771_v57 = vpop.f32.mrb[7].mxu0 }
 0x532   : > { %v7233_v59 = vpop.f32.mrb[16].mxu1 }
 0x533   : > { %v5764_v60 = vpop.f32.mrb[17].mxu1 }
 0x534   : > { %v1314_v61 = vpop.f32.mrb[18].mxu1 }
 0x535   : > { %v5765_v62 = vpop.f32.mrb[19].mxu1 }
 0x53a   : > { %v1415_v0 = vpop.f32.mrb[20].mxu1 }
 0x53b   : > { %v1422_v1 = vsel %vm7187_vm3, %v1415_v0, -1e+30  ;;  %v5776_v2 = vpop.f32.mrb[21].mxu1 }
 0x53c   : > { %v1418_v3 = vpop.f32.mrb[22].mxu1  ;;  %v1426_v6 = vsel %vm1199_vm4, %v1422_v1, -inf }
 0x53d   : > { %1427 = vmax.xlane.f32.xlu1 %v1426_v6  ;;  %v5777_v7 = vpop.f32.mrb[23].mxu1 }
 0x54e   : > { %1497 = vrot.lane.b32.xlu1 %v7209_v28, %s6565_s3 }
 0x552   : > { %1547 = vrot.lane.b32.xlu1 %v7155_v43, %s6566_s6 }
 0x556   : > { %1597 = vrot.lane.b32.xlu1 %v7160_v47, %s6566_s6 }
 0x55a   : > { %1595 = vrot.lane.b32.xlu1 %v7171_v51, %s6566_s6 }
 0x5b7   : > { %v1425_v8 = vpop.xlane.xlu0 %1424 }
 0x5b8   : > { %v1429_v9 = vsub.f32 %v1421_v53, %v1425_v8 }
 0x5ba   : > { %v1431_v10 = vmul.f32 1.442695, %v1429_v9 }
 0x5bc   : > { %6195 = vpow2.f32 %v1431_v10 }
 0x5c6   : > { %v6196_v11 = vpop.eup %6195 }
 0x5c7   : > { %v1435_v12 = vsel %vm1199_vm4, %v6196_v11, 0.0 }
 0x5c8   : > { %1436 = vadd.xlane.f32.xlu0 %v1435_v12 }
 0x5ca   : > { %v1428_v13 = vpop.xlane.xlu1 %1427 }
 0x5cb   : > { %v1430_v14 = vsub.f32 %v1422_v1, %v1428_v13 }
 0x5cd   : > { %v1433_v15 = vmul.f32 1.442695, %v1430_v14 }
 0x5ce   : > { %v1498_v16 = vpop.permute.xlu1 %1497 }
 0x5cf   : > { %6197 = vpow2.f32 %v1433_v15  ;;  %v1503_v17 = vsel %vm1227_vm2, %v1498_v16, 0 }
 0x5d0   : > { %5785 = vmatpush3.bf16.msra.mxu1 %v1503_v17 }
 0x5d1   : > { %5796 = vmatprep.subr.bf16.mxu1 %v6563_v5 }
 0x5d2   : > { %v1548_v26 = vpop.permute.xlu1 %1547 }
 0x5d3   : > { %v1553_v34 = vsel %vm1104_vm1, %v1548_v26, 0 }
 0x5d6   : > { %v1598_v31 = vpop.permute.xlu1 %1597 }
 0x5d7   : > { %v1603_v37 = vsel %vm1104_vm1, %v1598_v31, 0 }
 0x5d9   : > { %v6198_v18 = vpop.eup %6197 }
 0x5da   : > { %v1438_v19 = vsel %vm1199_vm4, %v6198_v18, 0.0  ;;  %v1596_v39 = vpop.permute.xlu1 %1595 }
 0x5db   : > { %1439 = vadd.xlane.f32.xlu0 %v1438_v19 }
 0x5f1   : > { %1448 = vrot.lane.b32.xlu0 %v7181_v58, %s6565_s3 }
 0x5f5   : > { %1545 = vrot.lane.b32.xlu0 %v7162_v48, %s6566_s6 }
 0x655   : > { %v1437_v20 = vpop.xlane.xlu0 %1436 }
 0x656   : > { %6199 = vrcp.f32 %v1437_v20 }
 0x660   : > { %v6200_v21 = vpop.eup %6199 }
 0x661   : > { %v1443_v23 = vmul.f32 %v6200_v21, %v6196_v11 }
 0x663   : > { %v1445_v27 = vpack.c.bf16 %v1443_v23, %v1443_v23 }
 0x668   : > { %v1440_v22 = vpop.xlane.xlu0 %1439 }
 0x669   : > { %6201 = vrcp.f32 %v1440_v22 }
 0x66c   : > { %v1449_v24 = vpop.permute.xlu0 %1448 }
 0x66d   : > { %v1454_v25 = vsel %vm1227_vm2, %v1449_v24, 0 }
 0x66e   : > { %5779 = vmatpush3.bf16.msra.mxu0 %v1454_v25 }
 0x66f   : > { %5790 = vmatprep.subr.bf16.mxu0 %v6563_v5 }
 0x670   : > { %v1546_v38 = vpop.permute.xlu0 %1545 }
 0x671   : > { %5781 = vmatmul.mubr.msk.bf16.vlgmr.msra.gmra.mrb[8].mxu0 %vm1199_vm4, %v1445_v27 }
 0x672   : > { %5792 = vmatprep.mubr.msk.bf16.mxu0 %vm6564_vm0, %v6563_v5 }
 0x673   : > { %v6202_v29 = vpop.eup %6201 }
 0x674   : > { %v1444_v30 = vmul.f32 %v6202_v29, %v6198_v18 }
 0x676   : > { %v1446_v35 = vpack.c.bf16 %v1444_v30, %v1444_v30 }
 0x677   : > { %5791 = vmatpush3.bf16.xpose.msra.mxu0 %v1553_v34 }
 0x678   : > { %5787 = vmatmul.mubr.msk.bf16.vlgmr.msra.gmra.mrb[24].mxu1 %vm1199_vm4, %v1446_v35  ;;  %5802 = vmatprep.subr.bf16.mxu0 %v6563_v5 }
 0x679   : > { %5797 = vmatpush3.bf16.xpose.msra.mxu1 %v1603_v37  ;;  %5798 = vmatprep.mubr.msk.bf16.mxu1 %vm6564_vm0, %v6563_v5 }
 0x67a   : > { %5808 = vmatprep.subr.bf16.mxu1 %v6563_v5 }
 0x67e   : > { %5793 = vmatmul.mubr.msk.bf16.vlgmr.msra.gmra.mrb[12].mxu0 %vm1104_vm1, %v1546_v38 }
 0x67f   : > { %5804 = vmatprep.mubr.msk.bf16.mxu0 %vm6564_vm0, %v6563_v5 }
 0x680   : > { %5799 = vmatmul.mubr.msk.bf16.vlgmr.msra.gmra.mrb[28].mxu1 %vm1104_vm1, %v1596_v39 }
 0x681   : > { %5810 = vmatprep.mubr.msk.bf16.mxu1 %vm6564_vm0, %v6563_v5 }
 0x744   : > { %v7272_v40 = vpop.f32.mrb[8].mxu0 }
 0x745   : > { %v5782_v41 = vpop.f32.mrb[9].mxu0 }
 0x746   : > { %v1493_v42 = vpop.f32.mrb[10].mxu0 }
 0x747   : > { %v5783_v45 = vpop.f32.mrb[11].mxu0 }
 0x74b   : > { %v7274_v46 = vpop.f32.mrb[24].mxu1 }
 0x74c   : > { %v6004_v49 = vpack.i.bf16 %v7274_v46, %v7272_v40  ;;  %v5788_v50 = vpop.f32.mrb[25].mxu1 }
 0x74d   : > { %v1542_v53 = vpop.f32.mrb[26].mxu1 }
 0x74e   : > { %v5789_v54 = vpop.f32.mrb[27].mxu1 }
 0x751   : > { %v1589_v55 = vpop.f32.mrb[12].mxu0 }
 0x752   : > { %v1645_v56 = vsel %vm7187_vm3, %v1589_v55, -1e+30  ;;  %v5794_v57 = vpop.f32.mrb[13].mxu0 }
 0x753   : > { %v1592_v60 = vpop.f32.mrb[14].mxu0  ;;  %v1639_v61 = vpop.f32.mrb[28].mxu1  ;;  %v1647_v62 = vsel %vm1199_vm4, %v1645_v56, -inf }
 0x754   : > { %v1646_v0 = vsel %vm7187_vm3, %v1639_v61, -1e+30  ;;  %1648 = vmax.xlane.f32.xlu0 %v1647_v62  ;;  %v5795_v1 = vpop.f32.mrb[15].mxu0  ;;  %v5800_v2 = vpop.f32.mrb[29].mxu1 }
 0x755   : > { %v1642_v3 = vpop.f32.mrb[30].mxu1  ;;  %v1650_v6 = vsel %vm1199_vm4, %v1646_v0, -inf }
 0x756   : > { %1651 = vmax.xlane.f32.xlu1 %v1650_v6  ;;  %v5801_v7 = vpop.f32.mrb[31].mxu1 }
 0x767   : > { %1719 = vrot.lane.b32.xlu1 %v7209_v28, %s6566_s6 }
 0x76b   : > { %1769 = vrot.lane.b32.xlu1 %v7155_v43, %s6567_s7 }
 0x76f   : > { %1819 = vrot.lane.b32.xlu1 %v7160_v47, %s6567_s7 }
 0x773   : > { %1817 = vrot.lane.b32.xlu1 %v7171_v51, %s6567_s7 }
 0x7e1   : > { %v1649_v8 = vpop.xlane.xlu0 %1648 }
 0x7e2   : > { %v1653_v9 = vsub.f32 %v1645_v56, %v1649_v8 }
 0x7e3   : > { %v1652_v10 = vpop.xlane.xlu1 %1651 }
 0x7e4   : > { %v1655_v11 = vmul.f32 1.442695, %v1653_v9  ;;  %v1654_v12 = vsub.f32 %v1646_v0, %v1652_v10 }
 0x7e6   : > { %6203 = vpow2.f32 %v1655_v11  ;;  %v1657_v13 = vmul.f32 1.442695, %v1654_v12 }
 0x7e7   : > { %v1720_v14 = vpop.permute.xlu1 %1719 }
 0x7e8   : > { %6205 = vpow2.f32 %v1657_v13  ;;  %v1725_v15 = vsel %vm1227_vm2, %v1720_v14, 0 }
 0x7e9   : > { %5809 = vmatpush3.bf16.msra.mxu1 %v1725_v15 }
 0x7ea   : > { %5820 = vmatprep.subr.bf16.mxu1 %v6563_v5 }
 0x7eb   : > { %v1770_v22 = vpop.permute.xlu1 %1769 }
 0x7ef   : > { %v1820_v27 = vpop.permute.xlu1 %1819 }
 0x7f0   : > { %v6204_v43 = vpop.eup %6203  ;;  %v1825_v30 = vsel %vm1104_vm1, %v1820_v27, 0  ;;  %v6058_v27 = vld [vmem:[%s7046_s14 + $0x38] sm:$0xff]  }
 0x7f1   : > { %v1659_v47 = vsel %vm1199_vm4, %v6204_v43, 0.0 }
 0x7f2   : > { %v6206_v16 = vpop.eup %6205  ;;  %1660 = vadd.xlane.f32.xlu0 %v1659_v47 }
 0x7f3   : > { %v1662_v51 = vsel %vm1199_vm4, %v6206_v16, 0.0  ;;  %v1818_v34 = vpop.permute.xlu1 %1817 }
 0x7f6   : > { %1663 = vadd.xlane.f32.xlu0 %v1662_v51 }
 0x80c   : > { %1671 = vrot.lane.b32.xlu0 %v7181_v58, %s6566_s6 }
 0x810   : > { %1767 = vrot.lane.b32.xlu0 %v7162_v48, %s6567_s7  ;;  %v1775_v48 = vsel %vm1104_vm1, %v1770_v22, 0  ;;  %v6053_v22 = vld [vmem:[%s7046_s14 + $0x10] sm:$0xff]  }
 0x87f   : > { %v1661_v17 = vpop.xlane.xlu0 %1660 }
 0x880   : > { %6207 = vrcp.f32 %v1661_v17 }
 0x883   : > { %v1664_v18 = vpop.xlane.xlu0 %1663 }
 0x884   : > { %6209 = vrcp.f32 %v1664_v18 }
 0x887   : > { %v1672_v19 = vpop.permute.xlu0 %1671 }
 0x888   : > { %v1677_v20 = vsel %vm1227_vm2, %v1672_v19, 0 }
 0x889   : > { %5803 = vmatpush3.bf16.msra.mxu0 %v1677_v20  ;;  %v6051_v20 = vld [vmem:[%s7046_s14] sm:$0xff]  }
 0x88a   : > { %v6208_v21 = vpop.eup %6207  ;;  %5814 = vmatprep.subr.bf16.mxu0 %v6563_v5 }
 0x88b   : > { %v1667_v23 = vmul.f32 %v6208_v21, %v6204_v43  ;;  %v1768_v31 = vpop.permute.xlu0 %1767  ;;  %v6052_v21 = vld [vmem:[%s7046_s14 + $0x8] sm:$0xff]  }
 0x88d   : > { %v1669_v24 = vpack.c.bf16 %v1667_v23, %v1667_v23  ;;  %v6054_v23 = vld [vmem:[%s7046_s14 + $0x18] sm:$0xff]  }
 0x88e   : > { %v6210_v25 = vpop.eup %6209 }
 0x88f   : > { %v1668_v26 = vmul.f32 %v6210_v25, %v6206_v16  ;;  %5805 = vmatmul.mubr.msk.bf16.vlgmr.msra.gmra.mrb[16].mxu0 %vm1199_vm4, %v1669_v24  ;;  %v6055_v24 = vld [vmem:[%s7046_s14 + $0x20] sm:$0xff]   ;;  %v6056_v25 = vld [vmem:[%s7046_s14 + $0x28] sm:$0xff]  }
 0x890   : > { %5816 = vmatprep.mubr.msk.bf16.mxu0 %vm6564_vm0, %v6563_v5 }
 0x891   : > { %v1670_v29 = vpack.c.bf16 %v1668_v26, %v1668_v26  ;;  %v6057_v26 = vld [vmem:[%s7046_s14 + $0x30] sm:$0xff]  }
 0x892   : > { %5815 = vmatpush3.bf16.xpose.msra.mxu0 %v1775_v48 }
 0x893   : > { %5811 = vmatmul.mubr.msk.bf16.vlgmr.msra.gmra.mrb[32].mxu1 %vm1199_vm4, %v1670_v29  ;;  %5826 = vmatprep.subr.bf16.mxu0 %v6563_v5 }
 0x894   : > { %5821 = vmatpush3.bf16.xpose.msra.mxu1 %v1825_v30  ;;  %5822 = vmatprep.mubr.msk.bf16.mxu1 %vm6564_vm0, %v6563_v5 }
 0x895   : > { %5832 = vmatprep.subr.bf16.mxu1 %v6563_v5 }
 0x899   : > { %5817 = vmatmul.mubr.msk.bf16.vlgmr.msra.gmra.mrb[20].mxu0 %vm1104_vm1, %v1768_v31 }
 0x89a   : > { %5828 = vmatprep.mubr.msk.bf16.mxu0 %vm6564_vm0, %v6563_v5 }
 0x89b   : > { %5823 = vmatmul.mubr.msk.bf16.vlgmr.msra.gmra.mrb[36].mxu1 %vm1104_vm1, %v1818_v34 }
 0x89c   : > { %5834 = vmatprep.mubr.msk.bf16.mxu1 %vm6564_vm0, %v6563_v5 }
 0x962   : > { %v1713_v35 = vpop.f32.mrb[16].mxu0 }
 0x963   : > { %v5806_v37 = vpop.f32.mrb[17].mxu0 }
 0x964   : > { %v1716_v38 = vpop.f32.mrb[18].mxu0 }
 0x965   : > { %v5807_v39 = vpop.f32.mrb[19].mxu0 }
 0x966   : > { %v1761_v41 = vpop.f32.mrb[32].mxu1 }
 0x967   : > { %v6009_v42 = vpack.i.bf16 %v1761_v41, %v1713_v35  ;;  %v5812_v45 = vpop.f32.mrb[33].mxu1 }
 0x968   : > { %v1764_v50 = vpop.f32.mrb[34].mxu1 }
 0x969   : > { %v5813_v53 = vpop.f32.mrb[35].mxu1 }
 0x96c   : > { %v1811_v54 = vpop.f32.mrb[20].mxu0 }
 0x96d   : > { %v1867_v55 = vsel %vm7187_vm3, %v1811_v54, -1e+30  ;;  %v5818_v56 = vpop.f32.mrb[21].mxu0 }
 0x96e   : > { %v1814_v57 = vpop.f32.mrb[22].mxu0  ;;  %v1861_v60 = vpop.f32.mrb[36].mxu1  ;;  %v1869_v61 = vsel %vm1199_vm4, %v1867_v55, -inf }
 0x96f   : > { %v1868_v62 = vsel %vm7187_vm3, %v1861_v60, -1e+30  ;;  %1870 = vmax.xlane.f32.xlu0 %v1869_v61  ;;  %v5819_v0 = vpop.f32.mrb[23].mxu0  ;;  %v5824_v1 = vpop.f32.mrb[37].mxu1 }
 0x970   : > { %v1864_v2 = vpop.f32.mrb[38].mxu1  ;;  %v1872_v3 = vsel %vm1199_vm4, %v1868_v62, -inf }
 0x971   : > { %1873 = vmax.xlane.f32.xlu1 %v1872_v3  ;;  %v5825_v6 = vpop.f32.mrb[39].mxu1 }
 0x982   : > { %1941 = vrot.lane.b32.xlu1 %v7209_v28, %s6567_s7 }
 0x986   : > { %6005 = vrot.lane.b32.xlu1 %v6004_v49, %s6567_s7 }
 0x98a   : > { %6010 = vrot.lane.b32.xlu1 %v6009_v42, %s6566_s6 }
 0x9fc   : > { %v1871_v63 = vpop.xlane.xlu0 %1870 }
 0x9fd   : > { %v1875_v7 = vsub.f32 %v1867_v55, %v1871_v63 }
 0x9fe   : > { %v1874_v8 = vpop.xlane.xlu1 %1873 }
 0x9ff   : > { %v1877_v9 = vmul.f32 1.442695, %v1875_v7  ;;  %v1876_v10 = vsub.f32 %v1868_v62, %v1874_v8 }
 0xa01   : > { %6211 = vpow2.f32 %v1877_v9  ;;  %v1879_v11 = vmul.f32 1.442695, %v1876_v10  ;;  %v6227_v9 = vld [vmem:[#allocation2] sm:$0xff] }
 0xa02   : > { %v1942_v12 = vpop.permute.xlu1 %1941 }
 0xa03   : > { %6213 = vpow2.f32 %v1879_v11  ;;  %v1947_v13 = vsel %vm1227_vm2, %v1942_v12, 0  ;;  %v6228_v11 = vld [vmem:[#allocation2 + $0x8] sm:$0xff] }
 0xa04   : > { %5833 = vmatpush3.bf16.msra.mxu1 %v1947_v13  ;;  %v2178_v13 = vld [vmem:[%s7048_s24] sm:$0xff] }
 0xa06   : > { %v6006_v41 = vpop.permute.xlu1 %6005 }
 0xa07   : > { %v6008_v45 = vunpack.i.h.bf16 %v6006_v41  ;;  %v6007_v50 = vunpack.i.l.bf16 %v6006_v41  ;;  %v2226_v41 = vld [vmem:[%s7048_s24 + $0x180] sm:$0xff] }
 0xa09   : > { %v2014_v55 = vsel %vm1104_vm1, %v7233_v59, %v6008_v45  ;;  %v2013_v56 = vsel %vm1104_vm1, %v7228_v44, %v6007_v50  ;;  %v5212_v59 = vld [vmem:[%s7938_s26] ss:$0 sm:$0xff]  ;;  %v2227_v45 = vld [vmem:[%s7048_s24 + $0x188] sm:$0xff] }
 0xa0a   : > { %v6011_v42 = vpop.permute.xlu1 %6010 }
 0xa0b   : > { %v6212_v28 = vpop.eup %6211  ;;  %v6013_v53 = vunpack.i.h.bf16 %v6011_v42 }
 0xa0c   : > { %v1881_v14 = vsel %vm1199_vm4, %v6212_v28, 0.0 }
 0xa0d   : > { %v6214_v15 = vpop.eup %6213  ;;  %1882 = vadd.xlane.f32.xlu0 %v1881_v14  ;;  %v2017_v62 = vsel %vm2015_vm5, %v2014_v55, %v6013_v53  ;;  %v2179_v14 = vld [vmem:[%s7048_s24 + $0x8] sm:$0xff] }
 0xa0e   : > { %v1884_v40 = vsel %vm1199_vm4, %v6214_v15, 0.0  ;;  %v2235_v53 = vld [vmem:[%s7048_s24 + $0x1c8] sm:$0xff] }
 0xa0f   : > { %v5274_v55 = vcombine.high %v2227_v45, %v2235_v53 }
 0xa11   : > { %1885 = vadd.xlane.f32.xlu0 %v1884_v40 }
 0xa27   : > { %1893 = vrot.lane.b32.xlu0 %v7181_v58, %s6567_s7 }
 0xa9a   : > { %v1883_v46 = vpop.xlane.xlu0 %1882 }
 0xa9b   : > { %6215 = vrcp.f32 %v1883_v46  ;;  %v2187_v46 = vld [vmem:[%s7048_s24 + $0x48] sm:$0xff] }
 0xa9e   : > { %v1886_v49 = vpop.xlane.xlu0 %1885 }
 0xa9f   : > { %6217 = vrcp.f32 %v1886_v49  ;;  %v2194_v49 = vld [vmem:[%s7048_s24 + $0x80] sm:$0xff] }
 0xaa2   : > { %v1894_v43 = vpop.permute.xlu0 %1893 }
 0xaa3   : > { %v1899_v47 = vsel %vm1227_vm2, %v1894_v43, 0  ;;  %v2202_v43 = vld [vmem:[%s7048_s24 + $0xc0] sm:$0xff] }
 0xaa4   : > { %5827 = vmatpush3.bf16.msra.mxu0 %v1899_v47  ;;  %v5225_v47 = vcombine.low %v2179_v14, %v2187_v46 }
 0xaa5   : > { %v6216_v16 = vpop.eup %6215  ;;  %5838 = vmatprep.subr.bf16.mxu0 %v6563_v5 }
 0xaa6   : > { %v1889_v51 = vmul.f32 %v6216_v16, %v6212_v28  ;;  %v2186_v28 = vld [vmem:[%s7048_s24 + $0x40] sm:$0xff]  ;;  %v5226_v16 = vcombine.high %v2179_v14, %v2187_v46 }
 0xaa7   : > { %v5224_v40 = vcombine.high %v2178_v13, %v2186_v28  ;;  %v2290_v46 = vld [vmem:[%s7048_s24 + $0x380] sm:$0xff] }
 0xaa8   : > { %v1891_v17 = vpack.c.bf16 %v1889_v51, %v1889_v51  ;;  %v5240_v51 = vcombine.high %v2194_v49, %v2202_v43 }
 0xaa9   : > { %v6218_v18 = vpop.eup %6217  ;;  %3030 = vmatprep.subr.bf16.mxu1 %v5224_v40 }
 0xaaa   : > { %v1890_v19 = vmul.f32 %v6218_v18, %v6214_v15  ;;  %5829 = vmatmul.mubr.msk.bf16.vlgmr.msra.gmra.mrb[24].mxu0 %vm1199_vm4, %v1891_v17  ;;  %v5223_v15 = vcombine.low %v2178_v13, %v2186_v28  ;;  %v2195_v17 = vld [vmem:[%s7048_s24 + $0x88] sm:$0xff] }
 0xaab   : > { %5854 = vmatprep.mubr.msk.bf16.mxu0 %vm6564_vm0, %v6563_v5  ;;  %5839 = vmatpush3.bf16.msra.mxu0 %v6051_v20  ;;  %v2203_v18 = vld [vmem:[%s7048_s24 + $0xc8] sm:$0xff] }
 0xaac   : > { %v1892_v58 = vpack.c.bf16 %v1890_v19, %v1890_v19  ;;  %5840 = vmatprep.subr.bf16.mxu0 %v6563_v5  ;;  %v5242_v19 = vcombine.high %v2195_v17, %v2203_v18  ;;  %v5241_v20 = vcombine.low %v2195_v17, %v2203_v18  ;;  %v2283_v28 = vld [vmem:[%s7048_s24 + $0x348] sm:$0xff] }
 0xaae   : > { %5835 = vmatmul.mubr.msk.bf16.vlgmr.msra.gmra.mrb[40].mxu1 %vm1199_vm4, %v1892_v58  ;;  %v5239_v58 = vcombine.low %v2194_v49, %v2202_v43  ;;  %v2298_v49 = vld [vmem:[%s7048_s24 + $0x3c0] sm:$0xff]  ;;  %v2291_v43 = vld [vmem:[%s7048_s24 + $0x388] sm:$0xff] }
 0xaaf   : > { %3062 = vmatprep.mubr.bf16.mxu1 %v6562_v4  ;;  %5841 = vmatpush3.bf16.msra.mxu0 %v6052_v21 }
 0xab0   : > { %5842 = vmatprep.subr.bf16.mxu0 %v6563_v5  ;;  %3031 = vmatpush1.bf16.msra.mxu1 %v5223_v15 }
 0xab1   : > { %3032 = vmatprep.subr.bf16.mxu1 %v5240_v51  ;;  %v5335_v51 = vcombine.low %v2290_v46, %v2298_v49 }
 0xab3   : > { %5843 = vmatpush3.bf16.msra.mxu0 %v6053_v22 }
 0xab4   : > { %5844 = vmatprep.subr.bf16.mxu0 %v6563_v5  ;;  %3033 = vmatpush1.bf16.msra.mxu1 %v5239_v58  ;;  %v2188_v58 = vld [vmem:[%s7048_s24 + $0x50] sm:$0xff] }
 0xab7   : > { %5845 = vmatpush3.bf16.msra.mxu0 %v6054_v23 }
 0xab8   : > { %5846 = vmatprep.subr.bf16.mxu0 %v6563_v5 }
 0xabb   : > { %5847 = vmatpush3.bf16.msra.mxu0 %v6055_v24 }
 0xabc   : > { %5848 = vmatprep.subr.bf16.mxu0 %v6563_v5 }
 0xabf   : > { %5849 = vmatpush3.bf16.msra.mxu0 %v6056_v25 }
 0xac0   : > { %5850 = vmatprep.subr.bf16.mxu0 %v6563_v5 }
 0xac3   : > { %5851 = vmatpush3.bf16.msra.mxu0 %v6057_v26 }
 0xac4   : > { %5852 = vmatprep.subr.bf16.mxu0 %v6563_v5  ;;  %v6012_v5 = vunpack.i.l.bf16 %v6011_v42  ;;  %v2234_v42 = vld [vmem:[%s7048_s24 + $0x1c0] sm:$0xff] }
 0xac5   : > { %v5272_v50 = vcombine.high %v2226_v41, %v2234_v42 }
 0xac6   : > { %v2016_v61 = vsel %vm2015_vm5, %v2013_v56, %v6012_v5  ;;  %v5271_v5 = vcombine.low %v2226_v41, %v2234_v42  ;;  %v2242_v56 = vld [vmem:[%s7048_s24 + $0x200] sm:$0xff] }
 0xac7   : > { %5853 = vmatpush3.bf16.msra.mxu0 %v6058_v27 }
 0xac8   : > { %3073 = vmatprep.subr.bf16.mxu0 %v5226_v16  ;;  %v2299_v16 = vld [vmem:[%s7048_s24 + $0x3c8] sm:$0xff] }
 0xac9   : > { %v5337_v17 = vcombine.low %v2291_v43, %v2299_v16  ;;  %v5338_v18 = vcombine.high %v2291_v43, %v2299_v16  ;;  %v2260_v16 = vld [vmem:[%s7048_s24 + $0x290] sm:$0xff] }
 0xb7d   : > { %v1935_v48 = vpop.f32.mrb[24].mxu0 }
 0xb7e   : > { %v5830_v29 = vpop.f32.mrb[25].mxu0 }
 0xb7f   : > { %v1938_v30 = vpop.f32.mrb[26].mxu0  ;;  %v2210_v29 = vld [vmem:[%s7048_s24 + $0x100] sm:$0xff] }
 0xb80   : > { %v5831_v31 = vpop.f32.mrb[27].mxu0  ;;  %v2218_v30 = vld [vmem:[%s7048_s24 + $0x140] sm:$0xff] }
 0xb81   : > { %v1983_v34 = vpop.f32.mrb[40].mxu1  ;;  %v2211_v31 = vld [vmem:[%s7048_s24 + $0x108] sm:$0xff] }
 0xb82   : > { %v6014_v35 = vpack.i.bf16 %v1983_v34, %v1935_v48  ;;  %v5836_v37 = vpop.f32.mrb[41].mxu1  ;;  %v5256_v34 = vcombine.high %v2210_v29, %v2218_v30 }
 0xb83   : > { %v1986_v38 = vpop.f32.mrb[42].mxu1  ;;  %v5255_v37 = vcombine.low %v2210_v29, %v2218_v30 }
 0xb84   : > { %6015 = vrot.lane.b32.xlu0 %v6014_v35, %s6565_s3  ;;  %v5837_v39 = vpop.f32.mrb[43].mxu1  ;;  %v2219_v35 = vld [vmem:[%s7048_s24 + $0x148] sm:$0xff]  ;;  %3034 = vmatprep.subr.bf16.mxu1 %v5256_v34  ;;  %s7947_s3 = sld [smem:[#allocation51_spill]] (!%p5482_p0) }
 0xb85   : > { %v5257_v38 = vcombine.low %v2211_v31, %v2219_v35  ;;  %v5258_v39 = vcombine.high %v2211_v31, %v2219_v35  ;;  %3035 = vmatpush1.bf16.msra.mxu1 %v5255_v37 }
 0xb86   : > { %3036 = vmatprep.subr.bf16.mxu1 %v5272_v50  ;;  %v5222_v50 = vld [vmem:[%s812_s28] ss:$0 sm:$0xff] }
 0xb89   : > { %3037 = vmatpush1.bf16.msra.mxu1 %v5271_v5  ;;  %v2204_v5 = vld [vmem:[%s7048_s24 + $0xd0] sm:$0xff] }
 0xbf6   : > { %v6016_v54 = vpop.permute.xlu0 %6015 }
 0xbf7   : > { %v6018_v57 = vunpack.i.h.bf16 %v6016_v54  ;;  %v6017_v60 = vunpack.i.l.bf16 %v6016_v54  ;;  %v5273_v54 = vcombine.low %v2227_v45, %v2235_v53 }
 0xbf9   : > { %v2020_v0 = vsel %vm2018_vm6, %v2017_v62, %v6018_v57  ;;  %v2019_v1 = vsel %vm2018_vm6, %v2016_v61, %v6017_v60  ;;  %v2250_v57 = vld [vmem:[%s7048_s24 + $0x240] sm:$0xff]  ;;  %v2243_v60 = vld [vmem:[%s7048_s24 + $0x208] sm:$0xff] }
 0xbfa   : > { %v2021_v2 = vpack.c.bf16 %v2020_v0, %v2019_v1  ;;  %v5288_v61 = vcombine.high %v2242_v56, %v2250_v57  ;;  %v2251_v62 = vld [vmem:[%s7048_s24 + $0x248] sm:$0xff]  ;;  %v5287_v0 = vcombine.low %v2242_v56, %v2250_v57 }
 0xbfb   : > { %v5289_v1 = vcombine.low %v2243_v60, %v2251_v62 }
 0xbfc   : > { %5855 = vmatmul.mubr.bf16.vlgmr.msra.gmra.mrb[28].mxu0 %v2021_v2  ;;  %v5290_v2 = vcombine.high %v2243_v60, %v2251_v62  ;;  %3038 = vmatprep.subr.bf16.mxu1 %v5288_v61  ;;  %v2212_v62 = vld [vmem:[%s7048_s24 + $0x110] sm:$0xff] }
 0xbfd   : > { %3105 = vmatprep.mubr.bf16.mxu0 %v6562_v4  ;;  %3074 = vmatpush1.bf16.msra.mxu0 %v5225_v47  ;;  %v5336_v47 = vcombine.high %v2290_v46, %v2298_v49 }
 0xbfe   : > { %3075 = vmatprep.subr.bf16.mxu0 %v5242_v19  ;;  %3039 = vmatpush1.bf16.msra.mxu1 %v5287_v0  ;;  %v2180_v19 = vld [vmem:[%s7048_s24 + $0x10] sm:$0xff] }
 0xbff   : > { %v2220_v0 = vld [vmem:[%s7048_s24 + $0x150] sm:$0xff] }
 0xc01   : > { %3076 = vmatpush1.bf16.msra.mxu0 %v5241_v20  ;;  %v2181_v20 = vld [vmem:[%s7048_s24 + $0x18] sm:$0xff] }
 0xc02   : > { %3077 = vmatprep.subr.bf16.mxu0 %v5258_v39  ;;  %v5221_v39 = vld [vmem:[%s809_s29] ss:$0 sm:$0xff] }
 0xc05   : > { %3078 = vmatpush1.bf16.msra.mxu0 %v5257_v38 }
 0xc06   : > { %3079 = vmatprep.subr.bf16.mxu0 %v5274_v55  ;;  %v2205_v55 = vld [vmem:[%s7048_s24 + $0xd8] sm:$0xff] }
 0xc09   : > { %3080 = vmatpush1.bf16.msra.mxu0 %v5273_v54  ;;  %v2197_v54 = vld [vmem:[%s7048_s24 + $0x98] sm:$0xff] }
 0xc0a   : > { %3081 = vmatprep.subr.bf16.mxu0 %v5290_v2  ;;  %v2221_v2 = vld [vmem:[%s7048_s24 + $0x158] sm:$0xff] }
 0xc0d   : > { %3082 = vmatpush1.bf16.msra.mxu0 %v5289_v1  ;;  %v2213_v1 = vld [vmem:[%s7048_s24 + $0x118] sm:$0xff] }
 0xccf   : > { %v2127_v3 = vpop.f32.mrb[28].mxu0 }
 0xcd0   : > { %v2128_v44 = vadd.f32 %v5212_v59, %v2127_v3  ;;  %v5856_v6 = vpop.f32.mrb[29].mxu0  ;;  %v2266_v3 = vld [vmem:[%s7048_s24 + $0x2c0] sm:$0xff] }
 0xcd1   : > { %v2130_v63 = vpop.f32.mrb[30].mxu0 }
 0xcd2   : > { %v2131_v7 = vadd.f32 %v5212_v59, %v2130_v63  ;;  %v5857_v8 = vpop.f32.mrb[31].mxu0  ;;  %v2134_v10 = vadd.f32 %v6227_v9, %v2128_v44  ;;  %v2258_v59 = vld [vmem:[%s7048_s24 + $0x280] sm:$0xff]  ;;  %v2259_v44 = vld [vmem:[%s7048_s24 + $0x288] sm:$0xff] }
 0xcd3   : > { %v5304_v6 = vcombine.high %v2258_v59, %v2266_v3  ;;  %v2267_v63 = vld [vmem:[%s7048_s24 + $0x2c8] sm:$0xff] }
 0xcd4   : > { %2138 = vadd.xlane.f32.xlu1 %v2134_v10  ;;  %v2135_v12 = vadd.f32 %v6228_v11, %v2131_v7  ;;  %v5303_v7 = vcombine.low %v2258_v59, %v2266_v3  ;;  %v5305_v8 = vcombine.low %v2259_v44, %v2267_v63  ;;  %v5306_v9 = vcombine.high %v2259_v44, %v2267_v63  ;;  %v2282_v11 = vld [vmem:[%s7048_s24 + $0x340] sm:$0xff]  ;;  %v2228_v63 = vld [vmem:[%s7048_s24 + $0x190] sm:$0xff] }
 0xcd5   : > { %3040 = vmatprep.subr.bf16.mxu1 %v5304_v6  ;;  %v5245_v3 = vcombine.low %v2197_v54, %v2205_v55  ;;  %v5260_v44 = vcombine.high %v2212_v62, %v2220_v0  ;;  %v5262_v6 = vcombine.high %v2213_v1, %v2221_v2 }
 0xcd6   : > { %2140 = vadd.xlane.f32.xlu0 %v2135_v12  ;;  %3083 = vmatprep.subr.bf16.mxu0 %v5306_v9  ;;  %v2237_v9 = vld [vmem:[%s7048_s24 + $0x1d8] sm:$0xff] }
 0xcd7   : > { %3041 = vmatpush1.bf16.msra.mxu1 %v5303_v7  ;;  %3084 = vmatpush1.bf16.msra.mxu0 %v5305_v8  ;;  %v2236_v7 = vld [vmem:[%s7048_s24 + $0x1d0] sm:$0xff]  ;;  %v2229_v8 = vld [vmem:[%s7048_s24 + $0x198] sm:$0xff] }
 0xcd8   : > { %v5275_v46 = vcombine.low %v2228_v63, %v2236_v7  ;;  %v5277_v49 = vcombine.low %v2229_v8, %v2237_v9 }
 0xd61   : > { %v2139_v21 = vpop.xlane.xlu1 %2138 }
 0xd62   : > { %v2143_v22 = vmul.f32 0.0078125, %v2139_v21  ;;  %v5227_v21 = vcombine.low %v2180_v19, %v2188_v58 }
 0xd63   : > { %v2141_v23 = vpop.xlane.xlu0 %2140 }
 0xd64   : > { %v7377_v24 = vsub.f32 %v2134_v10, %v2143_v22  ;;  %v2144_v25 = vmul.f32 0.0078125, %v2141_v23  ;;  %v2274_v10 = vld [vmem:[%s7048_s24 + $0x300] sm:$0xff]  ;;  %v5228_v22 = vcombine.high %v2180_v19, %v2188_v58  ;;  %v2189_v23 = vld [vmem:[%s7048_s24 + $0x58] sm:$0xff] }
 0xd65   : > { %v5320_v13 = vcombine.high %v2274_v10, %v2282_v11  ;;  %v5319_v14 = vcombine.low %v2274_v10, %v2282_v11  ;;  %v5259_v10 = vcombine.low %v2212_v62, %v2220_v0  ;;  %v5261_v11 = vcombine.low %v2213_v1, %v2221_v2  ;;  %v2198_v62 = vld [vmem:[%s7048_s24 + $0xa0] sm:$0xff]  ;;  %v2199_v1 = vld [vmem:[%s7048_s24 + $0xa8] sm:$0xff] }
 0xd66   : > { %v7379_v26 = vsub.f32 %v2135_v12, %v2144_v25  ;;  %v2147_v27 = vmul.f32 %v7377_v24, %v7377_v24  ;;  %v2275_v12 = vld [vmem:[%s7048_s24 + $0x308] sm:$0xff]  ;;  %v5229_v25 = vcombine.low %v2181_v20, %v2189_v23  ;;  %v2206_v0 = vld [vmem:[%s7048_s24 + $0xe0] sm:$0xff] }
 0xd67   : > { %v5321_v15 = vcombine.low %v2275_v12, %v2283_v28  ;;  %v5322_v40 = vcombine.high %v2275_v12, %v2283_v28  ;;  %3042 = vmatprep.subr.bf16.mxu1 %v5320_v13  ;;  %v5276_v12 = vcombine.high %v2228_v63, %v2236_v7  ;;  %v5278_v13 = vcombine.high %v2229_v8, %v2237_v9  ;;  %v2244_v28 = vld [vmem:[%s7048_s24 + $0x210] sm:$0xff]  ;;  %v2207_v2 = vld [vmem:[%s7048_s24 + $0xe8] sm:$0xff]  ;;  %v2214_v63 = vld [vmem:[%s7048_s24 + $0x120] sm:$0xff] }
 0xd68   : > { %2149 = vadd.xlane.f32.xlu0 %v2147_v27  ;;  %v2148_v48 = vmul.f32 %v7379_v26, %v7379_v26  ;;  %3043 = vmatpush1.bf16.msra.mxu1 %v5319_v14  ;;  %v5230_v27 = vcombine.high %v2181_v20, %v2189_v23  ;;  %v2252_v14 = vld [vmem:[%s7048_s24 + $0x250] sm:$0xff]  ;;  %v2222_v7 = vld [vmem:[%s7048_s24 + $0x160] sm:$0xff]  ;;  %v2215_v8 = vld [vmem:[%s7048_s24 + $0x128] sm:$0xff] }
 0xd69   : > { %3085 = vmatprep.subr.bf16.mxu0 %v5322_v40  ;;  %3044 = vmatprep.subr.bf16.mxu1 %v5336_v47  ;;  %v2253_v40 = vld [vmem:[%s7048_s24 + $0x258] sm:$0xff]  ;;  %v5292_v43 = vcombine.high %v2244_v28, %v2252_v14  ;;  %v5291_v19 = vcombine.low %v2244_v28, %v2252_v14  ;;  %v2284_v23 = vld [vmem:[%s7048_s24 + $0x350] sm:$0xff]  ;;  %v2223_v9 = vld [vmem:[%s7048_s24 + $0x168] sm:$0xff] }
 0xd6a   : > { %3086 = vmatpush1.bf16.msra.mxu0 %v5321_v15  ;;  %v2245_v15 = vld [vmem:[%s7048_s24 + $0x218] sm:$0xff]  ;;  %v2230_v28 = vld [vmem:[%s7048_s24 + $0x1a0] sm:$0xff] }
 0xd6b   : > { %3087 = vmatprep.subr.bf16.mxu0 %v5338_v18  ;;  %v5294_v47 = vcombine.high %v2245_v15, %v2253_v40  ;;  %v2269_v18 = vld [vmem:[%s7048_s24 + $0x2d8] sm:$0xff]  ;;  %v5293_v58 = vcombine.low %v2245_v15, %v2253_v40  ;;  %v2238_v14 = vld [vmem:[%s7048_s24 + $0x1e0] sm:$0xff]  ;;  %v2231_v15 = vld [vmem:[%s7048_s24 + $0x1a8] sm:$0xff] }
 0xd6c   : > { %2151 = vadd.xlane.f32.xlu0 %v2148_v48  ;;  %3045 = vmatpush1.bf16.msra.mxu1 %v5335_v51  ;;  %v2268_v51 = vld [vmem:[%s7048_s24 + $0x2d0] sm:$0xff]  ;;  %v2239_v40 = vld [vmem:[%s7048_s24 + $0x1e8] sm:$0xff] }
 0xd6d   : > { %3116 = vmatprep.subr.bf16.mxu1 %v5228_v22  ;;  %v5308_v20 = vcombine.high %v2260_v16, %v2268_v51  ;;  %v2276_v22 = vld [vmem:[%s7048_s24 + $0x310] sm:$0xff] }
 0xd6e   : > { %3088 = vmatpush1.bf16.msra.mxu0 %v5337_v17  ;;  %v2261_v17 = vld [vmem:[%s7048_s24 + $0x298] sm:$0xff] }
 0xd6f   : > { %3159 = vmatprep.subr.bf16.mxu0 %v5230_v27  ;;  %v2285_v27 = vld [vmem:[%s7048_s24 + $0x358] sm:$0xff] }
 0xdf5   : > { %v2150_v48 = vpop.xlane.xlu0 %2149 }
 0xdf6   : > { %v2153_v29 = vmul.f32 0.0078125, %v2150_v48  ;;  %v5307_v48 = vcombine.low %v2260_v16, %v2268_v51  ;;  %v2246_v16 = vld [vmem:[%s7048_s24 + $0x220] sm:$0xff] }
 0xdf7   : > { %v2254_v51 = vld [vmem:[%s7048_s24 + $0x260] sm:$0xff] }
 0xdf8   : > { %v2155_v30 = vadd.f32 1e-05, %v2153_v29  ;;  %v5309_v29 = vcombine.low %v2261_v17, %v2269_v18 }
 0xdf9   : > { %v2152_v31 = vpop.xlane.xlu0 %2151 }
 0xdfa   : > { %6219 = vrsqrt.f32 %v2155_v30  ;;  %v2154_v34 = vmul.f32 0.0078125, %v2152_v31  ;;  %v5324_v30 = vcombine.high %v2276_v22, %v2284_v23 }
 0xdfc   : > { %v2156_v35 = vadd.f32 1e-05, %v2154_v34  ;;  %v2292_v34 = vld [vmem:[%s7048_s24 + $0x390] sm:$0xff] }
 0xdfe   : > { %6221 = vrsqrt.f32 %v2156_v35  ;;  %v2300_v35 = vld [vmem:[%s7048_s24 + $0x3d0] sm:$0xff] }
 0xe04   : > { %v6220_v37 = vpop.eup %6219 }
 0xe05   : > { %v2159_v38 = vmul.f32 %v6220_v37, %v7377_v24  ;;  %v2196_v24 = vld [vmem:[%s7048_s24 + $0x90] sm:$0xff]  ;;  %v2293_v37 = vld [vmem:[%s7048_s24 + $0x398] sm:$0xff] }
 0xe06   : > { %v5244_v61 = vcombine.high %v2196_v24, %v2204_v5  ;;  %v5243_v59 = vcombine.low %v2196_v24, %v2204_v5  ;;  %v2183_v24 = vld [vmem:[%s7048_s24 + $0x28] sm:$0xff] }
 0xe07   : > { %v2167_v42 = vmul.f32 %v5221_v39, %v2159_v38  ;;  %v2301_v38 = vld [vmem:[%s7048_s24 + $0x3d8] sm:$0xff]  ;;  %v2191_v5 = vld [vmem:[%s7048_s24 + $0x68] sm:$0xff] }
 0xe08   : > { %v6222_v41 = vpop.eup %6221 }
 0xe09   : > { %v2160_v45 = vmul.f32 %v6222_v41, %v7379_v26  ;;  %v7429_v56 = vadd.f32 %v5222_v50, %v2167_v42  ;;  %v5246_v26 = vcombine.high %v2197_v54, %v2205_v55  ;;  %v5340_v42 = vcombine.high %v2292_v34, %v2300_v35 }
 0xe0a   : > { %v5339_v54 = vcombine.low %v2292_v34, %v2300_v35  ;;  %v5341_v55 = vcombine.low %v2293_v37, %v2301_v38  ;;  %v2278_v34 = vld [vmem:[%s7048_s24 + $0x320] sm:$0xff] }
 0xe0b   : > { %v2168_v53 = vmul.f32 %v5221_v39, %v2160_v45  ;;  %v5323_v39 = vcombine.low %v2276_v22, %v2284_v23  ;;  %v5342_v45 = vcombine.high %v2293_v37, %v2301_v38  ;;  %v2262_v22 = vld [vmem:[%s7048_s24 + $0x2a0] sm:$0xff]  ;;  %v2279_v37 = vld [vmem:[%s7048_s24 + $0x328] sm:$0xff] }
 0xe0c   : > { %v2270_v23 = vld [vmem:[%s7048_s24 + $0x2e0] sm:$0xff]  ;;  %v2287_v38 = vld [vmem:[%s7048_s24 + $0x368] sm:$0xff] }
 0xe0d   : > { %v7431_v57 = vadd.f32 %v5222_v50, %v2168_v53  ;;  %v2182_v50 = vld [vmem:[%s7048_s24 + $0x20] sm:$0xff] }
 0xe0e   : > { %v2190_v53 = vld [vmem:[%s7048_s24 + $0x60] sm:$0xff] }
 0xe0f   : > { %v7435_v60 = vpack.c.bf16 %v7431_v57, %v7429_v56  ;;  %v2286_v35 = vld [vmem:[%s7048_s24 + $0x360] sm:$0xff] }
 0xe11   : > { %3063 = vmatmul.mubr.bf16.vlgmr.msra.gmra.mrb[44].mxu1 %v7435_v60  ;;  %3106 = vmatmul.mubr.bf16.vlgmr.msra.gmra.mrb[32].mxu0 %v7435_v60 }
 0xe12   : > { %3117 = vmatpush1.bf16.msra.mxu1 %v5227_v21  ;;  %3160 = vmatpush1.bf16.msra.mxu0 %v5229_v25  ;;  %v5310_v21 = vcombine.high %v2261_v17, %v2269_v18  ;;  %v2277_v25 = vld [vmem:[%s7048_s24 + $0x318] sm:$0xff]  ;;  %v2247_v17 = vld [vmem:[%s7048_s24 + $0x228] sm:$0xff] }
 0xe13   : > { %3118 = vmatprep.subr.bf16.mxu1 %v5244_v61  ;;  %3161 = vmatprep.subr.bf16.mxu0 %v5246_v26  ;;  %v5326_v31 = vcombine.high %v2277_v25, %v2285_v27  ;;  %v5325_v41 = vcombine.low %v2277_v25, %v2285_v27  ;;  %v5232_v61 = vcombine.high %v2182_v50, %v2190_v53  ;;  %v2255_v18 = vld [vmem:[%s7048_s24 + $0x268] sm:$0xff] }
 0xe14   : > { %3148 = vmatprep.mubr.bf16.mxu1 %v6562_v4  ;;  %3191 = vmatprep.mubr.bf16.mxu0 %v6562_v4  ;;  %v5234_v26 = vcombine.high %v2183_v24, %v2191_v5  ;;  %v2263_v25 = vld [vmem:[%s7048_s24 + $0x2a8] sm:$0xff] }
 0xe15   : > { %v2271_v27 = vld [vmem:[%s7048_s24 + $0x2e8] sm:$0xff] }
 0xe16   : > { %3119 = vmatpush1.bf16.msra.mxu1 %v5243_v59  ;;  %3162 = vmatpush1.bf16.msra.mxu0 %v5245_v3  ;;  %v5231_v59 = vcombine.low %v2182_v50, %v2190_v53  ;;  %v5233_v3 = vcombine.low %v2183_v24, %v2191_v5  ;;  %v2294_v50 = vld [vmem:[%s7048_s24 + $0x3a0] sm:$0xff]  ;;  %v2295_v24 = vld [vmem:[%s7048_s24 + $0x3a8] sm:$0xff] }
 0xe17   : > { %3120 = vmatprep.subr.bf16.mxu1 %v5260_v44  ;;  %3163 = vmatprep.subr.bf16.mxu0 %v5262_v6  ;;  %v5248_v44 = vcombine.high %v2198_v62, %v2206_v0  ;;  %v5250_v6 = vcombine.high %v2199_v1, %v2207_v2  ;;  %v2302_v53 = vld [vmem:[%s7048_s24 + $0x3e0] sm:$0xff]  ;;  %v2303_v5 = vld [vmem:[%s7048_s24 + $0x3e8] sm:$0xff] }
 0xe1a   : > { %3121 = vmatpush1.bf16.msra.mxu1 %v5259_v10  ;;  %3164 = vmatpush1.bf16.msra.mxu0 %v5261_v11  ;;  %v5247_v10 = vcombine.low %v2198_v62, %v2206_v0  ;;  %v5249_v11 = vcombine.low %v2199_v1, %v2207_v2  ;;  %v2184_v62 = vld [vmem:[%s7048_s24 + $0x30] sm:$0xff]  ;;  %v2185_v1 = vld [vmem:[%s7048_s24 + $0x38] sm:$0xff] }
 0xe1b   : > { %3122 = vmatprep.subr.bf16.mxu1 %v5276_v12  ;;  %3165 = vmatprep.subr.bf16.mxu0 %v5278_v13  ;;  %v5264_v12 = vcombine.high %v2214_v63, %v2222_v7  ;;  %v5266_v13 = vcombine.high %v2215_v8, %v2223_v9  ;;  %v2192_v0 = vld [vmem:[%s7048_s24 + $0x70] sm:$0xff]  ;;  %v2193_v2 = vld [vmem:[%s7048_s24 + $0x78] sm:$0xff] }
 0xe1e   : > { %3123 = vmatpush1.bf16.msra.mxu1 %v5275_v46  ;;  %3166 = vmatpush1.bf16.msra.mxu0 %v5277_v49  ;;  %v5263_v46 = vcombine.low %v2214_v63, %v2222_v7  ;;  %v5265_v49 = vcombine.low %v2215_v8, %v2223_v9  ;;  %v2200_v63 = vld [vmem:[%s7048_s24 + $0xb0] sm:$0xff]  ;;  %v2201_v8 = vld [vmem:[%s7048_s24 + $0xb8] sm:$0xff] }
 0xe1f   : > { %3124 = vmatprep.subr.bf16.mxu1 %v5292_v43  ;;  %3167 = vmatprep.subr.bf16.mxu0 %v5294_v47  ;;  %v5280_v43 = vcombine.high %v2230_v28, %v2238_v14  ;;  %v5282_v47 = vcombine.high %v2231_v15, %v2239_v40  ;;  %v2208_v7 = vld [vmem:[%s7048_s24 + $0xf0] sm:$0xff]  ;;  %v2209_v9 = vld [vmem:[%s7048_s24 + $0xf8] sm:$0xff] }
 0xe22   : > { %3125 = vmatpush1.bf16.msra.mxu1 %v5291_v19  ;;  %3168 = vmatpush1.bf16.msra.mxu0 %v5293_v58  ;;  %v5279_v19 = vcombine.low %v2230_v28, %v2238_v14  ;;  %v5281_v58 = vcombine.low %v2231_v15, %v2239_v40  ;;  %v2216_v28 = vld [vmem:[%s7048_s24 + $0x130] sm:$0xff]  ;;  %v2217_v15 = vld [vmem:[%s7048_s24 + $0x138] sm:$0xff] }
 0xe23   : > { %3126 = vmatprep.subr.bf16.mxu1 %v5308_v20  ;;  %3169 = vmatprep.subr.bf16.mxu0 %v5310_v21  ;;  %v5296_v20 = vcombine.high %v2246_v16, %v2254_v51  ;;  %v5298_v21 = vcombine.high %v2247_v17, %v2255_v18  ;;  %v2224_v14 = vld [vmem:[%s7048_s24 + $0x170] sm:$0xff]  ;;  %v2225_v40 = vld [vmem:[%s7048_s24 + $0x178] sm:$0xff] }
 0xe26   : > { %3127 = vmatpush1.bf16.msra.mxu1 %v5307_v48  ;;  %3170 = vmatpush1.bf16.msra.mxu0 %v5309_v29  ;;  %v5295_v48 = vcombine.low %v2246_v16, %v2254_v51  ;;  %v5297_v29 = vcombine.low %v2247_v17, %v2255_v18  ;;  %v2232_v16 = vld [vmem:[%s7048_s24 + $0x1b0] sm:$0xff]  ;;  %v2233_v17 = vld [vmem:[%s7048_s24 + $0x1b8] sm:$0xff] }
 0xe27   : > { %3128 = vmatprep.subr.bf16.mxu1 %v5324_v30  ;;  %3171 = vmatprep.subr.bf16.mxu0 %v5326_v31  ;;  %v5312_v30 = vcombine.high %v2262_v22, %v2270_v23  ;;  %v5314_v31 = vcombine.high %v2263_v25, %v2271_v27  ;;  %v2240_v51 = vld [vmem:[%s7048_s24 + $0x1f0] sm:$0xff]  ;;  %v2241_v18 = vld [vmem:[%s7048_s24 + $0x1f8] sm:$0xff] }
 0xe2a   : > { %3129 = vmatpush1.bf16.msra.mxu1 %v5323_v39  ;;  %3172 = vmatpush1.bf16.msra.mxu0 %v5325_v41  ;;  %v5311_v39 = vcombine.low %v2262_v22, %v2270_v23  ;;  %v5313_v41 = vcombine.low %v2263_v25, %v2271_v27  ;;  %v2248_v22 = vld [vmem:[%s7048_s24 + $0x230] sm:$0xff]  ;;  %v2249_v25 = vld [vmem:[%s7048_s24 + $0x238] sm:$0xff] }
 0xe2b   : > { %3130 = vmatprep.subr.bf16.mxu1 %v5340_v42  ;;  %3173 = vmatprep.subr.bf16.mxu0 %v5342_v45  ;;  %v5328_v42 = vcombine.high %v2278_v34, %v2286_v35  ;;  %v5330_v45 = vcombine.high %v2279_v37, %v2287_v38  ;;  %v2256_v23 = vld [vmem:[%s7048_s24 + $0x270] sm:$0xff]  ;;  %v2257_v27 = vld [vmem:[%s7048_s24 + $0x278] sm:$0xff] }
 0xe2e   : > { %3131 = vmatpush1.bf16.msra.mxu1 %v5339_v54  ;;  %3174 = vmatpush1.bf16.msra.mxu0 %v5341_v55  ;;  %v5327_v54 = vcombine.low %v2278_v34, %v2286_v35  ;;  %v5329_v55 = vcombine.low %v2279_v37, %v2287_v38  ;;  %v2272_v34 = vld [vmem:[%s7048_s24 + $0x2f0] sm:$0xff]  ;;  %v2265_v35 = vld [vmem:[%s7048_s24 + $0x2b8] sm:$0xff]  ;;  %v5299_v38 = vcombine.low %v2248_v22, %v2256_v23 }
 0xe2f   : > { %3202 = vmatprep.subr.bf16.mxu1 %v5232_v61  ;;  %3245 = vmatprep.subr.bf16.mxu0 %v5234_v26  ;;  %v5344_v61 = vcombine.high %v2294_v50, %v2302_v53  ;;  %v5346_v26 = vcombine.high %v2295_v24, %v2303_v5  ;;  %v2273_v37 = vld [vmem:[%s7048_s24 + $0x2f8] sm:$0xff] }
 0xe31   : > { %3149 = vmatmul.mubr.bf16.vlgmr.msra.gmra.mrb[48].mxu1 %v7435_v60  ;;  %3192 = vmatmul.mubr.bf16.vlgmr.msra.gmra.mrb[36].mxu0 %v7435_v60 }
 0xe32   : > { %3203 = vmatpush1.bf16.msra.mxu1 %v5231_v59  ;;  %3246 = vmatpush1.bf16.msra.mxu0 %v5233_v3  ;;  %v5343_v59 = vcombine.low %v2294_v50, %v2302_v53  ;;  %v5345_v3 = vcombine.low %v2295_v24, %v2303_v5  ;;  %v2288_v50 = vld [vmem:[%s7048_s24 + $0x370] sm:$0xff]  ;;  %v2281_v53 = vld [vmem:[%s7048_s24 + $0x338] sm:$0xff] }
 0xe33   : > { %3204 = vmatprep.subr.bf16.mxu1 %v5248_v44  ;;  %3247 = vmatprep.subr.bf16.mxu0 %v5250_v6  ;;  %v5236_v44 = vcombine.high %v2184_v62, %v2192_v0  ;;  %v5238_v6 = vcombine.high %v2185_v1, %v2193_v2  ;;  %v2289_v24 = vld [vmem:[%s7048_s24 + $0x378] sm:$0xff] }
 0xe34   : > { %3234 = vmatprep.mubr.bf16.mxu1 %v6562_v4  ;;  %3277 = vmatprep.mubr.bf16.mxu0 %v6562_v4 }
 0xe36   : > { %3205 = vmatpush1.bf16.msra.mxu1 %v5247_v10  ;;  %3248 = vmatpush1.bf16.msra.mxu0 %v5249_v11  ;;  %v5235_v10 = vcombine.low %v2184_v62, %v2192_v0  ;;  %v5237_v11 = vcombine.low %v2185_v1, %v2193_v2  ;;  %v2304_v62 = vld [vmem:[%s7048_s24 + $0x3f0] sm:$0xff]  ;;  %v2297_v0 = vld [vmem:[%s7048_s24 + $0x3b8] sm:$0xff] }
 0xe37   : > { %3206 = vmatprep.subr.bf16.mxu1 %v5264_v12  ;;  %3249 = vmatprep.subr.bf16.mxu0 %v5266_v13  ;;  %v5252_v12 = vcombine.high %v2200_v63, %v2208_v7  ;;  %v5254_v13 = vcombine.high %v2201_v8, %v2209_v9  ;;  %v2305_v1 = vld [vmem:[%s7048_s24 + $0x3f8] sm:$0xff] }
 0xe3a   : > { %3207 = vmatpush1.bf16.msra.mxu1 %v5263_v46  ;;  %3250 = vmatpush1.bf16.msra.mxu0 %v5265_v49  ;;  %v5251_v46 = vcombine.low %v2200_v63, %v2208_v7  ;;  %v5253_v49 = vcombine.low %v2201_v8, %v2209_v9  ;;  %v5349_v63 = vcombine.low %v2297_v0, %v2305_v1  ;;  %v6059_v7 = vld [vmem:[%s7056_s18 + $0x40] sm:$0xff]  }
 0xe3b   : > { %3208 = vmatprep.subr.bf16.mxu1 %v5280_v43  ;;  %3251 = vmatprep.subr.bf16.mxu0 %v5282_v47  ;;  %v5268_v43 = vcombine.high %v2216_v28, %v2224_v14  ;;  %v5270_v47 = vcombine.high %v2217_v15, %v2225_v40  ;;  %v6060_v8 = vld [vmem:[%s7056_s18 + $0xc0] sm:$0xff]  }
 0xe3c   : > { %v6061_v9 = vld [vmem:[%s7056_s18] sm:$0xff]  }
 0xe3e   : > { %3209 = vmatpush1.bf16.msra.mxu1 %v5279_v19  ;;  %3252 = vmatpush1.bf16.msra.mxu0 %v5281_v58  ;;  %v5267_v19 = vcombine.low %v2216_v28, %v2224_v14  ;;  %v5269_v58 = vcombine.low %v2217_v15, %v2225_v40  ;;  %v6066_v28 = vld [vmem:[%s7056_s18 + $0x88] sm:$0xff]   ;;  %v6067_v14 = vld [vmem:[%s7056_s18 + $0x50] sm:$0xff]  }
 0xe3f   : > { %3210 = vmatprep.subr.bf16.mxu1 %v5296_v20  ;;  %3253 = vmatprep.subr.bf16.mxu0 %v5298_v21  ;;  %v5284_v20 = vcombine.high %v2232_v16, %v2240_v51  ;;  %v5286_v21 = vcombine.high %v2233_v17, %v2241_v18  ;;  %v6068_v15 = vld [vmem:[%s7056_s18 + $0xd0] sm:$0xff]  }
 0xe40   : > { %v6069_v40 = vld [vmem:[%s7056_s18 + $0x10] sm:$0xff]  }
 0xe42   : > { %3211 = vmatpush1.bf16.msra.mxu1 %v5295_v48  ;;  %3254 = vmatpush1.bf16.msra.mxu0 %v5297_v29  ;;  %v5283_v48 = vcombine.low %v2232_v16, %v2240_v51  ;;  %v5300_v29 = vcombine.high %v2248_v22, %v2256_v23  ;;  %v6075_v16 = vld [vmem:[%s7056_s18 + $0x60] sm:$0xff]   ;;  %v6083_v22 = vld [vmem:[%s7056_s18 + $0x70] sm:$0xff]  }
 0xe43   : > { %3212 = vmatprep.subr.bf16.mxu1 %v5312_v30  ;;  %3255 = vmatprep.subr.bf16.mxu0 %v5314_v31  ;;  %v5302_v30 = vcombine.high %v2249_v25, %v2257_v27  ;;  %v2264_v31 = vld [vmem:[%s7048_s24 + $0x2b0] sm:$0xff]  ;;  %v6076_v51 = vld [vmem:[%s7056_s18 + $0xe0] sm:$0xff]  }
 0xe44   : > { %v5315_v5 = vcombine.low %v2264_v31, %v2272_v34  ;;  %v6084_v23 = vld [vmem:[%s7056_s18 + $0xf0] sm:$0xff]  }
 0xe46   : > { %3213 = vmatpush1.bf16.msra.mxu1 %v5311_v39  ;;  %3256 = vmatpush1.bf16.msra.mxu0 %v5313_v41  ;;  %v5301_v39 = vcombine.low %v2249_v25, %v2257_v27  ;;  %v5316_v41 = vcombine.high %v2264_v31, %v2272_v34  ;;  %v6085_v25 = vld [vmem:[%s7056_s18 + $0x30] sm:$0xff]   ;;  %v6091_v31 = vld [vmem:[%s7056_s18 + $0x140] sm:$0xff]  }
 0xe47   : > { %3214 = vmatprep.subr.bf16.mxu1 %v5328_v42  ;;  %3257 = vmatprep.subr.bf16.mxu0 %v5330_v45  ;;  %v5318_v42 = vcombine.high %v2265_v35, %v2273_v37  ;;  %v2280_v45 = vld [vmem:[%s7048_s24 + $0x330] sm:$0xff]  ;;  %v6092_v34 = vld [vmem:[%s7056_s18 + $0x1c0] sm:$0xff]  }
 0xe48   : > { %v5331_v2 = vcombine.low %v2280_v45, %v2288_v50  ;;  %v6086_v27 = vld [vmem:[%s7056_s18 + $0xb0] sm:$0xff]  }
 0xe4a   : > { %3215 = vmatpush1.bf16.msra.mxu1 %v5327_v54  ;;  %3258 = vmatpush1.bf16.msra.mxu0 %v5329_v55  ;;  %v5317_v54 = vcombine.low %v2265_v35, %v2273_v37  ;;  %v5332_v55 = vcombine.high %v2280_v45, %v2288_v50  ;;  %v7574_v35 = vld [vmem:[%s7054_s27] sm:$0xff]  ;;  %v2324_v37 = vsub.s32 3, %v7144_v32 }
 0xe4b   : > { %3216 = vmatprep.subr.bf16.mxu1 %v5344_v61  ;;  %3259 = vmatprep.subr.bf16.mxu0 %v5346_v26  ;;  %v5334_v61 = vcombine.high %v2281_v53, %v2289_v24  ;;  %v2296_v26 = vld [vmem:[%s7048_s24 + $0x3b0] sm:$0xff]  ;;  %s7941_s24 = sld [smem:[#allocation45_spill]] }
 0xe4e   : > { %3217 = vmatpush1.bf16.msra.mxu1 %v5343_v59  ;;  %3260 = vmatpush1.bf16.msra.mxu0 %v5345_v3  ;;  %v5333_v59 = vcombine.low %v2281_v53, %v2289_v24  ;;  %v5348_v3 = vcombine.high %v2296_v26, %v2304_v62 }
 0xe4f   : > { %3288 = vmatprep.subr.bf16.mxu1 %v5236_v44  ;;  %3331 = vmatprep.subr.bf16.mxu0 %v5238_v6  ;;  %v5350_v44 = vcombine.high %v2297_v0, %v2305_v1  ;;  %v5347_v6 = vcombine.low %v2296_v26, %v2304_v62 }
 0xe51   : > { %3235 = vmatmul.mubr.bf16.vlgmr.msra.gmra.mrb[52].mxu1 %v7435_v60  ;;  %3278 = vmatmul.mubr.bf16.vlgmr.msra.gmra.mrb[40].mxu0 %v7435_v60 }
 0xe52   : > { %3289 = vmatpush1.bf16.msra.mxu1 %v5235_v10  ;;  %3332 = vmatpush1.bf16.msra.mxu0 %v5237_v11  ;;  %v6062_v10 = vld [vmem:[%s7056_s18 + $0x80] sm:$0xff]   ;;  %v6063_v11 = vld [vmem:[%s7056_s18 + $0x48] sm:$0xff]  }
 0xe53   : > { %3290 = vmatprep.subr.bf16.mxu1 %v5252_v12  ;;  %3333 = vmatprep.subr.bf16.mxu0 %v5254_v13  ;;  %v6064_v12 = vld [vmem:[%s7056_s18 + $0xc8] sm:$0xff]  }
 0xe54   : > { %3320 = vmatprep.mubr.bf16.mxu1 %v6562_v4  ;;  %3363 = vmatprep.mubr.bf16.mxu0 %v6562_v4  ;;  %v5285_v4 = vcombine.low %v2233_v17, %v2241_v18  ;;  %v6065_v13 = vld [vmem:[%s7056_s18 + $0x8] sm:$0xff]   ;;  %v6077_v17 = vld [vmem:[%s7056_s18 + $0x20] sm:$0xff]  }
 0xe55   : > { %v6078_v18 = vld [vmem:[%s7056_s18 + $0xa0] sm:$0xff]  }
 0xe56   : > { %3291 = vmatpush1.bf16.msra.mxu1 %v5251_v46  ;;  %3334 = vmatpush1.bf16.msra.mxu0 %v5253_v49  ;;  %v6070_v46 = vld [vmem:[%s7056_s18 + $0x90] sm:$0xff]   ;;  %v6072_v49 = vld [vmem:[%s7056_s18 + $0xd8] sm:$0xff]  }
 0xe57   : > { %3292 = vmatprep.subr.bf16.mxu1 %v5268_v43  ;;  %3335 = vmatprep.subr.bf16.mxu0 %v5270_v47  ;;  %v6073_v43 = vld [vmem:[%s7056_s18 + $0x18] sm:$0xff]  }
 0xe58   : > { %v6074_v47 = vld [vmem:[%s7056_s18 + $0x98] sm:$0xff]  }
 0xe5a   : > { %3293 = vmatpush1.bf16.msra.mxu1 %v5267_v19  ;;  %3336 = vmatpush1.bf16.msra.mxu0 %v5269_v58  ;;  %v6079_v19 = vld [vmem:[%s7056_s18 + $0x68] sm:$0xff]  }
 0xe5b   : > { %3294 = vmatprep.subr.bf16.mxu1 %v5284_v20  ;;  %3337 = vmatprep.subr.bf16.mxu0 %v5286_v21  ;;  %v6080_v58 = vld [vmem:[%s7056_s18 + $0xe8] sm:$0xff]  }
 0xe5c   : > { %v6081_v20 = vld [vmem:[%s7056_s18 + $0x28] sm:$0xff]  }
 0xe5d   : > { %v6082_v21 = vld [vmem:[%s7056_s18 + $0xa8] sm:$0xff]  }
 0xe5e   : > { %3295 = vmatpush1.bf16.msra.mxu1 %v5283_v48  ;;  %3338 = vmatpush1.bf16.msra.mxu0 %v5285_v4  ;;  %v6087_v48 = vld [vmem:[%s7056_s18 + $0x78] sm:$0xff]  }
 0xe5f   : > { %3296 = vmatprep.subr.bf16.mxu1 %v5300_v29  ;;  %3339 = vmatprep.subr.bf16.mxu0 %v5302_v30  ;;  %v6088_v4 = vld [vmem:[%s7056_s18 + $0xf8] sm:$0xff]  }
 0xe60   : > { %v6089_v29 = vld [vmem:[%s7056_s18 + $0x38] sm:$0xff]  }
 0xe61   : > { %v6090_v30 = vld [vmem:[%s7056_s18 + $0xb8] sm:$0xff]  }
 0xe62   : > { %3297 = vmatpush1.bf16.msra.mxu1 %v5299_v38  ;;  %3340 = vmatpush1.bf16.msra.mxu0 %v5301_v39  ;;  %v2313_v38 = vrot.slane %v7574_v35, %v7152_v36  ;;  %v2321_v39 = vrot.slane %v7574_v35, %v7178_v52 }
 0xe63   : > { %3298 = vmatprep.subr.bf16.mxu1 %v5316_v41  ;;  %3341 = vmatprep.subr.bf16.mxu0 %v5318_v42  ;;  %v2317_v41 = vrot.slane %v7574_v35, %v7147_v33  ;;  %v2325_v42 = vrot.slane %v7574_v35, %v2324_v37 }
 0xe66   : > { %3299 = vmatpush1.bf16.msra.mxu1 %v5315_v5  ;;  %3342 = vmatpush1.bf16.msra.mxu0 %v5317_v54 }
 0xe67   : > { %3300 = vmatprep.subr.bf16.mxu1 %v5332_v55  ;;  %3343 = vmatprep.subr.bf16.mxu0 %v5334_v61 }
 0xe6a   : > { %3301 = vmatpush1.bf16.msra.mxu1 %v5331_v2  ;;  %3344 = vmatpush1.bf16.msra.mxu0 %v5333_v59 }
 0xe6b   : > { %3302 = vmatprep.subr.bf16.mxu1 %v5348_v3  ;;  %3345 = vmatprep.subr.bf16.mxu0 %v5350_v44 }
 0xe6e   : > { %3303 = vmatpush1.bf16.msra.mxu1 %v5347_v6  ;;  %3346 = vmatpush1.bf16.msra.mxu0 %v5349_v63 }
 0xe6f   : > { %5546 = vmatprep.subr.bf16.mxu1 %v6059_v7  ;;  %5568 = vmatprep.subr.bf16.mxu0 %v6060_v8 }
 0xe71   : > { %3321 = vmatmul.mubr.bf16.vlgmr.msra.gmra.mrb[56].mxu1 %v7435_v60  ;;  %3364 = vmatmul.mubr.bf16.vlgmr.msra.gmra.mrb[44].mxu0 %v7435_v60  ;;  %v6071_v60 = vld [vmem:[%s7056_s18 + $0x58] sm:$0xff]  }
 0xe72   : > { %5547 = vmatpush3.bf16.msra.mxu1 %v6061_v9  ;;  %5569 = vmatpush3.bf16.msra.mxu0 %v6062_v10 }
 0xe73   : > { %5548 = vmatprep.subr.bf16.mxu1 %v6063_v11  ;;  %5570 = vmatprep.subr.bf16.mxu0 %v6064_v12 }
 0xe76   : > { %5549 = vmatpush3.bf16.msra.mxu1 %v6065_v13  ;;  %5571 = vmatpush3.bf16.msra.mxu0 %v6066_v28 }
 0xe77   : > { %5550 = vmatprep.subr.bf16.mxu1 %v6067_v14  ;;  %5572 = vmatprep.subr.bf16.mxu0 %v6068_v15 }
 0xe7a   : > { %5551 = vmatpush3.bf16.msra.mxu1 %v6069_v40  ;;  %5573 = vmatpush3.bf16.msra.mxu0 %v6070_v46  ;;  %v6093_v40 = vld [vmem:[%s7056_s18 + $0x100] sm:$0xff]  }
 0xe7b   : > { %5552 = vmatprep.subr.bf16.mxu1 %v6071_v60  ;;  %5574 = vmatprep.subr.bf16.mxu0 %v6072_v49  ;;  %v6094_v46 = vld [vmem:[%s7056_s18 + $0x180] sm:$0xff]   ;;  %v6095_v60 = vld [vmem:[%s7056_s18 + $0x148] sm:$0xff]  }
 0xe7c   : > { %v6096_v49 = vld [vmem:[%s7056_s18 + $0x1c8] sm:$0xff]  }
 0xe7e   : > { %5553 = vmatpush3.bf16.msra.mxu1 %v6073_v43  ;;  %5575 = vmatpush3.bf16.msra.mxu0 %v6074_v47  ;;  %v6097_v43 = vld [vmem:[%s7056_s18 + $0x108] sm:$0xff]  }
 0xe7f   : > { %5554 = vmatprep.subr.bf16.mxu1 %v6075_v16  ;;  %5576 = vmatprep.subr.bf16.mxu0 %v6076_v51  ;;  %v6098_v47 = vld [vmem:[%s7056_s18 + $0x188] sm:$0xff]   ;;  %v6099_v16 = vld [vmem:[%s7056_s18 + $0x150] sm:$0xff]  }
 0xe80   : > { %v6100_v51 = vld [vmem:[%s7056_s18 + $0x1d0] sm:$0xff]  }
 0xe82   : > { %5555 = vmatpush3.bf16.msra.mxu1 %v6077_v17  ;;  %5577 = vmatpush3.bf16.msra.mxu0 %v6078_v18  ;;  %v6101_v17 = vld [vmem:[%s7056_s18 + $0x110] sm:$0xff]  }
 0xe83   : > { %5556 = vmatprep.subr.bf16.mxu1 %v6079_v19  ;;  %5578 = vmatprep.subr.bf16.mxu0 %v6080_v58  ;;  %v6102_v18 = vld [vmem:[%s7056_s18 + $0x190] sm:$0xff]   ;;  %v6103_v19 = vld [vmem:[%s7056_s18 + $0x158] sm:$0xff]  }
 0xe84   : > { %v6104_v58 = vld [vmem:[%s7056_s18 + $0x1d8] sm:$0xff]  }
 0xe86   : > { %5557 = vmatpush3.bf16.msra.mxu1 %v6081_v20  ;;  %5579 = vmatpush3.bf16.msra.mxu0 %v6082_v21  ;;  %v6105_v20 = vld [vmem:[%s7056_s18 + $0x118] sm:$0xff]  }
 0xe87   : > { %5558 = vmatprep.subr.bf16.mxu1 %v6083_v22  ;;  %5580 = vmatprep.subr.bf16.mxu0 %v6084_v23  ;;  %v6106_v21 = vld [vmem:[%s7056_s18 + $0x198] sm:$0xff]   ;;  %v6107_v22 = vld [vmem:[%s7056_s18 + $0x160] sm:$0xff]  }
 0xe88   : > { %v6108_v23 = vld [vmem:[%s7056_s18 + $0x1e0] sm:$0xff]  }
 0xe8a   : > { %5559 = vmatpush3.bf16.msra.mxu1 %v6085_v25  ;;  %5581 = vmatpush3.bf16.msra.mxu0 %v6086_v27  ;;  %v6109_v25 = vld [vmem:[%s7056_s18 + $0x120] sm:$0xff]  }
 0xe8b   : > { %5560 = vmatprep.subr.bf16.mxu1 %v6087_v48  ;;  %5582 = vmatprep.subr.bf16.mxu0 %v6088_v4  ;;  %v6110_v27 = vld [vmem:[%s7056_s18 + $0x1a0] sm:$0xff]   ;;  %v6111_v48 = vld [vmem:[%s7056_s18 + $0x168] sm:$0xff]  }
 0xe8c   : > { %v6112_v4 = vld [vmem:[%s7056_s18 + $0x1e8] sm:$0xff]  }
 0xe8e   : > { %5561 = vmatpush3.bf16.msra.mxu1 %v6089_v29  ;;  %5583 = vmatpush3.bf16.msra.mxu0 %v6090_v30  ;;  %v2328_v29 = vsub.s32 4, %v7144_v32  ;;  %v2336_v30 = vsub.s32 6, %v7144_v32 }
 0xe8f   : > { %5590 = vmatprep.subr.bf16.mxu1 %v6091_v31  ;;  %5612 = vmatprep.subr.bf16.mxu0 %v6092_v34  ;;  %v2332_v31 = vsub.s32 5, %v7144_v32  ;;  %v2340_v34 = vsub.s32 7, %v7144_v32 }
 0xee4   : > { %v3064_v45 = vpop.f32.mrb[44].mxu1  ;;  %v3107_v50 = vpop.f32.mrb[32].mxu0 }
 0xee5   : > { %v3065_v53 = vadd.f32 %v3064_v45, %v2313_v38  ;;  %v3108_v24 = vadd.f32 %v3107_v50, %v2321_v39  ;;  %v3066_v5 = vpop.f32.mrb[45].mxu1  ;;  %v3109_v54 = vpop.f32.mrb[33].mxu0  ;;  %v6115_v45 = vld [vmem:[%s7056_s18 + $0x170] sm:$0xff]  }
 0xee6   : > { %v3067_v55 = vadd.f32 %v3066_v5, %v2317_v41  ;;  %v3110_v61 = vadd.f32 %v3109_v54, %v2325_v42  ;;  %v3068_v26 = vpop.f32.mrb[46].mxu1  ;;  %v3111_v62 = vpop.f32.mrb[34].mxu0  ;;  %v6116_v50 = vld [vmem:[%s7056_s18 + $0x1f0] sm:$0xff]  }
 0xee7   : > { %v3069_v0 = vadd.f32 %v3068_v26, %v2313_v38  ;;  %v3112_v1 = vadd.f32 %v3111_v62, %v2321_v39  ;;  %v3070_v2 = vpop.f32.mrb[47].mxu1  ;;  %v3113_v59 = vpop.f32.mrb[35].mxu0  ;;  %v3374_v6 = vmax.f32 %v3065_v53, 0.0  ;;  %v3376_v63 = vmax.f32 %v3108_v24, 0.0  ;;  %v6113_v38 = vld [vmem:[%s7056_s18 + $0x128] sm:$0xff]  }
 0xee8   : > { %v3071_v3 = vadd.f32 %v3070_v2, %v2317_v41  ;;  %v3114_v44 = vadd.f32 %v3113_v59, %v2325_v42  ;;  %v3375_v9 = vmax.f32 %v3067_v55, 0.0  ;;  %v3377_v10 = vmax.f32 %v3110_v61, 0.0  ;;  %v6114_v39 = vld [vmem:[%s7056_s18 + $0x1a8] sm:$0xff]   ;;  %v6117_v55 = vld [vmem:[%s7056_s18 + $0x130] sm:$0xff]   ;;  %v6119_v2 = vld [vmem:[%s7056_s18 + $0x178] sm:$0xff]  }
 0xee9   : > { %v3390_v7 = vmax.f32 %v3069_v0, 0.0  ;;  %v3392_v8 = vmax.f32 %v3112_v1, 0.0  ;;  %v2329_v41 = vrot.slane %v7574_v35, %v2328_v29  ;;  %v2337_v42 = vrot.slane %v7574_v35, %v2336_v30  ;;  %v6118_v61 = vld [vmem:[%s7056_s18 + $0x1b0] sm:$0xff]   ;;  %v6120_v59 = vld [vmem:[%s7056_s18 + $0x1f8] sm:$0xff]  }
 0xeea   : > { %v3391_v11 = vmax.f32 %v3071_v3, 0.0  ;;  %v3393_v12 = vmax.f32 %v3114_v44, 0.0  ;;  %v2333_v53 = vrot.slane %v7574_v35, %v2332_v31  ;;  %v2341_v24 = vrot.slane %v7574_v35, %v2340_v34 }
 0xeeb   : > { %v3406_v13 = vpack.c.bf16 %v3390_v7, %v3374_v6  ;;  %v3408_v28 = vpack.c.bf16 %v3392_v8, %v3376_v63 }
 0xeec   : > { %v3407_v14 = vpack.c.bf16 %v3391_v11, %v3375_v9  ;;  %v3409_v15 = vpack.c.bf16 %v3393_v12, %v3377_v10  ;;  %v6121_v12 = vld [vmem:[%s7056_s18 + $0x138] sm:$0xff]  }
 0xeee   : > { %4485 = vmatprep.mubr.bf16.mxu1 %v3407_v14  ;;  %4526 = vmatprep.mubr.bf16.mxu0 %v3409_v15 }
 0xeef   : > { %4486 = vmatmul.mubr.bf16.vlgmr.msra.gmra.mrb[60].mxu1 %v3406_v13  ;;  %4527 = vmatmul.mubr.bf16.vlgmr.msra.gmra.mrb[48].mxu0 %v3408_v28  ;;  %v6122_v13 = vld [vmem:[%s7056_s18 + $0x1b8] sm:$0xff]  }
 0xef0   : > { %5591 = vmatpush3.bf16.msra.mxu1 %v6093_v40  ;;  %5613 = vmatpush3.bf16.msra.mxu0 %v6094_v46  ;;  %v6123_v46 = vld [vmem:[%s7056_s18 + $0x240] sm:$0xff]  }
 0xef1   : > { %5592 = vmatprep.subr.bf16.mxu1 %v6095_v60  ;;  %5614 = vmatprep.subr.bf16.mxu0 %v6096_v49  ;;  %v6124_v60 = vld [vmem:[%s7056_s18 + $0x2c0] sm:$0xff]  }
 0xef4   : > { %5593 = vmatpush3.bf16.msra.mxu1 %v6097_v43  ;;  %5615 = vmatpush3.bf16.msra.mxu0 %v6098_v47 }
 0xef5   : > { %5594 = vmatprep.subr.bf16.mxu1 %v6099_v16  ;;  %5616 = vmatprep.subr.bf16.mxu0 %v6100_v51 }
 0xef8   : > { %5595 = vmatpush3.bf16.msra.mxu1 %v6101_v17  ;;  %5617 = vmatpush3.bf16.msra.mxu0 %v6102_v18 }
 0xef9   : > { %5596 = vmatprep.subr.bf16.mxu1 %v6103_v19  ;;  %5618 = vmatprep.subr.bf16.mxu0 %v6104_v58  ;;  %v6125_v58 = vld [vmem:[%s7056_s18 + $0x200] sm:$0xff]  }
 0xefc   : > { %5597 = vmatpush3.bf16.msra.mxu1 %v6105_v20  ;;  %5619 = vmatpush3.bf16.msra.mxu0 %v6106_v21  ;;  %v6126_v20 = vld [vmem:[%s7056_s18 + $0x280] sm:$0xff]   ;;  %v6127_v21 = vld [vmem:[%s7056_s18 + $0x248] sm:$0xff]  }
 0xefd   : > { %5598 = vmatprep.subr.bf16.mxu1 %v6107_v22  ;;  %5620 = vmatprep.subr.bf16.mxu0 %v6108_v23  ;;  %v6128_v22 = vld [vmem:[%s7056_s18 + $0x2c8] sm:$0xff]  }
 0xefe   : > { %v6129_v23 = vld [vmem:[%s7056_s18 + $0x208] sm:$0xff]  }
 0xf00   : > { %5599 = vmatpush3.bf16.msra.mxu1 %v6109_v25  ;;  %5621 = vmatpush3.bf16.msra.mxu0 %v6110_v27  ;;  %v6130_v25 = vld [vmem:[%s7056_s18 + $0x288] sm:$0xff]   ;;  %v6131_v27 = vld [vmem:[%s7056_s18 + $0x250] sm:$0xff]  }
 0xf01   : > { %5600 = vmatprep.subr.bf16.mxu1 %v6111_v48  ;;  %5622 = vmatprep.subr.bf16.mxu0 %v6112_v4  ;;  %v6132_v48 = vld [vmem:[%s7056_s18 + $0x2d0] sm:$0xff]  }
 0xf02   : > { %v6133_v4 = vld [vmem:[%s7056_s18 + $0x210] sm:$0xff]  }
 0xf04   : > { %v3150_v5 = vpop.f32.mrb[48].mxu1  ;;  %v3193_v54 = vpop.f32.mrb[36].mxu0  ;;  %5601 = vmatpush3.bf16.msra.mxu1 %v6113_v38  ;;  %5623 = vmatpush3.bf16.msra.mxu0 %v6114_v39  ;;  %v6134_v38 = vld [vmem:[%s7056_s18 + $0x290] sm:$0xff]   ;;  %v6135_v39 = vld [vmem:[%s7056_s18 + $0x258] sm:$0xff]  }
 0xf05   : > { %v3151_v26 = vadd.f32 %v3150_v5, %v2329_v41  ;;  %v3194_v62 = vadd.f32 %v3193_v54, %v2337_v42  ;;  %v3152_v0 = vpop.f32.mrb[49].mxu1  ;;  %v3195_v1 = vpop.f32.mrb[37].mxu0  ;;  %5602 = vmatprep.subr.bf16.mxu1 %v6115_v45  ;;  %5624 = vmatprep.subr.bf16.mxu0 %v6116_v50  ;;  %v6138_v45 = vld [vmem:[%s7056_s18 + $0x298] sm:$0xff]   ;;  %v6139_v50 = vld [vmem:[%s7056_s18 + $0x260] sm:$0xff]   ;;  %v6143_v54 = vld [vmem:[%s7056_s18 + $0x268] sm:$0xff]  }
 0xf06   : > { %v3153_v3 = vadd.f32 %v3152_v0, %v2333_v53  ;;  %v3196_v44 = vadd.f32 %v3195_v1, %v2341_v24  ;;  %v3154_v6 = vpop.f32.mrb[50].mxu1  ;;  %v3197_v35 = vpop.f32.mrb[38].mxu0  ;;  %v6142_v5 = vld [vmem:[%s7056_s18 + $0x2a0] sm:$0xff]  }
 0xf07   : > { %v3155_v63 = vadd.f32 %v3154_v6, %v2329_v41  ;;  %v3198_v7 = vadd.f32 %v3197_v35, %v2337_v42  ;;  %v3156_v8 = vpop.f32.mrb[51].mxu1  ;;  %v3199_v9 = vpop.f32.mrb[39].mxu0  ;;  %v3378_v28 = vmax.f32 %v3151_v26, 0.0  ;;  %v3380_v14 = vmax.f32 %v3194_v62, 0.0  ;;  %v6136_v41 = vld [vmem:[%s7056_s18 + $0x2d8] sm:$0xff]   ;;  %v6145_v26 = vld [vmem:[%s7056_s18 + $0x228] sm:$0xff]  }
 0xf08   : > { %v3157_v10 = vadd.f32 %v3156_v8, %v2333_v53  ;;  %v3200_v11 = vadd.f32 %v3199_v9, %v2341_v24  ;;  %5603 = vmatpush3.bf16.msra.mxu1 %v6117_v55  ;;  %5625 = vmatpush3.bf16.msra.mxu0 %v6118_v61  ;;  %v3379_v49 = vmax.f32 %v3153_v3, 0.0  ;;  %v3381_v43 = vmax.f32 %v3196_v44, 0.0  ;;  %v6137_v42 = vld [vmem:[%s7056_s18 + $0x218] sm:$0xff]   ;;  %v6140_v53 = vld [vmem:[%s7056_s18 + $0x2e0] sm:$0xff]   ;;  %v6144_v55 = vld [vmem:[%s7056_s18 + $0x2e8] sm:$0xff]  }
 0xf09   : > { %v3394_v15 = vmax.f32 %v3155_v63, 0.0  ;;  %v3396_v40 = vmax.f32 %v3198_v7, 0.0  ;;  %5604 = vmatprep.subr.bf16.mxu1 %v6119_v2  ;;  %5626 = vmatprep.subr.bf16.mxu0 %v6120_v59  ;;  %v6141_v24 = vld [vmem:[%s7056_s18 + $0x220] sm:$0xff]   ;;  %v7655_v61 = vld [vmem:[%s7054_s27 + $0x8] sm:$0xff]  ;;  %v6147_v2 = vld [vmem:[%s7056_s18 + $0x270] sm:$0xff]   ;;  %s7942_s27 = scalar_lea.vmem %s7941_s24, %s7064_s1 }
 0xf0a   : > { %v3395_v47 = vmax.f32 %v3157_v10, 0.0  ;;  %v3397_v16 = vmax.f32 %v3200_v11, 0.0  ;;  %v6146_v62 = vld [vmem:[%s7056_s18 + $0x2a8] sm:$0xff]   ;;  %v2345_v0 = vrot.slane %v7655_v61, %v7152_v36  ;;  %v2353_v1 = vrot.slane %v7655_v61, %v7178_v52  ;;  %v6148_v59 = vld [vmem:[%s7056_s18 + $0x2f0] sm:$0xff]   ;;  %v6151_v10 = vld [vmem:[%s7056_s18 + $0x278] sm:$0xff]  }
 0xf0b   : > { %v3410_v51 = vpack.c.bf16 %v3394_v15, %v3378_v28  ;;  %v3412_v17 = vpack.c.bf16 %v3396_v40, %v3380_v14  ;;  %v2349_v3 = vrot.slane %v7655_v61, %v7147_v33  ;;  %v2357_v44 = vrot.slane %v7655_v61, %v2324_v37  ;;  %v6149_v63 = vld [vmem:[%s7056_s18 + $0x230] sm:$0xff]   ;;  %v6152_v33 = vld [vmem:[%s7056_s18 + $0x2f8] sm:$0xff]  }
 0xf0c   : > { %v3411_v18 = vpack.c.bf16 %v3395_v47, %v3379_v49  ;;  %v3413_v19 = vpack.c.bf16 %v3397_v16, %v3381_v43  ;;  %5605 = vmatpush3.bf16.msra.mxu1 %v6121_v12  ;;  %5627 = vmatpush3.bf16.msra.mxu0 %v6122_v13  ;;  %v6150_v36 = vld [vmem:[%s7056_s18 + $0x2b0] sm:$0xff]   ;;  %v6153_v49 = vld [vmem:[%s7056_s18 + $0x238] sm:$0xff]  }
 0xf0d   : > { %5634 = vmatprep.subr.bf16.mxu1 %v6123_v46  ;;  %5656 = vmatprep.subr.bf16.mxu0 %v6124_v60  ;;  %v6154_v43 = vld [vmem:[%s7056_s18 + $0x2b8] sm:$0xff]  }
 0xf0e   : > { %4567 = vmatprep.mubr.bf16.mxu1 %v3411_v18  ;;  %4608 = vmatprep.mubr.bf16.mxu0 %v3413_v19  ;;  %v6155_v18 = vld [vmem:[%s7056_s18 + $0x340] sm:$0xff]  }
 0xf0f   : > { %4568 = vmatmul.mubr.bf16.vlgmr.msra.gmra.mrb[64].mxu1 %v3410_v51  ;;  %4609 = vmatmul.mubr.bf16.vlgmr.msra.gmra.mrb[52].mxu0 %v3412_v17  ;;  %v6156_v19 = vld [vmem:[%s7056_s18 + $0x3c0] sm:$0xff]  }
 0xf10   : > { %5635 = vmatpush3.bf16.msra.mxu1 %v6125_v58  ;;  %5657 = vmatpush3.bf16.msra.mxu0 %v6126_v20 }
 0xf11   : > { %5636 = vmatprep.subr.bf16.mxu1 %v6127_v21  ;;  %5658 = vmatprep.subr.bf16.mxu0 %v6128_v22 }
 0xf14   : > { %5637 = vmatpush3.bf16.msra.mxu1 %v6129_v23  ;;  %5659 = vmatpush3.bf16.msra.mxu0 %v6130_v25 }
 0xf15   : > { %5638 = vmatprep.subr.bf16.mxu1 %v6131_v27  ;;  %5660 = vmatprep.subr.bf16.mxu0 %v6132_v48 }
 0xf18   : > { %5639 = vmatpush3.bf16.msra.mxu1 %v6133_v4  ;;  %5661 = vmatpush3.bf16.msra.mxu0 %v6134_v38  ;;  %v6157_v4 = vld [vmem:[%s7056_s18 + $0x300] sm:$0xff]  }
 0xf19   : > { %5640 = vmatprep.subr.bf16.mxu1 %v6135_v39  ;;  %5662 = vmatprep.subr.bf16.mxu0 %v6136_v41  ;;  %v6158_v38 = vld [vmem:[%s7056_s18 + $0x380] sm:$0xff]   ;;  %v6159_v39 = vld [vmem:[%s7056_s18 + $0x348] sm:$0xff]  }
 0xf1a   : > { %v6160_v41 = vld [vmem:[%s7056_s18 + $0x3c8] sm:$0xff]  }
 0xf1c   : > { %5641 = vmatpush3.bf16.msra.mxu1 %v6137_v42  ;;  %5663 = vmatpush3.bf16.msra.mxu0 %v6138_v45  ;;  %v6161_v42 = vld [vmem:[%s7056_s18 + $0x308] sm:$0xff]  }
 0xf1d   : > { %5642 = vmatprep.subr.bf16.mxu1 %v6139_v50  ;;  %5664 = vmatprep.subr.bf16.mxu0 %v6140_v53  ;;  %v6162_v45 = vld [vmem:[%s7056_s18 + $0x388] sm:$0xff]   ;;  %v6163_v50 = vld [vmem:[%s7056_s18 + $0x350] sm:$0xff]  }
 0xf1e   : > { %v6164_v53 = vld [vmem:[%s7056_s18 + $0x3d0] sm:$0xff]  }
 0xf20   : > { %5643 = vmatpush3.bf16.msra.mxu1 %v6141_v24  ;;  %5665 = vmatpush3.bf16.msra.mxu0 %v6142_v5  ;;  %v6165_v24 = vld [vmem:[%s7056_s18 + $0x310] sm:$0xff]  }
 0xf21   : > { %5644 = vmatprep.subr.bf16.mxu1 %v6143_v54  ;;  %5666 = vmatprep.subr.bf16.mxu0 %v6144_v55  ;;  %v6166_v5 = vld [vmem:[%s7056_s18 + $0x390] sm:$0xff]   ;;  %v6167_v54 = vld [vmem:[%s7056_s18 + $0x358] sm:$0xff]  }
 0xf22   : > { %v6168_v55 = vld [vmem:[%s7056_s18 + $0x3d8] sm:$0xff]  }
 0xf24   : > { %v3236_v6 = vpop.f32.mrb[52].mxu1  ;;  %v3279_v35 = vpop.f32.mrb[40].mxu0  ;;  %5645 = vmatpush3.bf16.msra.mxu1 %v6145_v26  ;;  %5667 = vmatpush3.bf16.msra.mxu0 %v6146_v62  ;;  %v6169_v26 = vld [vmem:[%s7056_s18 + $0x318] sm:$0xff]  }
 0xf25   : > { %v3237_v7 = vadd.f32 %v3236_v6, %v2345_v0  ;;  %v3280_v8 = vadd.f32 %v3279_v35, %v2353_v1  ;;  %v3238_v52 = vpop.f32.mrb[53].mxu1  ;;  %v3281_v9 = vpop.f32.mrb[41].mxu0  ;;  %5646 = vmatprep.subr.bf16.mxu1 %v6147_v2  ;;  %5668 = vmatprep.subr.bf16.mxu0 %v6148_v59  ;;  %v6170_v62 = vld [vmem:[%s7056_s18 + $0x398] sm:$0xff]   ;;  %v6173_v2 = vld [vmem:[%s7056_s18 + $0x320] sm:$0xff]   ;;  %v6177_v6 = vld [vmem:[%s7056_s18 + $0x328] sm:$0xff]  }
 0xf26   : > { %v3239_v11 = vadd.f32 %v3238_v52, %v2349_v3  ;;  %v3282_v12 = vadd.f32 %v3281_v9, %v2357_v44  ;;  %v3240_v13 = vpop.f32.mrb[54].mxu1  ;;  %v3283_v37 = vpop.f32.mrb[42].mxu0  ;;  %v6174_v59 = vld [vmem:[%s7056_s18 + $0x3a0] sm:$0xff]   ;;  %v6178_v35 = vld [vmem:[%s7056_s18 + $0x3a8] sm:$0xff]   ;;  %v2365_v52 = vrot.slane %v7655_v61, %v2332_v31  ;;  %v2373_v9 = vrot.slane %v7655_v61, %v2340_v34  ;;  %v6184_v31 = vld [vmem:[%s7056_s18 + $0x3f8] sm:$0xff]  }
 0xf27   : > { %v3241_v28 = vadd.f32 %v3240_v13, %v2345_v0  ;;  %v3284_v14 = vadd.f32 %v3283_v37, %v2353_v1  ;;  %v3242_v15 = vpop.f32.mrb[55].mxu1  ;;  %v3285_v40 = vpop.f32.mrb[43].mxu0  ;;  %v3382_v47 = vmax.f32 %v3237_v7, 0.0  ;;  %v3384_v16 = vmax.f32 %v3280_v8, 0.0  ;;  %v6171_v0 = vld [vmem:[%s7056_s18 + $0x360] sm:$0xff]   ;;  %v6179_v7 = vld [vmem:[%s7056_s18 + $0x370] sm:$0xff]  }
 0xf28   : > { %v3243_v46 = vadd.f32 %v3242_v15, %v2349_v3  ;;  %v3286_v60 = vadd.f32 %v3285_v40, %v2357_v44  ;;  %5647 = vmatpush3.bf16.msra.mxu1 %v6149_v63  ;;  %5669 = vmatpush3.bf16.msra.mxu0 %v6150_v36  ;;  %v3383_v58 = vmax.f32 %v3239_v11, 0.0  ;;  %v3385_v20 = vmax.f32 %v3282_v12, 0.0  ;;  %v6172_v1 = vld [vmem:[%s7056_s18 + $0x3e0] sm:$0xff]   ;;  %v6175_v3 = vld [vmem:[%s7056_s18 + $0x368] sm:$0xff]   ;;  %v6180_v8 = vld [vmem:[%s7056_s18 + $0x3f0] sm:$0xff]  }
 0xf29   : > { %v3398_v51 = vmax.f32 %v3241_v28, 0.0  ;;  %v3400_v17 = vmax.f32 %v3284_v14, 0.0  ;;  %5648 = vmatprep.subr.bf16.mxu1 %v6151_v10  ;;  %5670 = vmatprep.subr.bf16.mxu0 %v6152_v33  ;;  %v6176_v44 = vld [vmem:[%s7056_s18 + $0x3e8] sm:$0xff]   ;;  %v2361_v63 = vrot.slane %v7655_v61, %v2328_v29  ;;  %v2369_v36 = vrot.slane %v7655_v61, %v2336_v30  ;;  %v6181_v29 = vld [vmem:[%s7056_s18 + $0x330] sm:$0xff]   ;;  %v6183_v28 = vld [vmem:[%s7056_s18 + $0x378] sm:$0xff]  }
 0xf2a   : > { %v3399_v21 = vmax.f32 %v3243_v46, 0.0  ;;  %v3401_v22 = vmax.f32 %v3286_v60, 0.0  ;;  %v6182_v11 = vld [vmem:[%s7056_s18 + $0x3b0] sm:$0xff]  }
 0xf2b   : > { %v3414_v23 = vpack.c.bf16 %v3398_v51, %v3382_v47  ;;  %v3416_v25 = vpack.c.bf16 %v3400_v17, %v3384_v16  ;;  %v6185_v47 = vld [vmem:[%s7056_s18 + $0x338] sm:$0xff]  }
 0xf2c   : > { %v3415_v27 = vpack.c.bf16 %v3399_v21, %v3383_v58  ;;  %v3417_v48 = vpack.c.bf16 %v3401_v22, %v3385_v20  ;;  %5649 = vmatpush3.bf16.msra.mxu1 %v6153_v49  ;;  %5671 = vmatpush3.bf16.msra.mxu0 %v6154_v43  ;;  %v6186_v16 = vld [vmem:[%s7056_s18 + $0x3b8] sm:$0xff]  }
 0xf2d   : > { %5678 = vmatprep.subr.bf16.mxu1 %v6155_v18  ;;  %5700 = vmatprep.subr.bf16.mxu0 %v6156_v19 }
 0xf2e   : > { %4649 = vmatprep.mubr.bf16.mxu1 %v3415_v27  ;;  %4690 = vmatprep.mubr.bf16.mxu0 %v3417_v48 }
 0xf2f   : > { %4650 = vmatmul.mubr.bf16.vlgmr.msra.gmra.mrb[68].mxu1 %v3414_v23  ;;  %4691 = vmatmul.mubr.bf16.vlgmr.msra.gmra.mrb[56].mxu0 %v3416_v25 }
 0xf30   : > { %5679 = vmatpush3.bf16.msra.mxu1 %v6157_v4  ;;  %5701 = vmatpush3.bf16.msra.mxu0 %v6158_v38 }
 0xf31   : > { %5680 = vmatprep.subr.bf16.mxu1 %v6159_v39  ;;  %5702 = vmatprep.subr.bf16.mxu0 %v6160_v41  ;;  %v5351_v39 = vld [vmem:[%s7942_s27] ss:$0 sm:$0xff] }
 0xf34   : > { %5681 = vmatpush3.bf16.msra.mxu1 %v6161_v42  ;;  %5703 = vmatpush3.bf16.msra.mxu0 %v6162_v45 }
 0xf35   : > { %5682 = vmatprep.subr.bf16.mxu1 %v6163_v50  ;;  %5704 = vmatprep.subr.bf16.mxu0 %v6164_v53 }
 0xf38   : > { %5683 = vmatpush3.bf16.msra.mxu1 %v6165_v24  ;;  %5705 = vmatpush3.bf16.msra.mxu0 %v6166_v5 }
 0xf39   : > { %5684 = vmatprep.subr.bf16.mxu1 %v6167_v54  ;;  %5706 = vmatprep.subr.bf16.mxu0 %v6168_v55 }
 0xf3c   : > { %5685 = vmatpush3.bf16.msra.mxu1 %v6169_v26  ;;  %5707 = vmatpush3.bf16.msra.mxu0 %v6170_v62 }
 0xf3d   : > { %5686 = vmatprep.subr.bf16.mxu1 %v6171_v0  ;;  %5708 = vmatprep.subr.bf16.mxu0 %v6172_v1 }
 0xf40   : > { %5687 = vmatpush3.bf16.msra.mxu1 %v6173_v2  ;;  %5709 = vmatpush3.bf16.msra.mxu0 %v6174_v59 }
 0xf41   : > { %5688 = vmatprep.subr.bf16.mxu1 %v6175_v3  ;;  %5710 = vmatprep.subr.bf16.mxu0 %v6176_v44 }
 0xf44   : > { %v3322_v10 = vpop.f32.mrb[56].mxu1  ;;  %v3365_v33 = vpop.f32.mrb[44].mxu0  ;;  %5689 = vmatpush3.bf16.msra.mxu1 %v6177_v6  ;;  %5711 = vmatpush3.bf16.msra.mxu0 %v6178_v35 }
 0xf45   : > { %v3323_v12 = vadd.f32 %v3322_v10, %v2361_v63  ;;  %v3366_v30 = vadd.f32 %v3365_v33, %v2369_v36  ;;  %v3324_v13 = vpop.f32.mrb[57].mxu1  ;;  %v3367_v37 = vpop.f32.mrb[45].mxu0  ;;  %5690 = vmatprep.subr.bf16.mxu1 %v6179_v7  ;;  %5712 = vmatprep.subr.bf16.mxu0 %v6180_v8 }
 0xf46   : > { %v3325_v14 = vadd.f32 %v3324_v13, %v2365_v52  ;;  %v3368_v32 = vadd.f32 %v3367_v37, %v2373_v9  ;;  %v3326_v15 = vpop.f32.mrb[58].mxu1  ;;  %v3369_v34 = vpop.f32.mrb[46].mxu0 }
 0xf47   : > { %v3327_v61 = vadd.f32 %v3326_v15, %v2361_v63  ;;  %v3370_v40 = vadd.f32 %v3369_v34, %v2369_v36  ;;  %v3328_v46 = vpop.f32.mrb[59].mxu1  ;;  %v3371_v60 = vpop.f32.mrb[47].mxu0  ;;  %v3386_v51 = vmax.f32 %v3323_v12, 0.0  ;;  %v3388_v17 = vmax.f32 %v3366_v30, 0.0 }
 0xf48   : > { %v3329_v49 = vadd.f32 %v3328_v46, %v2365_v52  ;;  %v3372_v43 = vadd.f32 %v3371_v60, %v2373_v9  ;;  %5691 = vmatpush3.bf16.msra.mxu1 %v6181_v29  ;;  %5713 = vmatpush3.bf16.msra.mxu0 %v6182_v11  ;;  %v3387_v58 = vmax.f32 %v3325_v14, 0.0  ;;  %v3389_v20 = vmax.f32 %v3368_v32, 0.0 }
 0xf49   : > { %v3402_v18 = vmax.f32 %v3327_v61, 0.0  ;;  %v3404_v19 = vmax.f32 %v3370_v40, 0.0  ;;  %5692 = vmatprep.subr.bf16.mxu1 %v6183_v28  ;;  %5714 = vmatprep.subr.bf16.mxu0 %v6184_v31 }
 0xf4a   : > { %v3403_v21 = vmax.f32 %v3329_v49, 0.0  ;;  %v3405_v22 = vmax.f32 %v3372_v43, 0.0 }
 0xf4b   : > { %v3418_v23 = vpack.c.bf16 %v3402_v18, %v3386_v51  ;;  %v3420_v25 = vpack.c.bf16 %v3404_v19, %v3388_v17 }
 0xf4c   : > { %v3419_v27 = vpack.c.bf16 %v3403_v21, %v3387_v58  ;;  %v3421_v48 = vpack.c.bf16 %v3405_v22, %v3389_v20  ;;  %5693 = vmatpush3.bf16.msra.mxu1 %v6185_v47  ;;  %5715 = vmatpush3.bf16.msra.mxu0 %v6186_v16 }
 0xf4e   : > { %4731 = vmatprep.mubr.bf16.mxu1 %v3419_v27  ;;  %4772 = vmatprep.mubr.bf16.mxu0 %v3421_v48 }
 0xf4f   : > { %4732 = vmatmul.mubr.bf16.vlgmr.msra.gmra.mrb[72].mxu1 %v3418_v23  ;;  %4773 = vmatmul.mubr.bf16.vlgmr.msra.gmra.mrb[60].mxu0 %v3420_v25 }
 0xfc2   : > { %v5562_v4 = vpop.f32.mrb[60].mxu1  ;;  %v5584_v38 = vpop.f32.mrb[48].mxu0 }
 0xfc3   : > { %v5563_v41 = vpop.f32.mrb[61].mxu1  ;;  %v5585_v42 = vpop.f32.mrb[49].mxu0 }
 0xfc4   : > { %v5564_v45 = vadd.f32 %v5563_v41, %v5562_v4  ;;  %v5586_v50 = vadd.f32 %v5585_v42, %v5584_v38  ;;  %v5565_v53 = vpop.f32.mrb[62].mxu1  ;;  %v5587_v24 = vpop.f32.mrb[50].mxu0 }
 0xfc5   : > { %v5566_v5 = vpop.f32.mrb[63].mxu1  ;;  %v5588_v54 = vpop.f32.mrb[51].mxu0 }
 0xfc6   : > { %v4488_v55 = vadd.f32 %v5564_v45, %v5351_v39  ;;  %v5567_v26 = vadd.f32 %v5566_v5, %v5565_v53  ;;  %v5589_v62 = vadd.f32 %v5588_v54, %v5587_v24 }
 0xfc8   : > { %v4529_v0 = vadd.f32 %v5586_v50, %v4488_v55  ;;  %v4491_v1 = vadd.f32 %v5567_v26, %v5351_v39 }
 0xfca   : > { %v4532_v2 = vadd.f32 %v5589_v62, %v4491_v1 }
 0xfe2   : > { %v5606_v59 = vpop.f32.mrb[64].mxu1  ;;  %v5628_v3 = vpop.f32.mrb[52].mxu0 }
 0xfe3   : > { %v5607_v44 = vpop.f32.mrb[65].mxu1  ;;  %v5629_v6 = vpop.f32.mrb[53].mxu0 }
 0xfe4   : > { %v5608_v35 = vadd.f32 %v5607_v44, %v5606_v59  ;;  %v5630_v63 = vadd.f32 %v5629_v6, %v5628_v3  ;;  %v5609_v36 = vpop.f32.mrb[66].mxu1  ;;  %v5631_v7 = vpop.f32.mrb[54].mxu0  ;;  %v5480_v3 = vld [vmem:[%s815_s17] ss:$0 sm:$0xff] }
 0xfe5   : > { %v5610_v8 = vpop.f32.mrb[67].mxu1  ;;  %v5632_v52 = vpop.f32.mrb[55].mxu0 }
 0xfe6   : > { %v4570_v9 = vadd.f32 %v5608_v35, %v4529_v0  ;;  %v5611_v10 = vadd.f32 %v5610_v8, %v5609_v36  ;;  %v5633_v33 = vadd.f32 %v5632_v52, %v5631_v7  ;;  %v5481_v35 = vld [vmem:[%s818_s2] ss:$0 sm:$0xff] }
 0xfe8   : > { %v4611_v29 = vadd.f32 %v5630_v63, %v4570_v9  ;;  %v4573_v11 = vadd.f32 %v5611_v10, %v4532_v2 }
 0xfea   : > { %v4614_v12 = vadd.f32 %v5633_v33, %v4573_v11 }
0x1002   : > { %v5650_v30 = vpop.f32.mrb[68].mxu1  ;;  %v5672_v13 = vpop.f32.mrb[56].mxu0 }
0x1003   : > { %v5651_v37 = vpop.f32.mrb[69].mxu1  ;;  %v5673_v28 = vpop.f32.mrb[57].mxu0 }
0x1004   : > { %v5652_v31 = vadd.f32 %v5651_v37, %v5650_v30  ;;  %v5674_v14 = vadd.f32 %v5673_v28, %v5672_v13  ;;  %v5653_v32 = vpop.f32.mrb[70].mxu1  ;;  %v5675_v15 = vpop.f32.mrb[58].mxu0 }
0x1005   : > { %v5654_v34 = vpop.f32.mrb[71].mxu1  ;;  %v5676_v61 = vpop.f32.mrb[59].mxu0 }
0x1006   : > { %v4652_v40 = vadd.f32 %v5652_v31, %v4611_v29  ;;  %v5655_v46 = vadd.f32 %v5654_v34, %v5653_v32  ;;  %v5677_v60 = vadd.f32 %v5676_v61, %v5675_v15  ;;  %v5483_v61 = vld [vmem:[%s7946_s5] ss:$0 sm:$0xff] (!%p5482_p0) }
0x1008   : > { %v4693_v49 = vadd.f32 %v5674_v14, %v4652_v40  ;;  %v4655_v43 = vadd.f32 %v5655_v46, %v4614_v12  ;;  %v5484_v46 = vld [vmem:[%s7947_s3] ss:$0 sm:$0xff] (!%p5482_p0) }
0x100a   : > { %v4696_v47 = vadd.f32 %v5677_v60, %v4655_v43 }
0x1022   : > { %v5694_v16 = vpop.f32.mrb[72].mxu1  ;;  %v5716_v51 = vpop.f32.mrb[60].mxu0 }
0x1023   : > { %v5695_v17 = vpop.f32.mrb[73].mxu1  ;;  %v5717_v18 = vpop.f32.mrb[61].mxu0 }
0x1024   : > { %v5696_v19 = vadd.f32 %v5695_v17, %v5694_v16  ;;  %v5718_v58 = vadd.f32 %v5717_v18, %v5716_v51  ;;  %v5697_v20 = vpop.f32.mrb[74].mxu1  ;;  %v5719_v21 = vpop.f32.mrb[62].mxu0 }
0x1025   : > { %v5698_v22 = vpop.f32.mrb[75].mxu1  ;;  %v5720_v23 = vpop.f32.mrb[63].mxu0 }
0x1026   : > { %v4734_v25 = vadd.f32 %v5696_v19, %v4693_v49  ;;  %v5699_v27 = vadd.f32 %v5698_v22, %v5697_v20  ;;  %v5721_v48 = vadd.f32 %v5720_v23, %v5719_v21 }
0x1028   : > { %v4775_v4 = vadd.f32 %v5718_v58, %v4734_v25  ;;  %v4737_v38 = vadd.f32 %v5699_v27, %v4696_v47 }
0x102a   : > { %v4778_v39 = vadd.f32 %v5721_v48, %v4737_v38  ;;  %v4781_v41 = vadd.f32 %v4775_v4, %v7429_v56 }
0x102c   : > { %4785 = vadd.xlane.f32.xlu1 %v4781_v41  ;;  %v4782_v42 = vadd.f32 %v4778_v39, %v7431_v57 }
0x102e   : > { %4787 = vadd.xlane.f32.xlu0 %v4782_v42 }
0x10b9   : > { %v4786_v45 = vpop.xlane.xlu1 %4785 }
0x10ba   : > { %v4789_v50 = vmul.f32 0.0078125, %v4786_v45 }
0x10bb   : > { %v4788_v53 = vpop.xlane.xlu0 %4787 }
0x10bc   : > { %v4791_v24 = vsub.f32 %v4781_v41, %v4789_v50  ;;  %v4790_v5 = vmul.f32 0.0078125, %v4788_v53 }
0x10be   : > { %v4792_v54 = vsub.f32 %v4782_v42, %v4790_v5  ;;  %v4793_v55 = vmul.f32 %v4791_v24, %v4791_v24 }
0x10c0   : > { %4795 = vadd.xlane.f32.xlu1 %v4793_v55  ;;  %v4794_v26 = vmul.f32 %v4792_v54, %v4792_v54 }
0x10c2   : > { %4797 = vadd.xlane.f32.xlu0 %v4794_v26 }
0x114d   : > { %v4796_v62 = vpop.xlane.xlu1 %4795 }
0x114e   : > { %v4799_v0 = vmul.f32 0.0078125, %v4796_v62 }
0x114f   : > { %v4798_v1 = vpop.xlane.xlu0 %4797 }
0x1150   : > { %v4801_v56 = vadd.f32 1e-05, %v4799_v0  ;;  %v4800_v2 = vmul.f32 0.0078125, %v4798_v1 }
0x1152   : > { %6223 = vrsqrt.f32 %v4801_v56  ;;  %v4802_v57 = vadd.f32 1e-05, %v4800_v2 }
0x1154   : > { %6225 = vrsqrt.f32 %v4802_v57 }
0x115c   : > { %v6224_v59 = vpop.eup %6223 }
0x115d   : > { %v4805_v44 = vmul.f32 %v6224_v59, %v4791_v24 }
0x115e   : > { %v6226_v6 = vpop.eup %6225 }
0x115f   : > { %v4813_v63 = vmul.f32 %v5480_v3, %v4805_v44  ;;  %v4806_v36 = vmul.f32 %v6226_v6, %v4792_v54  ;;  %4828 = sbr.rel (%p5482_p0) target bundleno = 4767 (0x129f), region = 112 }
0x1161   : > { %v4821_v7 = vadd.f32 %v5481_v35, %v4813_v63  ;;  %v4814_v8 = vmul.f32 %v5480_v3, %v4806_v36 }
0x1163   : > { %4823 = vst [vmem:[#allocation2] sm:$0xff] %v4821_v7  ;;  %v4822_v52 = vadd.f32 %v5481_v35, %v4814_v8  ;;  %4831 = vadd.xlane.f32.xlu0 (!%p5482_p0), %v4821_v7 }
0x1165   : > { %4824 = vst [vmem:[#allocation2 + $0x8] sm:$0xff] %v4822_v52 }
0x1167   : > { %4833 = vadd.xlane.f32.xlu0 %v4822_v52 }
0x11f0   : > { %v4832_v9 = vpop.xlane.xlu0 %4831 }
0x11f1   : > { %v4835_v10 = vmul.f32 0.0078125, %v4832_v9 }
0x11f3   : > { %v4837_v33 = vsub.f32 %v4821_v7, %v4835_v10 }
0x11f4   : > { %v4834_v29 = vpop.xlane.xlu0 %4833 }
0x11f5   : > { %v4836_v11 = vmul.f32 0.0078125, %v4834_v29  ;;  %v4839_v12 = vmul.f32 %v4837_v33, %v4837_v33 }
0x11f7   : > { %v4838_v30 = vsub.f32 %v4822_v52, %v4836_v11  ;;  %4841 = vadd.xlane.f32.xlu1 %v4839_v12 }
0x11f9   : > { %v4840_v13 = vmul.f32 %v4838_v30, %v4838_v30 }
0x11fb   : > { %4843 = vadd.xlane.f32.xlu1 %v4840_v13 }
0x1284   : > { %v4842_v37 = vpop.xlane.xlu1 %4841 }
0x1285   : > { %v4845_v28 = vmul.f32 0.0078125, %v4842_v37 }
0x1287   : > { %v4847_v31 = vadd.f32 1e-05, %v4845_v28 }
0x1288   : > { %v4844_v14 = vpop.xlane.xlu1 %4843 }
0x1289   : > { %6229 = vrsqrt.f32 %v4847_v31  ;;  %v4846_v32 = vmul.f32 0.0078125, %v4844_v14 }
0x128b   : > { %v4848_v15 = vadd.f32 1e-05, %v4846_v32 }
0x128d   : > { %6231 = vrsqrt.f32 %v4848_v15 }
0x1293   : > { %v6230_v34 = vpop.eup %6229 }
0x1294   : > { %v4851_v40 = vmul.f32 %v6230_v34, %v4837_v33 }
0x1296   : > { %v4859_v60 = vmul.f32 %v5483_v61, %v4851_v40 }
0x1297   : > { %v6232_v49 = vpop.eup %6231 }
0x1298   : > { %v4867_v43 = vadd.f32 %v5484_v46, %v4859_v60  ;;  %v4852_v47 = vmul.f32 %v6232_v49, %v4838_v30 }
0x129a   : > { %4869 = vst [vmem:[%s7098_s11] sm:$0xff] %v4867_v43  ;;  %v4860_v16 = vmul.f32 %v5483_v61, %v4852_v47 }
0x129c   : > { %v4868_v51 = vadd.f32 %v5484_v46, %v4860_v16 }
0x129e   : > { %4870 = vst [vmem:[%s7098_s11 + $0x8] sm:$0xff] %v4868_v51 }
0x129f PF: > { %s7948_s6 = sld [smem:[#allocation26_spill]]  ;;  %s7949_s7 = sld [smem:[#allocation35_spill]] }
0x12a0   : > { %s7950_s26 = sld [smem:[#allocation52_spill]]  ;;  %s4885_s10 = sshll.u32 %s7098_s11, 4  ;;  %s7753_s10 = int_to_ptr.vmem [resolvable:$true] %s4885_s10 }
0x12a1   : > { %s4872_s14 = scalar_lea.sflag [#allocation5], %s7026_s30  ;;  %s6413_s0 = scalar_lea.vmem %s7753_s10, 256 }
0x12a2   : > { %p6414_p9 = scmp.ne.s32.totalorder %s7753_s10, %s6413_s0  ;;  %s6568_s9 = smov [#allocation14]  }
0x12a3   : > { %s6417_s28 = sshll.u32 %s6568_s9, 4  ;;  %s6418_s28 = int_to_ptr.vmem [resolvable:$false] %s6417_s28 }
0x12a4   : > { %s6419_s29 = scalar_lea.vmem %s6418_s28, 512  ;;  %p6420_p1 = scmp.lt.s32.totalorder %s7753_s10, %s6418_s28 }
0x12a5   : > { %s5495_s19 = sshll.u32 %s7948_s6, 8  ;;  %p7952_p6 = scmp.ne.s32.totalorder %s7949_s7, 0 }
0x12a6   : > { %s7951_s4 = smov %s7950_s26  ;;  %s7750_s25 = scalar_lea.hbm %s7950_s26, %s5495_s19 }
0x12a7   : > { %p6415_p12 = pnand %p6414_p9, %p7952_p6  ;;  %p6421_p2 = scmp.lt.s32.totalorder %s6419_s29, %s6413_s0 }
0x12a9   : > { %p6416_p11 = pneg %p6415_p12  ;;  %p6422_p10 = por %p6421_p2, %p6420_p1 }
0x12ab   : > { %p6423_p8 = pnand %p6422_p10, %p6416_p11 }
0x12ad   : > { %6426 = shalt.err (!%p6423_p8)
}
0x12ae   : > { %s6427_s11 = scalar_lea.hbm %s7750_s25, 256  ;;  %s6431_s18 = scalar_lea.hbm %s7951_s4, 512 }
0x12af   : > { %p6428_p7 = scmp.ne.s32.totalorder %s7750_s25, %s6427_s11  ;;  %p6432_p3 = scmp.lt.u32.totalorder %s7750_s25, %s7951_s4 }
0x12b0   : > { %p6433_p5 = scmp.lt.u32.totalorder %s6431_s18, %s6427_s11  ;;  %p6435_p9 = scmp.lt.u32.totalorder %s6427_s11, %s7750_s25 }
0x12b1   : > { %p6429_p4 = pnand %p6428_p7, %p7952_p6 }
0x12b2   : > { %p6434_p0 = por %p6433_p5, %p6432_p3 }
0x12b3   : > { %p6430_p13 = pneg %p6429_p4 }
0x12b4   : > { %p6436_p12 = por %p6435_p9, %p6434_p0 }
0x12b6   : > { %p6437_p11 = pnand %p6436_p12, %p6430_p13 }
0x12b8   : > { %6440 = shalt.err (!%p6437_p11)
}
0x12b9   : > { %s6569_s13 = smov 128   ;;  %s6570_s20 = smov 8  }
0x12ba   : > { %5874 = dma.vmem_to_hbm [thread:$0]  (%p7952_p6), %s7753_s10, 256, %s7750_s25, %s4872_s14, %s6569_s13, %s6569_s13, %s6570_s20  }
0x12bb PF: > { %s7953_s15 = sld [smem:[#allocation29_spill]]  ;;  %s7954_s16 = sld [smem:[#allocation22_spill]] }
0x12bc   : > { %s7955_s1 = sld [smem:[#allocation36_spill]] }
0x12c1   : > { %p5900_p1 = scmp.ge.s32.totalorder %s7953_s15, 2  ;;  %s4900_s17 = sand.u32 1, %s7954_s16  }
0x12c2   : > { %p7956_p2 = scmp.ne.s32.totalorder %s7955_s1, 0  ;;  %s4901_s5 = scalar_lea.sflag [#allocation5], %s4900_s17 }
0x12c4   : > { %p5896_p10 = pnand %p5900_p1, %p7956_p2 }
0x12c6   : > { %6502 = dma.done.wait (!%p5896_p10), %s4901_s5, 256  }
0x12c7   : > { %6504 = vsyncadd (!%p5896_p10), %s4901_s5, 4294967040  ;;  %s40_s28 = sadd.s32 1, %s7953_s15   ;;  %s7957_s18 = sld [smem:[#allocation20_spill]] }
0x12c8   : > { %p37_p8 = scmp.ge.s32.totalorder %s40_s28, 6   ;;  %s7958_s19 = sld [smem:[#allocation21_spill]] }
0x12c9   : > { %s7959_s20 = sld [smem:[#allocation33_spill]]  ;;  %s7960_s21 = sld [smem:[#allocation23_spill]] }
0x12ca   : > { %s7961_s22 = sld [smem:[#allocation24_spill]]  ;;  %s7962_s23 = sld [smem:[#allocation34_spill]] }
0x12cb   : > { %s7963_s24 = sld [smem:[#allocation27_spill]]  ;;  %s7964_s25 = sld [smem:[#allocation28_spill]] }
0x12cc   : > { %s7965_s26 = sld [smem:[#allocation30_spill]]  ;;  %s7966_s27 = sld [smem:[#allocation32_spill]] }
0x12cd   :  { %39 = sbr.rel (!%p37_p8) target bundleno = 32 (0x20), region = 215 }
0x12d4   :  { %4906 = vsyncpa [#allocation4], 1 }
0x12d5   :  { %4908 = vsyncpa [#allocation4 + $0x1], 1 }
0x12d6   :  { %4909 = vsyncpa [#allocation7], 1 }
0x12d7   :  { %4911 = vsyncpa [#allocation7 + $0x1], 1 }
0x12d8   :  { %4912 = vsyncpa [#allocation10], 1 }
0x12d9   :  { %4914 = vsyncpa [#allocation10 + $0x1], 1 }
0x12da   :  { %4915 = vsyncpa [#allocation13], 1 }
0x12db   :  { %4917 = vsyncpa [#allocation13 + $0x1], 1 }
0x12dc   :  { %4918 = vsyncpa [#allocation5], 1 }
0x12dd   :  { %4920 = vsyncpa [#allocation5 + $0x1], 1 }

</bundles_post_ra>
